<compile_context>
chip_gen: v5e
topology: v5e:2x2
jax: 0.10.0
libtpu: 0.0.40
codegen_flags: <defaults>
</compile_context>

<pallas_src>
import numpy as np
import jax
import jax.numpy as jnp
from jax import lax
from jax.experimental import pallas as pl
from jax.experimental.pallas import tpu as pltpu

# ---- small, module-consistent sizes ----------------------------------------
N_EMBD = 128        # small stand-in for n_embd=384 (lane dim multiple of 128)
VOCAB = 256
N_LAYERS = 2        # small stand-in for n_layers=6
BATCH = 2
BLOCK_SIZE = 8      # T
LN_EPS = 1e-5       # nn.LayerNorm default


def _layernorm(y, w, b):
    mean = jnp.mean(y, axis=-1, keepdims=True)
    var = jnp.mean(jnp.square(y - mean), axis=-1, keepdims=True)
    return (y - mean) * lax.rsqrt(var + LN_EPS) * w + b


# ---------------------------------------------------------------------------
# Kernel 1: fused preload.  One (B*T, C) @ (C, 2*L*C) matmul; columns are
# [scale_0 | ... | scale_{L-1} | tok_0 | ... | tok_{L-1}].
# ---------------------------------------------------------------------------
def preload_kernel(seq_ref, w_ref, b_ref, lnw_ref, lnb_ref,
                   scales_ref, tok_ref):
    L = scales_ref.shape[0]
    C = seq_ref.shape[1]
    y = jnp.dot(seq_ref[...], w_ref[...], preferred_element_type=jnp.float32)
    y = y + b_ref[0, :]
    for l in range(L):
        scales_ref[l] = _layernorm(y[:, l * C:(l + 1) * C],
                                   lnw_ref[l, :], lnb_ref[l, :])
        tok_ref[l] = y[:, (L + l) * C:(L + l + 1) * C]


def preload(seq, w_all, b_all, ln_w, ln_b, n_layers):
    BT, C = seq.shape
    return pl.pallas_call(
        preload_kernel,
        out_shape=(jax.ShapeDtypeStruct((n_layers, BT, C), jnp.float32),
                   jax.ShapeDtypeStruct((n_layers, BT, C), jnp.float32)),
        grid_spec=pl.GridSpec(
            grid=(1,),
            in_specs=[
                pl.BlockSpec((BT, C), lambda i: (0, 0)),                    # seq
                pl.BlockSpec((C, 2 * n_layers * C), lambda i: (0, 0)),      # W_all
                pl.BlockSpec((1, 2 * n_layers * C), lambda i: (0, 0)),      # b_all
                pl.BlockSpec((n_layers, C), lambda i: (0, 0)),              # scale LN w
                pl.BlockSpec((n_layers, C), lambda i: (0, 0)),              # scale LN b
            ],
            out_specs=(pl.BlockSpec((n_layers, BT, C), lambda i: (0, 0, 0)),
                       pl.BlockSpec((n_layers, BT, C), lambda i: (0, 0, 0))),
        ),
        compiler_params=pltpu.CompilerParams(
            dimension_semantics=("arbitrary",)),
    )(seq, w_all, b_all, ln_w, ln_b)


# ---------------------------------------------------------------------------
# Kernel 2: time recurrence.  Single grid step; h carried through an unrolled
# fori_loop over T.  Per layer only the recurrent matmul h @ W_h remains.
# ---------------------------------------------------------------------------
def rnn_kernel(tok_ref, scales_ref, hw_ref, lnw_ref, lnb_ref, h_out_ref):
    L = tok_ref.shape[0]
    T, B, C = h_out_ref.shape

    # Hoist per-layer LN vectors out of the (unrolled) loops: JAX does not CSE
    # the broadcasts, so re-indexing the refs per iteration would re-emit them.
    ln_w = [lnw_ref[l, :] for l in range(L)]
    ln_b = [lnb_ref[l, :] for l in range(L)]

    def step(t, h):
        for l in range(L):
            y = tok_ref[l, t] + jnp.dot(h, hw_ref[l],
                                        preferred_element_type=jnp.float32)
            y = _layernorm(y, ln_w[l], ln_b[l])
            z = h + y * scales_ref[l, t]      # proj(...) * scale, residual
            h = z * jax.nn.sigmoid(z)         # F.silu
        h_out_ref[t] = h
        return h

    h0 = jnp.zeros((B, C), jnp.float32)
    lax.fori_loop(0, T, step, h0, unroll=True)


# ---------------------------------------------------------------------------
# Kernel 3: head projection, batched over all (T*B) rows, tiled over V.
# ---------------------------------------------------------------------------
def head_kernel(h_ref, w_ref, b_ref, o_ref):
    o_ref[...] = (jnp.dot(h_ref[...], w_ref[...],
                          preferred_element_type=jnp.float32)
                  + b_ref[0, :])


def head_matmul(h_flat, w_t, b, tile_v=1024):
    BT, C = h_flat.shape
    V = w_t.shape[1]
    tv = min(tile_v, V)
    assert V % tv == 0
    return pl.pallas_call(
        head_kernel,
        out_shape=jax.ShapeDtypeStruct((BT, V), jnp.float32),
        grid_spec=pl.GridSpec(
            grid=(V // tv,),
            in_specs=[
                pl.BlockSpec((BT, C), lambda j: (0, 0)),   # H (shared)
                pl.BlockSpec((C, tv), lambda j: (0, j)),   # head W^T tile
                pl.BlockSpec((1, tv), lambda j: (0, j)),   # head b tile
            ],
            out_specs=pl.BlockSpec((BT, tv), lambda j: (0, j)),
        ),
        compiler_params=pltpu.CompilerParams(
            dimension_semantics=("parallel",)),
    )(h_flat, w_t, b.reshape(1, V))


# ---------------------------------------------------------------------------
# Forward wrapper
# ---------------------------------------------------------------------------
def ssrnn_forward(idx, params):
    emb_w = params["emb_w"]                     # (V, C); tied with head weight
    B, T = idx.shape
    V, C = emb_w.shape
    L = params["proj_w"].shape[0]

    emb = emb_w[idx]                            # (B, T, C) embedding gather (glue)
    emb_t = jnp.transpose(emb, (1, 0, 2))       # (T, B, C) time-major
    seq = emb_t.reshape(T * B, C)

    # Column-concatenated preload weights: (in=C, L*out) per group, layer-major.
    w_scale = jnp.transpose(params["scale_w"], (2, 0, 1)).reshape(C, L * C)
    w_tok = jnp.transpose(params["proj_w"][:, :, :C], (2, 0, 1)).reshape(C, L * C)
    w_all = jnp.concatenate([w_scale, w_tok], axis=1)                  # (C, 2LC)
    b_all = jnp.concatenate([params["scale_b"].reshape(-1),
                             params["proj_b"].reshape(-1)]
                            ).reshape(1, 2 * L * C)

    scales_flat, tok_flat = preload(seq, w_all, b_all,
                                    params["scale_ln_w"],
                                    params["scale_ln_b"], L)
    scales = scales_flat.reshape(L, T, B, C)     # free reshape (time-major)
    tokpart = tok_flat.reshape(L, T, B, C)

    hw = jnp.transpose(params["proj_w"][:, :, C:], (0, 2, 1))          # (L, C, C)

    h_all = pl.pallas_call(
        rnn_kernel,
        out_shape=jax.ShapeDtypeStruct((T, B, C), jnp.float32),
        grid_spec=pl.GridSpec(
            grid=(1,),
            in_specs=[
                pl.BlockSpec((L, T, B, C), lambda i: (0, 0, 0, 0)),    # tokpart
                pl.BlockSpec((L, T, B, C), lambda i: (0, 0, 0, 0)),    # scales
                pl.BlockSpec((L, C, C), lambda i: (0, 0, 0)),          # proj W_h^T
                pl.BlockSpec((L, C), lambda i: (0, 0)),                # proj LN w
                pl.BlockSpec((L, C), lambda i: (0, 0)),                # proj LN b
            ],
            out_specs=pl.BlockSpec((T, B, C), lambda i: (0, 0, 0)),
        ),
        compiler_params=pltpu.CompilerParams(
            dimension_semantics=("arbitrary",)),
    )(tokpart, scales, hw, params["proj_ln_w"], params["proj_ln_b"])

    logits_flat = head_matmul(h_all.reshape(T * B, C), emb_w.T, params["head_b"])
    logits = jnp.transpose(logits_flat.reshape(T, B, V), (1, 0, 2))    # (B, T, V)
    return logits, None                                                # targets=None


# ---------------------------------------------------------------------------
# Deterministic parameter init mirroring Model._init_weights.
# ---------------------------------------------------------------------------
def init_params(key, vocab, n_embd, n_layers):
    std = 0.02 / (2 * (n_layers ** 0.5))
    k0, k1, k2 = jax.random.split(key, 3)
    return {
        "emb_w": std * jax.random.normal(k0, (vocab, n_embd), jnp.float32),
        "scale_w": std * jax.random.normal(k1, (n_layers, n_embd, n_embd), jnp.float32),
        "scale_b": jnp.zeros((n_layers, n_embd), jnp.float32),
        "scale_ln_w": jnp.ones((n_layers, n_embd), jnp.float32),
        "scale_ln_b": jnp.zeros((n_layers, n_embd), jnp.float32),
        "proj_w": std * jax.random.normal(k2, (n_layers, n_embd, 2 * n_embd), jnp.float32),
        "proj_b": jnp.zeros((n_layers, n_embd), jnp.float32),
        "proj_ln_w": jnp.ones((n_layers, n_embd), jnp.float32),
        "proj_ln_b": jnp.zeros((n_layers, n_embd), jnp.float32),
        "head_b": jnp.zeros((vocab,), jnp.float32),
    }


# Pure-JAX reference (mirrors the PyTorch forward) for correctness checking.
def reference_forward(idx, params):
    emb = params["emb_w"][idx]
    B, T, C = emb.shape
    L = params["proj_w"].shape[0]
    seq = emb.reshape(B * T, C)
    scales = []
    for l in range(L):
        y = seq @ params["scale_w"][l].T + params["scale_b"][l]
        y = _layernorm(y, params["scale_ln_w"][l], params["scale_ln_b"][l])
        scales.append(y.reshape(B, T, C))
    h = jnp.zeros((B, C), jnp.float32)
    logits = []
    for t in range(T):
        token = emb[:, t, :]
        for l in range(L):
            x = jnp.concatenate([token, h], axis=1)
            y = x @ params["proj_w"][l].T + params["proj_b"][l]
            y = _layernorm(y, params["proj_ln_w"][l], params["proj_ln_b"][l])
            z = h + y * scales[l][:, t, :]
            h = z * jax.nn.sigmoid(z)
        logits.append(h @ params["emb_w"].T + params["head_b"])
    return jnp.stack(logits, axis=1)


if __name__ == "__main__":
    key = jax.random.PRNGKey(0)
    pkey, ikey = jax.random.split(key)
    params = init_params(pkey, VOCAB, N_EMBD, N_LAYERS)
    idx = jax.random.randint(ikey, (BATCH, BLOCK_SIZE), 0, VOCAB, dtype=jnp.int32)

    logits, loss = jax.jit(ssrnn_forward)(idx, params)
    logits = jax.block_until_ready(logits)

    ref = reference_forward(idx, params)
    assert logits.shape == (BATCH, BLOCK_SIZE, VOCAB)
    assert loss is None
    np.testing.assert_allclose(np.asarray(logits), np.asarray(ref),
                               rtol=1e-2, atol=1e-5)
    print("KERNEL_OK")
</pallas_src>

<mosaic_0001>
module attributes {stable_mosaic.version = 11 : i64} {
  func.func @preload_kernel(%arg0: i32, %arg1: memref<16x128xf32, #tpu.memory_space<vmem>>, %arg2: memref<128x512xf32, #tpu.memory_space<vmem>>, %arg3: memref<1x512xf32, #tpu.memory_space<vmem>>, %arg4: memref<2x128xf32, #tpu.memory_space<vmem>>, %arg5: memref<2x128xf32, #tpu.memory_space<vmem>>, %arg6: memref<2x16x128xf32, #tpu.memory_space<vmem>>, %arg7: memref<2x16x128xf32, #tpu.memory_space<vmem>>) attributes {dimension_semantics = [#tpu.dimension_semantics<arbitrary>], iteration_bounds = array<i64: 1>, scalar_prefetch = 0 : i64, scratch_operands = 0 : i64, tpu.core_type = #tpu.core_type<tc>, window_params = [{pipeline_mode = #tpu.pipeline_mode<synchronous>, transform_indices = @transform_0, window_bounds = array<i64: 16, 128>}, {pipeline_mode = #tpu.pipeline_mode<synchronous>, transform_indices = @transform_1, window_bounds = array<i64: 128, 512>}, {pipeline_mode = #tpu.pipeline_mode<synchronous>, transform_indices = @transform_2, window_bounds = array<i64: 1, 512>}, {pipeline_mode = #tpu.pipeline_mode<synchronous>, transform_indices = @transform_3, window_bounds = array<i64: 2, 128>}, {pipeline_mode = #tpu.pipeline_mode<synchronous>, transform_indices = @transform_4, window_bounds = array<i64: 2, 128>}, {pipeline_mode = #tpu.pipeline_mode<synchronous>, transform_indices = @transform_5, window_bounds = array<i64: 2, 16, 128>}, {pipeline_mode = #tpu.pipeline_mode<synchronous>, transform_indices = @transform_6, window_bounds = array<i64: 2, 16, 128>}]} {
    %c0 = arith.constant 0 : index
    %c0_0 = arith.constant 0 : index
    %0 = vector.load %arg1[%c0, %c0_0] : memref<16x128xf32, #tpu.memory_space<vmem>>, vector<16x128xf32>
    %c0_1 = arith.constant 0 : index
    %c0_2 = arith.constant 0 : index
    %1 = vector.load %arg2[%c0_1, %c0_2] : memref<128x512xf32, #tpu.memory_space<vmem>>, vector<128x512xf32>
    %cst = arith.constant dense<0.000000e+00> : vector<16x512xf32>
    %2 = tpu.matmul %0, %1, %cst {dimension_numbers = #tpu.dot_dimension_numbers<[1], [0], [0], [1], [0, 0, 1, 1], [], []>} : vector<16x128xf32>, vector<128x512xf32>, vector<16x512xf32> -> vector<16x512xf32>
    %c0_3 = arith.constant 0 : index
    %c0_4 = arith.constant 0 : index
    %3 = vector.load %arg3[%c0_3, %c0_4] : memref<1x512xf32, #tpu.memory_space<vmem>>, vector<1x512xf32>
    %4 = vector.shape_cast %3 : vector<1x512xf32> to vector<512xf32>
    %5 = vector.shape_cast %4 : vector<512xf32> to vector<1x512xf32>
    %6 = vector.broadcast %5 : vector<1x512xf32> to vector<16x512xf32>
    %7 = arith.addf %2, %6 : vector<16x512xf32>
    %8 = vector.extract_strided_slice %7 {offsets = [0, 0], sizes = [16, 128], strides = [1, 1]} : vector<16x512xf32> to vector<16x128xf32>
    %c0_5 = arith.constant 0 : index
    %c0_6 = arith.constant 0 : index
    %9 = vector.load %arg4[%c0_5, %c0_6] : memref<2x128xf32, #tpu.memory_space<vmem>>, vector<1x128xf32>
    %10 = vector.shape_cast %9 : vector<1x128xf32> to vector<128xf32>
    %c0_7 = arith.constant 0 : index
    %c0_8 = arith.constant 0 : index
    %11 = vector.load %arg5[%c0_7, %c0_8] : memref<2x128xf32, #tpu.memory_space<vmem>>, vector<1x128xf32>
    %12 = vector.shape_cast %11 : vector<1x128xf32> to vector<128xf32>
    %cst_9 = arith.constant dense<0.000000e+00> : vector<16xf32>
    %13 = vector.multi_reduction <add>, %8, %cst_9 [1] : vector<16x128xf32> to vector<16xf32>
    %14 = vector.shape_cast %13 : vector<16xf32> to vector<16x1xf32>
    %cst_10 = arith.constant 1.280000e+02 : f32
    %15 = vector.broadcast %cst_10 : f32 to vector<16x1xf32>
    %16 = arith.divf %14, %15 : vector<16x1xf32>
    %17 = vector.broadcast %16 : vector<16x1xf32> to vector<16x128xf32>
    %18 = arith.subf %8, %17 : vector<16x128xf32>
    %19 = arith.mulf %18, %18 : vector<16x128xf32>
    %cst_11 = arith.constant dense<0.000000e+00> : vector<16xf32>
    %20 = vector.multi_reduction <add>, %19, %cst_11 [1] : vector<16x128xf32> to vector<16xf32>
    %21 = vector.shape_cast %20 : vector<16xf32> to vector<16x1xf32>
    %cst_12 = arith.constant 1.280000e+02 : f32
    %22 = vector.broadcast %cst_12 : f32 to vector<16x1xf32>
    %23 = arith.divf %21, %22 : vector<16x1xf32>
    %24 = vector.broadcast %16 : vector<16x1xf32> to vector<16x128xf32>
    %25 = arith.subf %8, %24 : vector<16x128xf32>
    %cst_13 = arith.constant 9.99999974E-6 : f32
    %26 = vector.broadcast %cst_13 : f32 to vector<16x1xf32>
    %27 = arith.addf %23, %26 : vector<16x1xf32>
    %28 = math.rsqrt %27 : vector<16x1xf32>
    %29 = vector.broadcast %28 : vector<16x1xf32> to vector<16x128xf32>
    %30 = arith.mulf %25, %29 : vector<16x128xf32>
    %31 = vector.shape_cast %10 : vector<128xf32> to vector<1x128xf32>
    %32 = vector.broadcast %31 : vector<1x128xf32> to vector<16x128xf32>
    %33 = arith.mulf %30, %32 : vector<16x128xf32>
    %34 = vector.shape_cast %12 : vector<128xf32> to vector<1x128xf32>
    %35 = vector.broadcast %34 : vector<1x128xf32> to vector<16x128xf32>
    %36 = arith.addf %33, %35 : vector<16x128xf32>
    %c0_14 = arith.constant 0 : index
    %c0_15 = arith.constant 0 : index
    %c0_16 = arith.constant 0 : index
    %37 = vector.load %arg6[%c0_14, %c0_15, %c0_16] : memref<2x16x128xf32, #tpu.memory_space<vmem>>, vector<1x16x128xf32>
    %38 = vector.shape_cast %37 : vector<1x16x128xf32> to vector<16x128xf32>
    %39 = vector.shape_cast %36 : vector<16x128xf32> to vector<1x16x128xf32>
    tpu.vector_store %arg6[%c0_14, %c0_15, %c0_16], %39 {strides = array<i32>} : memref<2x16x128xf32, #tpu.memory_space<vmem>>, vector<1x16x128xf32>,
    %40 = vector.extract_strided_slice %7 {offsets = [0, 256], sizes = [16, 128], strides = [1, 1]} : vector<16x512xf32> to vector<16x128xf32>
    %c0_17 = arith.constant 0 : index
    %c0_18 = arith.constant 0 : index
    %c0_19 = arith.constant 0 : index
    %41 = vector.load %arg7[%c0_17, %c0_18, %c0_19] : memref<2x16x128xf32, #tpu.memory_space<vmem>>, vector<1x16x128xf32>
    %42 = vector.shape_cast %41 : vector<1x16x128xf32> to vector<16x128xf32>
    %43 = vector.shape_cast %40 : vector<16x128xf32> to vector<1x16x128xf32>
    tpu.vector_store %arg7[%c0_17, %c0_18, %c0_19], %43 {strides = array<i32>} : memref<2x16x128xf32, #tpu.memory_space<vmem>>, vector<1x16x128xf32>,
    %44 = vector.extract_strided_slice %7 {offsets = [0, 128], sizes = [16, 128], strides = [1, 1]} : vector<16x512xf32> to vector<16x128xf32>
    %c1 = arith.constant 1 : index
    %c0_20 = arith.constant 0 : index
    %45 = vector.load %arg4[%c1, %c0_20] : memref<2x128xf32, #tpu.memory_space<vmem>>, vector<1x128xf32>
    %46 = vector.shape_cast %45 : vector<1x128xf32> to vector<128xf32>
    %c1_21 = arith.constant 1 : index
    %c0_22 = arith.constant 0 : index
    %47 = vector.load %arg5[%c1_21, %c0_22] : memref<2x128xf32, #tpu.memory_space<vmem>>, vector<1x128xf32>
    %48 = vector.shape_cast %47 : vector<1x128xf32> to vector<128xf32>
    %cst_23 = arith.constant dense<0.000000e+00> : vector<16xf32>
    %49 = vector.multi_reduction <add>, %44, %cst_23 [1] : vector<16x128xf32> to vector<16xf32>
    %50 = vector.shape_cast %49 : vector<16xf32> to vector<16x1xf32>
    %cst_24 = arith.constant 1.280000e+02 : f32
    %51 = vector.broadcast %cst_24 : f32 to vector<16x1xf32>
    %52 = arith.divf %50, %51 : vector<16x1xf32>
    %53 = vector.broadcast %52 : vector<16x1xf32> to vector<16x128xf32>
    %54 = arith.subf %44, %53 : vector<16x128xf32>
    %55 = arith.mulf %54, %54 : vector<16x128xf32>
    %cst_25 = arith.constant dense<0.000000e+00> : vector<16xf32>
    %56 = vector.multi_reduction <add>, %55, %cst_25 [1] : vector<16x128xf32> to vector<16xf32>
    %57 = vector.shape_cast %56 : vector<16xf32> to vector<16x1xf32>
    %cst_26 = arith.constant 1.280000e+02 : f32
    %58 = vector.broadcast %cst_26 : f32 to vector<16x1xf32>
    %59 = arith.divf %57, %58 : vector<16x1xf32>
    %60 = vector.broadcast %52 : vector<16x1xf32> to vector<16x128xf32>
    %61 = arith.subf %44, %60 : vector<16x128xf32>
    %cst_27 = arith.constant 9.99999974E-6 : f32
    %62 = vector.broadcast %cst_27 : f32 to vector<16x1xf32>
    %63 = arith.addf %59, %62 : vector<16x1xf32>
    %64 = math.rsqrt %63 : vector<16x1xf32>
    %65 = vector.broadcast %64 : vector<16x1xf32> to vector<16x128xf32>
    %66 = arith.mulf %61, %65 : vector<16x128xf32>
    %67 = vector.shape_cast %46 : vector<128xf32> to vector<1x128xf32>
    %68 = vector.broadcast %67 : vector<1x128xf32> to vector<16x128xf32>
    %69 = arith.mulf %66, %68 : vector<16x128xf32>
    %70 = vector.shape_cast %48 : vector<128xf32> to vector<1x128xf32>
    %71 = vector.broadcast %70 : vector<1x128xf32> to vector<16x128xf32>
    %72 = arith.addf %69, %71 : vector<16x128xf32>
    %c1_28 = arith.constant 1 : index
    %c0_29 = arith.constant 0 : index
    %c0_30 = arith.constant 0 : index
    %73 = vector.load %arg6[%c1_28, %c0_29, %c0_30] : memref<2x16x128xf32, #tpu.memory_space<vmem>>, vector<1x16x128xf32>
    %74 = vector.shape_cast %73 : vector<1x16x128xf32> to vector<16x128xf32>
    %75 = vector.shape_cast %72 : vector<16x128xf32> to vector<1x16x128xf32>
    tpu.vector_store %arg6[%c1_28, %c0_29, %c0_30], %75 {strides = array<i32>} : memref<2x16x128xf32, #tpu.memory_space<vmem>>, vector<1x16x128xf32>,
    %76 = vector.extract_strided_slice %7 {offsets = [0, 384], sizes = [16, 128], strides = [1, 1]} : vector<16x512xf32> to vector<16x128xf32>
    %c1_31 = arith.constant 1 : index
    %c0_32 = arith.constant 0 : index
    %c0_33 = arith.constant 0 : index
    %77 = vector.load %arg7[%c1_31, %c0_32, %c0_33] : memref<2x16x128xf32, #tpu.memory_space<vmem>>, vector<1x16x128xf32>
    %78 = vector.shape_cast %77 : vector<1x16x128xf32> to vector<16x128xf32>
    %79 = vector.shape_cast %76 : vector<16x128xf32> to vector<1x16x128xf32>
    tpu.vector_store %arg7[%c1_31, %c0_32, %c0_33], %79 {strides = array<i32>} : memref<2x16x128xf32, #tpu.memory_space<vmem>>, vector<1x16x128xf32>,
    return
  }
  func.func @transform_0(%arg0: i32) -> (i32, i32) {
    %c0_i32 = arith.constant 0 : i32
    %c0_i32_0 = arith.constant 0 : i32
    %c0_i32_1 = arith.constant 0 : i32
    return %c0_i32, %c0_i32_0 : i32, i32
  }
  func.func @transform_1(%arg0: i32) -> (i32, i32) {
    %c0_i32 = arith.constant 0 : i32
    %c0_i32_0 = arith.constant 0 : i32
    %c0_i32_1 = arith.constant 0 : i32
    return %c0_i32, %c0_i32_0 : i32, i32
  }
  func.func @transform_2(%arg0: i32) -> (i32, i32) {
    %c0_i32 = arith.constant 0 : i32
    %c0_i32_0 = arith.constant 0 : i32
    %c0_i32_1 = arith.constant 0 : i32
    return %c0_i32, %c0_i32_0 : i32, i32
  }
  func.func @transform_3(%arg0: i32) -> (i32, i32) {
    %c0_i32 = arith.constant 0 : i32
    %c0_i32_0 = arith.constant 0 : i32
    %c0_i32_1 = arith.constant 0 : i32
    return %c0_i32, %c0_i32_0 : i32, i32
  }
  func.func @transform_4(%arg0: i32) -> (i32, i32) {
    %c0_i32 = arith.constant 0 : i32
    %c0_i32_0 = arith.constant 0 : i32
    %c0_i32_1 = arith.constant 0 : i32
    return %c0_i32, %c0_i32_0 : i32, i32
  }
  func.func @transform_5(%arg0: i32) -> (i32, i32, i32) {
    %c0_i32 = arith.constant 0 : i32
    %c0_i32_0 = arith.constant 0 : i32
    %c0_i32_1 = arith.constant 0 : i32
    %c0_i32_2 = arith.constant 0 : i32
    return %c0_i32, %c0_i32_0, %c0_i32_1 : i32, i32, i32
  }
  func.func @transform_6(%arg0: i32) -> (i32, i32, i32) {
    %c0_i32 = arith.constant 0 : i32
    %c0_i32_0 = arith.constant 0 : i32
    %c0_i32_1 = arith.constant 0 : i32
    %c0_i32_2 = arith.constant 0 : i32
    return %c0_i32, %c0_i32_0, %c0_i32_1 : i32, i32, i32
  }
}

module attributes {stable_mosaic.version = 11 : i64} {
  func.func @rnn_kernel(%arg0: i32, %arg1: memref<2x8x2x128xf32, #tpu.memory_space<vmem>>, %arg2: memref<2x8x2x128xf32, #tpu.memory_space<vmem>>, %arg3: memref<2x128x128xf32, #tpu.memory_space<vmem>>, %arg4: memref<2x128xf32, #tpu.memory_space<vmem>>, %arg5: memref<2x128xf32, #tpu.memory_space<vmem>>, %arg6: memref<8x2x128xf32, #tpu.memory_space<vmem>>) attributes {dimension_semantics = [#tpu.dimension_semantics<arbitrary>], iteration_bounds = array<i64: 1>, scalar_prefetch = 0 : i64, scratch_operands = 0 : i64, tpu.core_type = #tpu.core_type<tc>, window_params = [{pipeline_mode = #tpu.pipeline_mode<synchronous>, transform_indices = @transform_0, window_bounds = array<i64: 2, 8, 2, 128>}, {pipeline_mode = #tpu.pipeline_mode<synchronous>, transform_indices = @transform_1, window_bounds = array<i64: 2, 8, 2, 128>}, {pipeline_mode = #tpu.pipeline_mode<synchronous>, transform_indices = @transform_2, window_bounds = array<i64: 2, 128, 128>}, {pipeline_mode = #tpu.pipeline_mode<synchronous>, transform_indices = @transform_3, window_bounds = array<i64: 2, 128>}, {pipeline_mode = #tpu.pipeline_mode<synchronous>, transform_indices = @transform_4, window_bounds = array<i64: 2, 128>}, {pipeline_mode = #tpu.pipeline_mode<synchronous>, transform_indices = @transform_5, window_bounds = array<i64: 8, 2, 128>}]} {
    %c0 = arith.constant 0 : index
    %c0_0 = arith.constant 0 : index
    %0 = vector.load %arg4[%c0, %c0_0] : memref<2x128xf32, #tpu.memory_space<vmem>>, vector<1x128xf32>
    %1 = vector.shape_cast %0 : vector<1x128xf32> to vector<128xf32>
    %c1 = arith.constant 1 : index
    %c0_1 = arith.constant 0 : index
    %2 = vector.load %arg4[%c1, %c0_1] : memref<2x128xf32, #tpu.memory_space<vmem>>, vector<1x128xf32>
    %3 = vector.shape_cast %2 : vector<1x128xf32> to vector<128xf32>
    %c0_2 = arith.constant 0 : index
    %c0_3 = arith.constant 0 : index
    %4 = vector.load %arg5[%c0_2, %c0_3] : memref<2x128xf32, #tpu.memory_space<vmem>>, vector<1x128xf32>
    %5 = vector.shape_cast %4 : vector<1x128xf32> to vector<128xf32>
    %c1_4 = arith.constant 1 : index
    %c0_5 = arith.constant 0 : index
    %6 = vector.load %arg5[%c1_4, %c0_5] : memref<2x128xf32, #tpu.memory_space<vmem>>, vector<1x128xf32>
    %7 = vector.shape_cast %6 : vector<1x128xf32> to vector<128xf32>
    %cst = arith.constant 0.000000e+00 : f32
    %8 = vector.broadcast %cst : f32 to vector<2x128xf32>
    %c0_i32 = arith.constant 0 : i32
    %c0_6 = arith.constant 0 : index
    %9 = arith.index_cast %c0_i32 : i32 to index
    %c0_7 = arith.constant 0 : index
    %c0_8 = arith.constant 0 : index
    %10 = vector.load %arg1[%c0_6, %9, %c0_7, %c0_8] : memref<2x8x2x128xf32, #tpu.memory_space<vmem>>, vector<1x1x2x128xf32>
    %11 = vector.shape_cast %10 : vector<1x1x2x128xf32> to vector<2x128xf32>
    %c0_9 = arith.constant 0 : index
    %c0_10 = arith.constant 0 : index
    %c0_11 = arith.constant 0 : index
    %12 = vector.load %arg3[%c0_9, %c0_10, %c0_11] : memref<2x128x128xf32, #tpu.memory_space<vmem>>, vector<1x128x128xf32>
    %13 = vector.shape_cast %12 : vector<1x128x128xf32> to vector<128x128xf32>
    %cst_12 = arith.constant dense<0.000000e+00> : vector<2x128xf32>
    %14 = tpu.matmul %8, %13, %cst_12 {dimension_numbers = #tpu.dot_dimension_numbers<[1], [0], [0], [1], [0, 0, 1, 1], [], []>} : vector<2x128xf32>, vector<128x128xf32>, vector<2x128xf32> -> vector<2x128xf32>
    %15 = arith.addf %11, %14 : vector<2x128xf32>
    %cst_13 = arith.constant dense<0.000000e+00> : vector<2xf32>
    %16 = vector.multi_reduction <add>, %15, %cst_13 [1] : vector<2x128xf32> to vector<2xf32>
    %17 = vector.shape_cast %16 : vector<2xf32> to vector<2x1xf32>
    %cst_14 = arith.constant 1.280000e+02 : f32
    %18 = vector.broadcast %cst_14 : f32 to vector<2x1xf32>
    %19 = arith.divf %17, %18 : vector<2x1xf32>
    %20 = vector.broadcast %19 : vector<2x1xf32> to vector<2x128xf32>
    %21 = arith.subf %15, %20 : vector<2x128xf32>
    %22 = arith.mulf %21, %21 : vector<2x128xf32>
    %cst_15 = arith.constant dense<0.000000e+00> : vector<2xf32>
    %23 = vector.multi_reduction <add>, %22, %cst_15 [1] : vector<2x128xf32> to vector<2xf32>
    %24 = vector.shape_cast %23 : vector<2xf32> to vector<2x1xf32>
    %cst_16 = arith.constant 1.280000e+02 : f32
    %25 = vector.broadcast %cst_16 : f32 to vector<2x1xf32>
    %26 = arith.divf %24, %25 : vector<2x1xf32>
    %27 = vector.broadcast %19 : vector<2x1xf32> to vector<2x128xf32>
    %28 = arith.subf %15, %27 : vector<2x128xf32>
    %cst_17 = arith.constant 9.99999974E-6 : f32
    %29 = vector.broadcast %cst_17 : f32 to vector<2x1xf32>
    %30 = arith.addf %26, %29 : vector<2x1xf32>
    %31 = math.rsqrt %30 : vector<2x1xf32>
    %32 = vector.broadcast %31 : vector<2x1xf32> to vector<2x128xf32>
    %33 = arith.mulf %28, %32 : vector<2x128xf32>
    %34 = vector.shape_cast %1 : vector<128xf32> to vector<1x128xf32>
    %35 = vector.broadcast %34 : vector<1x128xf32> to vector<2x128xf32>
    %36 = arith.mulf %33, %35 : vector<2x128xf32>
    %37 = vector.shape_cast %5 : vector<128xf32> to vector<1x128xf32>
    %38 = vector.broadcast %37 : vector<1x128xf32> to vector<2x128xf32>
    %39 = arith.addf %36, %38 : vector<2x128xf32>
    %c0_18 = arith.constant 0 : index
    %40 = arith.index_cast %c0_i32 : i32 to index
    %c0_19 = arith.constant 0 : index
    %c0_20 = arith.constant 0 : index
    %41 = vector.load %arg2[%c0_18, %40, %c0_19, %c0_20] : memref<2x8x2x128xf32, #tpu.memory_space<vmem>>, vector<1x1x2x128xf32>
    %42 = vector.shape_cast %41 : vector<1x1x2x128xf32> to vector<2x128xf32>
    %43 = arith.mulf %39, %42 : vector<2x128xf32>
    %44 = arith.addf %8, %43 : vector<2x128xf32>
    %45 = arith.negf %44 : vector<2x128xf32>
    %46 = math.exp %45 : vector<2x128xf32>
    %cst_21 = arith.constant 1.000000e+00 : f32
    %47 = vector.broadcast %cst_21 : f32 to vector<2x128xf32>
    %48 = arith.addf %47, %46 : vector<2x128xf32>
    %49 = arith.divf %47, %48 : vector<2x128xf32>
    %50 = arith.mulf %44, %49 : vector<2x128xf32>
    %c1_22 = arith.constant 1 : index
    %51 = arith.index_cast %c0_i32 : i32 to index
    %c0_23 = arith.constant 0 : index
    %c0_24 = arith.constant 0 : index
    %52 = vector.load %arg1[%c1_22, %51, %c0_23, %c0_24] : memref<2x8x2x128xf32, #tpu.memory_space<vmem>>, vector<1x1x2x128xf32>
    %53 = vector.shape_cast %52 : vector<1x1x2x128xf32> to vector<2x128xf32>
    %c1_25 = arith.constant 1 : index
    %c0_26 = arith.constant 0 : index
    %c0_27 = arith.constant 0 : index
    %54 = vector.load %arg3[%c1_25, %c0_26, %c0_27] : memref<2x128x128xf32, #tpu.memory_space<vmem>>, vector<1x128x128xf32>
    %55 = vector.shape_cast %54 : vector<1x128x128xf32> to vector<128x128xf32>
    %cst_28 = arith.constant dense<0.000000e+00> : vector<2x128xf32>
    %56 = tpu.matmul %50, %55, %cst_28 {dimension_numbers = #tpu.dot_dimension_numbers<[1], [0], [0], [1], [0, 0, 1, 1], [], []>} : vector<2x128xf32>, vector<128x128xf32>, vector<2x128xf32> -> vector<2x128xf32>
    %57 = arith.addf %53, %56 : vector<2x128xf32>
    %cst_29 = arith.constant dense<0.000000e+00> : vector<2xf32>
    %58 = vector.multi_reduction <add>, %57, %cst_29 [1] : vector<2x128xf32> to vector<2xf32>
    %59 = vector.shape_cast %58 : vector<2xf32> to vector<2x1xf32>
    %cst_30 = arith.constant 1.280000e+02 : f32
    %60 = vector.broadcast %cst_30 : f32 to vector<2x1xf32>
    %61 = arith.divf %59, %60 : vector<2x1xf32>
    %62 = vector.broadcast %61 : vector<2x1xf32> to vector<2x128xf32>
    %63 = arith.subf %57, %62 : vector<2x128xf32>
    %64 = arith.mulf %63, %63 : vector<2x128xf32>
    %cst_31 = arith.constant dense<0.000000e+00> : vector<2xf32>
    %65 = vector.multi_reduction <add>, %64, %cst_31 [1] : vector<2x128xf32> to vector<2xf32>
    %66 = vector.shape_cast %65 : vector<2xf32> to vector<2x1xf32>
    %cst_32 = arith.constant 1.280000e+02 : f32
    %67 = vector.broadcast %cst_32 : f32 to vector<2x1xf32>
    %68 = arith.divf %66, %67 : vector<2x1xf32>
    %69 = vector.broadcast %61 : vector<2x1xf32> to vector<2x128xf32>
    %70 = arith.subf %57, %69 : vector<2x128xf32>
    %cst_33 = arith.constant 9.99999974E-6 : f32
    %71 = vector.broadcast %cst_33 : f32 to vector<2x1xf32>
    %72 = arith.addf %68, %71 : vector<2x1xf32>
    %73 = math.rsqrt %72 : vector<2x1xf32>
    %74 = vector.broadcast %73 : vector<2x1xf32> to vector<2x128xf32>
    %75 = arith.mulf %70, %74 : vector<2x128xf32>
    %76 = vector.shape_cast %3 : vector<128xf32> to vector<1x128xf32>
    %77 = vector.broadcast %76 : vector<1x128xf32> to vector<2x128xf32>
    %78 = arith.mulf %75, %77 : vector<2x128xf32>
    %79 = vector.shape_cast %7 : vector<128xf32> to vector<1x128xf32>
    %80 = vector.broadcast %79 : vector<1x128xf32> to vector<2x128xf32>
    %81 = arith.addf %78, %80 : vector<2x128xf32>
    %c1_34 = arith.constant 1 : index
    %82 = arith.index_cast %c0_i32 : i32 to index
    %c0_35 = arith.constant 0 : index
    %c0_36 = arith.constant 0 : index
    %83 = vector.load %arg2[%c1_34, %82, %c0_35, %c0_36] : memref<2x8x2x128xf32, #tpu.memory_space<vmem>>, vector<1x1x2x128xf32>
    %84 = vector.shape_cast %83 : vector<1x1x2x128xf32> to vector<2x128xf32>
    %85 = arith.mulf %81, %84 : vector<2x128xf32>
    %86 = arith.addf %50, %85 : vector<2x128xf32>
    %87 = arith.negf %86 : vector<2x128xf32>
    %88 = math.exp %87 : vector<2x128xf32>
    %cst_37 = arith.constant 1.000000e+00 : f32
    %89 = vector.broadcast %cst_37 : f32 to vector<2x128xf32>
    %90 = arith.addf %89, %88 : vector<2x128xf32>
    %91 = arith.divf %89, %90 : vector<2x128xf32>
    %92 = arith.mulf %86, %91 : vector<2x128xf32>
    %93 = arith.index_cast %c0_i32 : i32 to index
    %c0_38 = arith.constant 0 : index
    %c0_39 = arith.constant 0 : index
    %94 = vector.load %arg6[%93, %c0_38, %c0_39] : memref<8x2x128xf32, #tpu.memory_space<vmem>>, vector<1x2x128xf32>
    %95 = vector.shape_cast %94 : vector<1x2x128xf32> to vector<2x128xf32>
    %96 = vector.shape_cast %92 : vector<2x128xf32> to vector<1x2x128xf32>
    tpu.vector_store %arg6[%93, %c0_38, %c0_39], %96 {strides = array<i32>} : memref<8x2x128xf32, #tpu.memory_space<vmem>>, vector<1x2x128xf32>,
    %c1_i32 = arith.constant 1 : i32
    %c0_40 = arith.constant 0 : index
    %97 = arith.index_cast %c1_i32 : i32 to index
    %c0_41 = arith.constant 0 : index
    %c0_42 = arith.constant 0 : index
    %98 = vector.load %arg1[%c0_40, %97, %c0_41, %c0_42] : memref<2x8x2x128xf32, #tpu.memory_space<vmem>>, vector<1x1x2x128xf32>
    %99 = vector.shape_cast %98 : vector<1x1x2x128xf32> to vector<2x128xf32>
    %c0_43 = arith.constant 0 : index
    %c0_44 = arith.constant 0 : index
    %c0_45 = arith.constant 0 : index
    %100 = vector.load %arg3[%c0_43, %c0_44, %c0_45] : memref<2x128x128xf32, #tpu.memory_space<vmem>>, vector<1x128x128xf32>
    %101 = vector.shape_cast %100 : vector<1x128x128xf32> to vector<128x128xf32>
    %cst_46 = arith.constant dense<0.000000e+00> : vector<2x128xf32>
    %102 = tpu.matmul %92, %101, %cst_46 {dimension_numbers = #tpu.dot_dimension_numbers<[1], [0], [0], [1], [0, 0, 1, 1], [], []>} : vector<2x128xf32>, vector<128x128xf32>, vector<2x128xf32> -> vector<2x128xf32>
    %103 = arith.addf %99, %102 : vector<2x128xf32>
    %cst_47 = arith.constant dense<0.000000e+00> : vector<2xf32>
    %104 = vector.multi_reduction <add>, %103, %cst_47 [1] : vector<2x128xf32> to vector<2xf32>
    %105 = vector.shape_cast %104 : vector<2xf32> to vector<2x1xf32>
    %cst_48 = arith.constant 1.280000e+02 : f32
    %106 = vector.broadcast %cst_48 : f32 to vector<2x1xf32>
    %107 = arith.divf %105, %106 : vector<2x1xf32>
    %108 = vector.broadcast %107 : vector<2x1xf32> to vector<2x128xf32>
    %109 = arith.subf %103, %108 : vector<2x128xf32>
    %110 = arith.mulf %109, %109 : vector<2x128xf32>
    %cst_49 = arith.constant dense<0.000000e+00> : vector<2xf32>
    %111 = vector.multi_reduction <add>, %110, %cst_49 [1] : vector<2x128xf32> to vector<2xf32>
    %112 = vector.shape_cast %111 : vector<2xf32> to vector<2x1xf32>
    %cst_50 = arith.constant 1.280000e+02 : f32
    %113 = vector.broadcast %cst_50 : f32 to vector<2x1xf32>
    %114 = arith.divf %112, %113 : vector<2x1xf32>
    %115 = vector.broadcast %107 : vector<2x1xf32> to vector<2x128xf32>
    %116 = arith.subf %103, %115 : vector<2x128xf32>
    %cst_51 = arith.constant 9.99999974E-6 : f32
    %117 = vector.broadcast %cst_51 : f32 to vector<2x1xf32>
    %118 = arith.addf %114, %117 : vector<2x1xf32>
    %119 = math.rsqrt %118 : vector<2x1xf32>
    %120 = vector.broadcast %119 : vector<2x1xf32> to vector<2x128xf32>
    %121 = arith.mulf %116, %120 : vector<2x128xf32>
    %122 = vector.shape_cast %1 : vector<128xf32> to vector<1x128xf32>
    %123 = vector.broadcast %122 : vector<1x128xf32> to vector<2x128xf32>
    %124 = arith.mulf %121, %123 : vector<2x128xf32>
    %125 = vector.shape_cast %5 : vector<128xf32> to vector<1x128xf32>
    %126 = vector.broadcast %125 : vector<1x128xf32> to vector<2x128xf32>
    %127 = arith.addf %124, %126 : vector<2x128xf32>
    %c0_52 = arith.constant 0 : index
    %128 = arith.index_cast %c1_i32 : i32 to index
    %c0_53 = arith.constant 0 : index
    %c0_54 = arith.constant 0 : index
    %129 = vector.load %arg2[%c0_52, %128, %c0_53, %c0_54] : memref<2x8x2x128xf32, #tpu.memory_space<vmem>>, vector<1x1x2x128xf32>
    %130 = vector.shape_cast %129 : vector<1x1x2x128xf32> to vector<2x128xf32>
    %131 = arith.mulf %127, %130 : vector<2x128xf32>
    %132 = arith.addf %92, %131 : vector<2x128xf32>
    %133 = arith.negf %132 : vector<2x128xf32>
    %134 = math.exp %133 : vector<2x128xf32>
    %cst_55 = arith.constant 1.000000e+00 : f32
    %135 = vector.broadcast %cst_55 : f32 to vector<2x128xf32>
    %136 = arith.addf %135, %134 : vector<2x128xf32>
    %137 = arith.divf %135, %136 : vector<2x128xf32>
    %138 = arith.mulf %132, %137 : vector<2x128xf32>
    %c1_56 = arith.constant 1 : index
    %139 = arith.index_cast %c1_i32 : i32 to index
    %c0_57 = arith.constant 0 : index
    %c0_58 = arith.constant 0 : index
    %140 = vector.load %arg1[%c1_56, %139, %c0_57, %c0_58] : memref<2x8x2x128xf32, #tpu.memory_space<vmem>>, vector<1x1x2x128xf32>
    %141 = vector.shape_cast %140 : vector<1x1x2x128xf32> to vector<2x128xf32>
    %c1_59 = arith.constant 1 : index
    %c0_60 = arith.constant 0 : index
    %c0_61 = arith.constant 0 : index
    %142 = vector.load %arg3[%c1_59, %c0_60, %c0_61] : memref<2x128x128xf32, #tpu.memory_space<vmem>>, vector<1x128x128xf32>
    %143 = vector.shape_cast %142 : vector<1x128x128xf32> to vector<128x128xf32>
    %cst_62 = arith.constant dense<0.000000e+00> : vector<2x128xf32>
    %144 = tpu.matmul %138, %143, %cst_62 {dimension_numbers = #tpu.dot_dimension_numbers<[1], [0], [0], [1], [0, 0, 1, 1], [], []>} : vector<2x128xf32>, vector<128x128xf32>, vector<2x128xf32> -> vector<2x128xf32>
    %145 = arith.addf %141, %144 : vector<2x128xf32>
    %cst_63 = arith.constant dense<0.000000e+00> : vector<2xf32>
    %146 = vector.multi_reduction <add>, %145, %cst_63 [1] : vector<2x128xf32> to vector<2xf32>
    %147 = vector.shape_cast %146 : vector<2xf32> to vector<2x1xf32>
    %cst_64 = arith.constant 1.280000e+02 : f32
    %148 = vector.broadcast %cst_64 : f32 to vector<2x1xf32>
    %149 = arith.divf %147, %148 : vector<2x1xf32>
    %150 = vector.broadcast %149 : vector<2x1xf32> to vector<2x128xf32>
    %151 = arith.subf %145, %150 : vector<2x128xf32>
    %152 = arith.mulf %151, %151 : vector<2x128xf32>
    %cst_65 = arith.constant dense<0.000000e+00> : vector<2xf32>
    %153 = vector.multi_reduction <add>, %152, %cst_65 [1] : vector<2x128xf32> to vector<2xf32>
    %154 = vector.shape_cast %153 : vector<2xf32> to vector<2x1xf32>
    %cst_66 = arith.constant 1.280000e+02 : f32
    %155 = vector.broadcast %cst_66 : f32 to vector<2x1xf32>
    %156 = arith.divf %154, %155 : vector<2x1xf32>
    %157 = vector.broadcast %149 : vector<2x1xf32> to vector<2x128xf32>
    %158 = arith.subf %145, %157 : vector<2x128xf32>
    %cst_67 = arith.constant 9.99999974E-6 : f32
    %159 = vector.broadcast %cst_67 : f32 to vector<2x1xf32>
    %160 = arith.addf %156, %159 : vector<2x1xf32>
    %161 = math.rsqrt %160 : vector<2x1xf32>
    %162 = vector.broadcast %161 : vector<2x1xf32> to vector<2x128xf32>
    %163 = arith.mulf %158, %162 : vector<2x128xf32>
    %164 = vector.shape_cast %3 : vector<128xf32> to vector<1x128xf32>
    %165 = vector.broadcast %164 : vector<1x128xf32> to vector<2x128xf32>
    %166 = arith.mulf %163, %165 : vector<2x128xf32>
    %167 = vector.shape_cast %7 : vector<128xf32> to vector<1x128xf32>
    %168 = vector.broadcast %167 : vector<1x128xf32> to vector<2x128xf32>
    %169 = arith.addf %166, %168 : vector<2x128xf32>
    %c1_68 = arith.constant 1 : index
    %170 = arith.index_cast %c1_i32 : i32 to index
    %c0_69 = arith.constant 0 : index
    %c0_70 = arith.constant 0 : index
    %171 = vector.load %arg2[%c1_68, %170, %c0_69, %c0_70] : memref<2x8x2x128xf32, #tpu.memory_space<vmem>>, vector<1x1x2x128xf32>
    %172 = vector.shape_cast %171 : vector<1x1x2x128xf32> to vector<2x128xf32>
    %173 = arith.mulf %169, %172 : vector<2x128xf32>
    %174 = arith.addf %138, %173 : vector<2x128xf32>
    %175 = arith.negf %174 : vector<2x128xf32>
    %176 = math.exp %175 : vector<2x128xf32>
    %cst_71 = arith.constant 1.000000e+00 : f32
    %177 = vector.broadcast %cst_71 : f32 to vector<2x128xf32>
    %178 = arith.addf %177, %176 : vector<2x128xf32>
    %179 = arith.divf %177, %178 : vector<2x128xf32>
    %180 = arith.mulf %174, %179 : vector<2x128xf32>
    %181 = arith.index_cast %c1_i32 : i32 to index
    %c0_72 = arith.constant 0 : index
    %c0_73 = arith.constant 0 : index
    %182 = vector.load %arg6[%181, %c0_72, %c0_73] : memref<8x2x128xf32, #tpu.memory_space<vmem>>, vector<1x2x128xf32>
    %183 = vector.shape_cast %182 : vector<1x2x128xf32> to vector<2x128xf32>
    %184 = vector.shape_cast %180 : vector<2x128xf32> to vector<1x2x128xf32>
    tpu.vector_store %arg6[%181, %c0_72, %c0_73], %184 {strides = array<i32>} : memref<8x2x128xf32, #tpu.memory_space<vmem>>, vector<1x2x128xf32>,
    %c2_i32 = arith.constant 2 : i32
    %c0_74 = arith.constant 0 : index
    %185 = arith.index_cast %c2_i32 : i32 to index
    %c0_75 = arith.constant 0 : index
    %c0_76 = arith.constant 0 : index
    %186 = vector.load %arg1[%c0_74, %185, %c0_75, %c0_76] : memref<2x8x2x128xf32, #tpu.memory_space<vmem>>, vector<1x1x2x128xf32>
    %187 = vector.shape_cast %186 : vector<1x1x2x128xf32> to vector<2x128xf32>
    %c0_77 = arith.constant 0 : index
    %c0_78 = arith.constant 0 : index
    %c0_79 = arith.constant 0 : index
    %188 = vector.load %arg3[%c0_77, %c0_78, %c0_79] : memref<2x128x128xf32, #tpu.memory_space<vmem>>, vector<1x128x128xf32>
    %189 = vector.shape_cast %188 : vector<1x128x128xf32> to vector<128x128xf32>
    %cst_80 = arith.constant dense<0.000000e+00> : vector<2x128xf32>
    %190 = tpu.matmul %180, %189, %cst_80 {dimension_numbers = #tpu.dot_dimension_numbers<[1], [0], [0], [1], [0, 0, 1, 1], [], []>} : vector<2x128xf32>, vector<128x128xf32>, vector<2x128xf32> -> vector<2x128xf32>
    %191 = arith.addf %187, %190 : vector<2x128xf32>
    %cst_81 = arith.constant dense<0.000000e+00> : vector<2xf32>
    %192 = vector.multi_reduction <add>, %191, %cst_81 [1] : vector<2x128xf32> to vector<2xf32>
    %193 = vector.shape_cast %192 : vector<2xf32> to vector<2x1xf32>
    %cst_82 = arith.constant 1.280000e+02 : f32
    %194 = vector.broadcast %cst_82 : f32 to vector<2x1xf32>
    %195 = arith.divf %193, %194 : vector<2x1xf32>
    %196 = vector.broadcast %195 : vector<2x1xf32> to vector<2x128xf32>
    %197 = arith.subf %191, %196 : vector<2x128xf32>
    %198 = arith.mulf %197, %197 : vector<2x128xf32>
    %cst_83 = arith.constant dense<0.000000e+00> : vector<2xf32>
    %199 = vector.multi_reduction <add>, %198, %cst_83 [1] : vector<2x128xf32> to vector<2xf32>
    %200 = vector.shape_cast %199 : vector<2xf32> to vector<2x1xf32>
    %cst_84 = arith.constant 1.280000e+02 : f32
    %201 = vector.broadcast %cst_84 : f32 to vector<2x1xf32>
    %202 = arith.divf %200, %201 : vector<2x1xf32>
    %203 = vector.broadcast %195 : vector<2x1xf32> to vector<2x128xf32>
    %204 = arith.subf %191, %203 : vector<2x128xf32>
    %cst_85 = arith.constant 9.99999974E-6 : f32
    %205 = vector.broadcast %cst_85 : f32 to vector<2x1xf32>
    %206 = arith.addf %202, %205 : vector<2x1xf32>
    %207 = math.rsqrt %206 : vector<2x1xf32>
    %208 = vector.broadcast %207 : vector<2x1xf32> to vector<2x128xf32>
    %209 = arith.mulf %204, %208 : vector<2x128xf32>
    %210 = vector.shape_cast %1 : vector<128xf32> to vector<1x128xf32>
    %211 = vector.broadcast %210 : vector<1x128xf32> to vector<2x128xf32>
    %212 = arith.mulf %209, %211 : vector<2x128xf32>
    %213 = vector.shape_cast %5 : vector<128xf32> to vector<1x128xf32>
    %214 = vector.broadcast %213 : vector<1x128xf32> to vector<2x128xf32>
    %215 = arith.addf %212, %214 : vector<2x128xf32>
    %c0_86 = arith.constant 0 : index
    %216 = arith.index_cast %c2_i32 : i32 to index
    %c0_87 = arith.constant 0 : index
    %c0_88 = arith.constant 0 : index
    %217 = vector.load %arg2[%c0_86, %216, %c0_87, %c0_88] : memref<2x8x2x128xf32, #tpu.memory_space<vmem>>, vector<1x1x2x128xf32>
    %218 = vector.shape_cast %217 : vector<1x1x2x128xf32> to vector<2x128xf32>
    %219 = arith.mulf %215, %218 : vector<2x128xf32>
    %220 = arith.addf %180, %219 : vector<2x128xf32>
    %221 = arith.negf %220 : vector<2x128xf32>
    %222 = math.exp %221 : vector<2x128xf32>
    %cst_89 = arith.constant 1.000000e+00 : f32
    %223 = vector.broadcast %cst_89 : f32 to vector<2x128xf32>
    %224 = arith.addf %223, %222 : vector<2x128xf32>
    %225 = arith.divf %223, %224 : vector<2x128xf32>
    %226 = arith.mulf %220, %225 : vector<2x128xf32>
    %c1_90 = arith.constant 1 : index
    %227 = arith.index_cast %c2_i32 : i32 to index
    %c0_91 = arith.constant 0 : index
    %c0_92 = arith.constant 0 : index
    %228 = vector.load %arg1[%c1_90, %227, %c0_91, %c0_92] : memref<2x8x2x128xf32, #tpu.memory_space<vmem>>, vector<1x1x2x128xf32>
    %229 = vector.shape_cast %228 : vector<1x1x2x128xf32> to vector<2x128xf32>
    %c1_93 = arith.constant 1 : index
    %c0_94 = arith.constant 0 : index
    %c0_95 = arith.constant 0 : index
    %230 = vector.load %arg3[%c1_93, %c0_94, %c0_95] : memref<2x128x128xf32, #tpu.memory_space<vmem>>, vector<1x128x128xf32>
    %231 = vector.shape_cast %230 : vector<1x128x128xf32> to vector<128x128xf32>
    %cst_96 = arith.constant dense<0.000000e+00> : vector<2x128xf32>
    %232 = tpu.matmul %226, %231, %cst_96 {dimension_numbers = #tpu.dot_dimension_numbers<[1], [0], [0], [1], [0, 0, 1, 1], [], []>} : vector<2x128xf32>, vector<128x128xf32>, vector<2x128xf32> -> vector<2x128xf32>
    %233 = arith.addf %229, %232 : vector<2x128xf32>
    %cst_97 = arith.constant dense<0.000000e+00> : vector<2xf32>
    %234 = vector.multi_reduction <add>, %233, %cst_97 [1] : vector<2x128xf32> to vector<2xf32>
    %235 = vector.shape_cast %234 : vector<2xf32> to vector<2x1xf32>
    %cst_98 = arith.constant 1.280000e+02 : f32
    %236 = vector.broadcast %cst_98 : f32 to vector<2x1xf32>
    %237 = arith.divf %235, %236 : vector<2x1xf32>
    %238 = vector.broadcast %237 : vector<2x1xf32> to vector<2x128xf32>
    %239 = arith.subf %233, %238 : vector<2x128xf32>
    %240 = arith.mulf %239, %239 : vector<2x128xf32>
    %cst_99 = arith.constant dense<0.000000e+00> : vector<2xf32>
    %241 = vector.multi_reduction <add>, %240, %cst_99 [1] : vector<2x128xf32> to vector<2xf32>
    %242 = vector.shape_cast %241 : vector<2xf32> to vector<2x1xf32>
    %cst_100 = arith.constant 1.280000e+02 : f32
    %243 = vector.broadcast %cst_100 : f32 to vector<2x1xf32>
    %244 = arith.divf %242, %243 : vector<2x1xf32>
    %245 = vector.broadcast %237 : vector<2x1xf32> to vector<2x128xf32>
    %246 = arith.subf %233, %245 : vector<2x128xf32>
    %cst_101 = arith.constant 9.99999974E-6 : f32
    %247 = vector.broadcast %cst_101 : f32 to vector<2x1xf32>
    %248 = arith.addf %244, %247 : vector<2x1xf32>
    %249 = math.rsqrt %248 : vector<2x1xf32>
    %250 = vector.broadcast %249 : vector<2x1xf32> to vector<2x128xf32>
    %251 = arith.mulf %246, %250 : vector<2x128xf32>
    %252 = vector.shape_cast %3 : vector<128xf32> to vector<1x128xf32>
    %253 = vector.broadcast %252 : vector<1x128xf32> to vector<2x128xf32>
    %254 = arith.mulf %251, %253 : vector<2x128xf32>
    %255 = vector.shape_cast %7 : vector<128xf32> to vector<1x128xf32>
    %256 = vector.broadcast %255 : vector<1x128xf32> to vector<2x128xf32>
    %257 = arith.addf %254, %256 : vector<2x128xf32>
    %c1_102 = arith.constant 1 : index
    %258 = arith.index_cast %c2_i32 : i32 to index
    %c0_103 = arith.constant 0 : index
    %c0_104 = arith.constant 0 : index
    %259 = vector.load %arg2[%c1_102, %258, %c0_103, %c0_104] : memref<2x8x2x128xf32, #tpu.memory_space<vmem>>, vector<1x1x2x128xf32>
    %260 = vector.shape_cast %259 : vector<1x1x2x128xf32> to vector<2x128xf32>
    %261 = arith.mulf %257, %260 : vector<2x128xf32>
    %262 = arith.addf %226, %261 : vector<2x128xf32>
    %263 = arith.negf %262 : vector<2x128xf32>
    %264 = math.exp %263 : vector<2x128xf32>
    %cst_105 = arith.constant 1.000000e+00 : f32
    %265 = vector.broadcast %cst_105 : f32 to vector<2x128xf32>
    %266 = arith.addf %265, %264 : vector<2x128xf32>
    %267 = arith.divf %265, %266 : vector<2x128xf32>
    %268 = arith.mulf %262, %267 : vector<2x128xf32>
    %269 = arith.index_cast %c2_i32 : i32 to index
    %c0_106 = arith.constant 0 : index
    %c0_107 = arith.constant 0 : index
    %270 = vector.load %arg6[%269, %c0_106, %c0_107] : memref<8x2x128xf32, #tpu.memory_space<vmem>>, vector<1x2x128xf32>
    %271 = vector.shape_cast %270 : vector<1x2x128xf32> to vector<2x128xf32>
    %272 = vector.shape_cast %268 : vector<2x128xf32> to vector<1x2x128xf32>
    tpu.vector_store %arg6[%269, %c0_106, %c0_107], %272 {strides = array<i32>} : memref<8x2x128xf32, #tpu.memory_space<vmem>>, vector<1x2x128xf32>,
    %c3_i32 = arith.constant 3 : i32
    %c0_108 = arith.constant 0 : index
    %273 = arith.index_cast %c3_i32 : i32 to index
    %c0_109 = arith.constant 0 : index
    %c0_110 = arith.constant 0 : index
    %274 = vector.load %arg1[%c0_108, %273, %c0_109, %c0_110] : memref<2x8x2x128xf32, #tpu.memory_space<vmem>>, vector<1x1x2x128xf32>
    %275 = vector.shape_cast %274 : vector<1x1x2x128xf32> to vector<2x128xf32>
    %c0_111 = arith.constant 0 : index
    %c0_112 = arith.constant 0 : index
    %c0_113 = arith.constant 0 : index
    %276 = vector.load %arg3[%c0_111, %c0_112, %c0_113] : memref<2x128x128xf32, #tpu.memory_space<vmem>>, vector<1x128x128xf32>
    %277 = vector.shape_cast %276 : vector<1x128x128xf32> to vector<128x128xf32>
    %cst_114 = arith.constant dense<0.000000e+00> : vector<2x128xf32>
    %278 = tpu.matmul %268, %277, %cst_114 {dimension_numbers = #tpu.dot_dimension_numbers<[1], [0], [0], [1], [0, 0, 1, 1], [], []>} : vector<2x128xf32>, vector<128x128xf32>, vector<2x128xf32> -> vector<2x128xf32>
    %279 = arith.addf %275, %278 : vector<2x128xf32>
    %cst_115 = arith.constant dense<0.000000e+00> : vector<2xf32>
    %280 = vector.multi_reduction <add>, %279, %cst_115 [1] : vector<2x128xf32> to vector<2xf32>
    %281 = vector.shape_cast %280 : vector<2xf32> to vector<2x1xf32>
    %cst_116 = arith.constant 1.280000e+02 : f32
    %282 = vector.broadcast %cst_116 : f32 to vector<2x1xf32>
    %283 = arith.divf %281, %282 : vector<2x1xf32>
    %284 = vector.broadcast %283 : vector<2x1xf32> to vector<2x128xf32>
    %285 = arith.subf %279, %284 : vector<2x128xf32>
    %286 = arith.mulf %285, %285 : vector<2x128xf32>
    %cst_117 = arith.constant dense<0.000000e+00> : vector<2xf32>
    %287 = vector.multi_reduction <add>, %286, %cst_117 [1] : vector<2x128xf32> to vector<2xf32>
    %288 = vector.shape_cast %287 : vector<2xf32> to vector<2x1xf32>
    %cst_118 = arith.constant 1.280000e+02 : f32
    %289 = vector.broadcast %cst_118 : f32 to vector<2x1xf32>
    %290 = arith.divf %288, %289 : vector<2x1xf32>
    %291 = vector.broadcast %283 : vector<2x1xf32> to vector<2x128xf32>
    %292 = arith.subf %279, %291 : vector<2x128xf32>
    %cst_119 = arith.constant 9.99999974E-6 : f32
    %293 = vector.broadcast %cst_119 : f32 to vector<2x1xf32>
    %294 = arith.addf %290, %293 : vector<2x1xf32>
    %295 = math.rsqrt %294 : vector<2x1xf32>
    %296 = vector.broadcast %295 : vector<2x1xf32> to vector<2x128xf32>
    %297 = arith.mulf %292, %296 : vector<2x128xf32>
    %298 = vector.shape_cast %1 : vector<128xf32> to vector<1x128xf32>
    %299 = vector.broadcast %298 : vector<1x128xf32> to vector<2x128xf32>
    %300 = arith.mulf %297, %299 : vector<2x128xf32>
    %301 = vector.shape_cast %5 : vector<128xf32> to vector<1x128xf32>
    %302 = vector.broadcast %301 : vector<1x128xf32> to vector<2x128xf32>
    %303 = arith.addf %300, %302 : vector<2x128xf32>
    %c0_120 = arith.constant 0 : index
    %304 = arith.index_cast %c3_i32 : i32 to index
    %c0_121 = arith.constant 0 : index
    %c0_122 = arith.constant 0 : index
    %305 = vector.load %arg2[%c0_120, %304, %c0_121, %c0_122] : memref<2x8x2x128xf32, #tpu.memory_space<vmem>>, vector<1x1x2x128xf32>
    %306 = vector.shape_cast %305 : vector<1x1x2x128xf32> to vector<2x128xf32>
    %307 = arith.mulf %303, %306 : vector<2x128xf32>
    %308 = arith.addf %268, %307 : vector<2x128xf32>
    %309 = arith.negf %308 : vector<2x128xf32>
    %310 = math.exp %309 : vector<2x128xf32>
    %cst_123 = arith.constant 1.000000e+00 : f32
    %311 = vector.broadcast %cst_123 : f32 to vector<2x128xf32>
    %312 = arith.addf %311, %310 : vector<2x128xf32>
    %313 = arith.divf %311, %312 : vector<2x128xf32>
    %314 = arith.mulf %308, %313 : vector<2x128xf32>
    %c1_124 = arith.constant 1 : index
    %315 = arith.index_cast %c3_i32 : i32 to index
    %c0_125 = arith.constant 0 : index
    %c0_126 = arith.constant 0 : index
    %316 = vector.load %arg1[%c1_124, %315, %c0_125, %c0_126] : memref<2x8x2x128xf32, #tpu.memory_space<vmem>>, vector<1x1x2x128xf32>
    %317 = vector.shape_cast %316 : vector<1x1x2x128xf32> to vector<2x128xf32>
    %c1_127 = arith.constant 1 : index
    %c0_128 = arith.constant 0 : index
    %c0_129 = arith.constant 0 : index
    %318 = vector.load %arg3[%c1_127, %c0_128, %c0_129] : memref<2x128x128xf32, #tpu.memory_space<vmem>>, vector<1x128x128xf32>
    %319 = vector.shape_cast %318 : vector<1x128x128xf32> to vector<128x128xf32>
    %cst_130 = arith.constant dense<0.000000e+00> : vector<2x128xf32>
    %320 = tpu.matmul %314, %319, %cst_130 {dimension_numbers = #tpu.dot_dimension_numbers<[1], [0], [0], [1], [0, 0, 1, 1], [], []>} : vector<2x128xf32>, vector<128x128xf32>, vector<2x128xf32> -> vector<2x128xf32>
    %321 = arith.addf %317, %320 : vector<2x128xf32>
    %cst_131 = arith.constant dense<0.000000e+00> : vector<2xf32>
    %322 = vector.multi_reduction <add>, %321, %cst_131 [1] : vector<2x128xf32> to vector<2xf32>
    %323 = vector.shape_cast %322 : vector<2xf32> to vector<2x1xf32>
    %cst_132 = arith.constant 1.280000e+02 : f32
    %324 = vector.broadcast %cst_132 : f32 to vector<2x1xf32>
    %325 = arith.divf %323, %324 : vector<2x1xf32>
    %326 = vector.broadcast %325 : vector<2x1xf32> to vector<2x128xf32>
    %327 = arith.subf %321, %326 : vector<2x128xf32>
    %328 = arith.mulf %327, %327 : vector<2x128xf32>
    %cst_133 = arith.constant dense<0.000000e+00> : vector<2xf32>
    %329 = vector.multi_reduction <add>, %328, %cst_133 [1] : vector<2x128xf32> to vector<2xf32>
    %330 = vector.shape_cast %329 : vector<2xf32> to vector<2x1xf32>
    %cst_134 = arith.constant 1.280000e+02 : f32
    %331 = vector.broadcast %cst_134 : f32 to vector<2x1xf32>
    %332 = arith.divf %330, %331 : vector<2x1xf32>
    %333 = vector.broadcast %325 : vector<2x1xf32> to vector<2x128xf32>
    %334 = arith.subf %321, %333 : vector<2x128xf32>
    %cst_135 = arith.constant 9.99999974E-6 : f32
    %335 = vector.broadcast %cst_135 : f32 to vector<2x1xf32>
    %336 = arith.addf %332, %335 : vector<2x1xf32>
    %337 = math.rsqrt %336 : vector<2x1xf32>
    %338 = vector.broadcast %337 : vector<2x1xf32> to vector<2x128xf32>
    %339 = arith.mulf %334, %338 : vector<2x128xf32>
    %340 = vector.shape_cast %3 : vector<128xf32> to vector<1x128xf32>
    %341 = vector.broadcast %340 : vector<1x128xf32> to vector<2x128xf32>
    %342 = arith.mulf %339, %341 : vector<2x128xf32>
    %343 = vector.shape_cast %7 : vector<128xf32> to vector<1x128xf32>
    %344 = vector.broadcast %343 : vector<1x128xf32> to vector<2x128xf32>
    %345 = arith.addf %342, %344 : vector<2x128xf32>
    %c1_136 = arith.constant 1 : index
    %346 = arith.index_cast %c3_i32 : i32 to index
    %c0_137 = arith.constant 0 : index
    %c0_138 = arith.constant 0 : index
    %347 = vector.load %arg2[%c1_136, %346, %c0_137, %c0_138] : memref<2x8x2x128xf32, #tpu.memory_space<vmem>>, vector<1x1x2x128xf32>
    %348 = vector.shape_cast %347 : vector<1x1x2x128xf32> to vector<2x128xf32>
    %349 = arith.mulf %345, %348 : vector<2x128xf32>
    %350 = arith.addf %314, %349 : vector<2x128xf32>
    %351 = arith.negf %350 : vector<2x128xf32>
    %352 = math.exp %351 : vector<2x128xf32>
    %cst_139 = arith.constant 1.000000e+00 : f32
    %353 = vector.broadcast %cst_139 : f32 to vector<2x128xf32>
    %354 = arith.addf %353, %352 : vector<2x128xf32>
    %355 = arith.divf %353, %354 : vector<2x128xf32>
    %356 = arith.mulf %350, %355 : vector<2x128xf32>
    %357 = arith.index_cast %c3_i32 : i32 to index
    %c0_140 = arith.constant 0 : index
    %c0_141 = arith.constant 0 : index
    %358 = vector.load %arg6[%357, %c0_140, %c0_141] : memref<8x2x128xf32, #tpu.memory_space<vmem>>, vector<1x2x128xf32>
    %359 = vector.shape_cast %358 : vector<1x2x128xf32> to vector<2x128xf32>
    %360 = vector.shape_cast %356 : vector<2x128xf32> to vector<1x2x128xf32>
    tpu.vector_store %arg6[%357, %c0_140, %c0_141], %360 {strides = array<i32>} : memref<8x2x128xf32, #tpu.memory_space<vmem>>, vector<1x2x128xf32>,
    %c4_i32 = arith.constant 4 : i32
    %c0_142 = arith.constant 0 : index
    %361 = arith.index_cast %c4_i32 : i32 to index
    %c0_143 = arith.constant 0 : index
    %c0_144 = arith.constant 0 : index
    %362 = vector.load %arg1[%c0_142, %361, %c0_143, %c0_144] : memref<2x8x2x128xf32, #tpu.memory_space<vmem>>, vector<1x1x2x128xf32>
    %363 = vector.shape_cast %362 : vector<1x1x2x128xf32> to vector<2x128xf32>
    %c0_145 = arith.constant 0 : index
    %c0_146 = arith.constant 0 : index
    %c0_147 = arith.constant 0 : index
    %364 = vector.load %arg3[%c0_145, %c0_146, %c0_147] : memref<2x128x128xf32, #tpu.memory_space<vmem>>, vector<1x128x128xf32>
    %365 = vector.shape_cast %364 : vector<1x128x128xf32> to vector<128x128xf32>
    %cst_148 = arith.constant dense<0.000000e+00> : vector<2x128xf32>
    %366 = tpu.matmul %356, %365, %cst_148 {dimension_numbers = #tpu.dot_dimension_numbers<[1], [0], [0], [1], [0, 0, 1, 1], [], []>} : vector<2x128xf32>, vector<128x128xf32>, vector<2x128xf32> -> vector<2x128xf32>
    %367 = arith.addf %363, %366 : vector<2x128xf32>
    %cst_149 = arith.constant dense<0.000000e+00> : vector<2xf32>
    %368 = vector.multi_reduction <add>, %367, %cst_149 [1] : vector<2x128xf32> to vector<2xf32>
    %369 = vector.shape_cast %368 : vector<2xf32> to vector<2x1xf32>
    %cst_150 = arith.constant 1.280000e+02 : f32
    %370 = vector.broadcast %cst_150 : f32 to vector<2x1xf32>
    %371 = arith.divf %369, %370 : vector<2x1xf32>
    %372 = vector.broadcast %371 : vector<2x1xf32> to vector<2x128xf32>
    %373 = arith.subf %367, %372 : vector<2x128xf32>
    %374 = arith.mulf %373, %373 : vector<2x128xf32>
    %cst_151 = arith.constant dense<0.000000e+00> : vector<2xf32>
    %375 = vector.multi_reduction <add>, %374, %cst_151 [1] : vector<2x128xf32> to vector<2xf32>
    %376 = vector.shape_cast %375 : vector<2xf32> to vector<2x1xf32>
    %cst_152 = arith.constant 1.280000e+02 : f32
    %377 = vector.broadcast %cst_152 : f32 to vector<2x1xf32>
    %378 = arith.divf %376, %377 : vector<2x1xf32>
    %379 = vector.broadcast %371 : vector<2x1xf32> to vector<2x128xf32>
    %380 = arith.subf %367, %379 : vector<2x128xf32>
    %cst_153 = arith.constant 9.99999974E-6 : f32
    %381 = vector.broadcast %cst_153 : f32 to vector<2x1xf32>
    %382 = arith.addf %378, %381 : vector<2x1xf32>
    %383 = math.rsqrt %382 : vector<2x1xf32>
    %384 = vector.broadcast %383 : vector<2x1xf32> to vector<2x128xf32>
    %385 = arith.mulf %380, %384 : vector<2x128xf32>
    %386 = vector.shape_cast %1 : vector<128xf32> to vector<1x128xf32>
    %387 = vector.broadcast %386 : vector<1x128xf32> to vector<2x128xf32>
    %388 = arith.mulf %385, %387 : vector<2x128xf32>
    %389 = vector.shape_cast %5 : vector<128xf32> to vector<1x128xf32>
    %390 = vector.broadcast %389 : vector<1x128xf32> to vector<2x128xf32>
    %391 = arith.addf %388, %390 : vector<2x128xf32>
    %c0_154 = arith.constant 0 : index
    %392 = arith.index_cast %c4_i32 : i32 to index
    %c0_155 = arith.constant 0 : index
    %c0_156 = arith.constant 0 : index
    %393 = vector.load %arg2[%c0_154, %392, %c0_155, %c0_156] : memref<2x8x2x128xf32, #tpu.memory_space<vmem>>, vector<1x1x2x128xf32>
    %394 = vector.shape_cast %393 : vector<1x1x2x128xf32> to vector<2x128xf32>
    %395 = arith.mulf %391, %394 : vector<2x128xf32>
    %396 = arith.addf %356, %395 : vector<2x128xf32>
    %397 = arith.negf %396 : vector<2x128xf32>
    %398 = math.exp %397 : vector<2x128xf32>
    %cst_157 = arith.constant 1.000000e+00 : f32
    %399 = vector.broadcast %cst_157 : f32 to vector<2x128xf32>
    %400 = arith.addf %399, %398 : vector<2x128xf32>
    %401 = arith.divf %399, %400 : vector<2x128xf32>
    %402 = arith.mulf %396, %401 : vector<2x128xf32>
    %c1_158 = arith.constant 1 : index
    %403 = arith.index_cast %c4_i32 : i32 to index
    %c0_159 = arith.constant 0 : index
    %c0_160 = arith.constant 0 : index
    %404 = vector.load %arg1[%c1_158, %403, %c0_159, %c0_160] : memref<2x8x2x128xf32, #tpu.memory_space<vmem>>, vector<1x1x2x128xf32>
    %405 = vector.shape_cast %404 : vector<1x1x2x128xf32> to vector<2x128xf32>
    %c1_161 = arith.constant 1 : index
    %c0_162 = arith.constant 0 : index
    %c0_163 = arith.constant 0 : index
    %406 = vector.load %arg3[%c1_161, %c0_162, %c0_163] : memref<2x128x128xf32, #tpu.memory_space<vmem>>, vector<1x128x128xf32>
    %407 = vector.shape_cast %406 : vector<1x128x128xf32> to vector<128x128xf32>
    %cst_164 = arith.constant dense<0.000000e+00> : vector<2x128xf32>
    %408 = tpu.matmul %402, %407, %cst_164 {dimension_numbers = #tpu.dot_dimension_numbers<[1], [0], [0], [1], [0, 0, 1, 1], [], []>} : vector<2x128xf32>, vector<128x128xf32>, vector<2x128xf32> -> vector<2x128xf32>
    %409 = arith.addf %405, %408 : vector<2x128xf32>
    %cst_165 = arith.constant dense<0.000000e+00> : vector<2xf32>
    %410 = vector.multi_reduction <add>, %409, %cst_165 [1] : vector<2x128xf32> to vector<2xf32>
    %411 = vector.shape_cast %410 : vector<2xf32> to vector<2x1xf32>
    %cst_166 = arith.constant 1.280000e+02 : f32
    %412 = vector.broadcast %cst_166 : f32 to vector<2x1xf32>
    %413 = arith.divf %411, %412 : vector<2x1xf32>
    %414 = vector.broadcast %413 : vector<2x1xf32> to vector<2x128xf32>
    %415 = arith.subf %409, %414 : vector<2x128xf32>
    %416 = arith.mulf %415, %415 : vector<2x128xf32>
    %cst_167 = arith.constant dense<0.000000e+00> : vector<2xf32>
    %417 = vector.multi_reduction <add>, %416, %cst_167 [1] : vector<2x128xf32> to vector<2xf32>
    %418 = vector.shape_cast %417 : vector<2xf32> to vector<2x1xf32>
    %cst_168 = arith.constant 1.280000e+02 : f32
    %419 = vector.broadcast %cst_168 : f32 to vector<2x1xf32>
    %420 = arith.divf %418, %419 : vector<2x1xf32>
    %421 = vector.broadcast %413 : vector<2x1xf32> to vector<2x128xf32>
    %422 = arith.subf %409, %421 : vector<2x128xf32>
    %cst_169 = arith.constant 9.99999974E-6 : f32
    %423 = vector.broadcast %cst_169 : f32 to vector<2x1xf32>
    %424 = arith.addf %420, %423 : vector<2x1xf32>
    %425 = math.rsqrt %424 : vector<2x1xf32>
    %426 = vector.broadcast %425 : vector<2x1xf32> to vector<2x128xf32>
    %427 = arith.mulf %422, %426 : vector<2x128xf32>
    %428 = vector.shape_cast %3 : vector<128xf32> to vector<1x128xf32>
    %429 = vector.broadcast %428 : vector<1x128xf32> to vector<2x128xf32>
    %430 = arith.mulf %427, %429 : vector<2x128xf32>
    %431 = vector.shape_cast %7 : vector<128xf32> to vector<1x128xf32>
    %432 = vector.broadcast %431 : vector<1x128xf32> to vector<2x128xf32>
    %433 = arith.addf %430, %432 : vector<2x128xf32>
    %c1_170 = arith.constant 1 : index
    %434 = arith.index_cast %c4_i32 : i32 to index
    %c0_171 = arith.constant 0 : index
    %c0_172 = arith.constant 0 : index
    %435 = vector.load %arg2[%c1_170, %434, %c0_171, %c0_172] : memref<2x8x2x128xf32, #tpu.memory_space<vmem>>, vector<1x1x2x128xf32>
    %436 = vector.shape_cast %435 : vector<1x1x2x128xf32> to vector<2x128xf32>
    %437 = arith.mulf %433, %436 : vector<2x128xf32>
    %438 = arith.addf %402, %437 : vector<2x128xf32>
    %439 = arith.negf %438 : vector<2x128xf32>
    %440 = math.exp %439 : vector<2x128xf32>
    %cst_173 = arith.constant 1.000000e+00 : f32
    %441 = vector.broadcast %cst_173 : f32 to vector<2x128xf32>
    %442 = arith.addf %441, %440 : vector<2x128xf32>
    %443 = arith.divf %441, %442 : vector<2x128xf32>
    %444 = arith.mulf %438, %443 : vector<2x128xf32>
    %445 = arith.index_cast %c4_i32 : i32 to index
    %c0_174 = arith.constant 0 : index
    %c0_175 = arith.constant 0 : index
    %446 = vector.load %arg6[%445, %c0_174, %c0_175] : memref<8x2x128xf32, #tpu.memory_space<vmem>>, vector<1x2x128xf32>
    %447 = vector.shape_cast %446 : vector<1x2x128xf32> to vector<2x128xf32>
    %448 = vector.shape_cast %444 : vector<2x128xf32> to vector<1x2x128xf32>
    tpu.vector_store %arg6[%445, %c0_174, %c0_175], %448 {strides = array<i32>} : memref<8x2x128xf32, #tpu.memory_space<vmem>>, vector<1x2x128xf32>,
    %c5_i32 = arith.constant 5 : i32
    %c0_176 = arith.constant 0 : index
    %449 = arith.index_cast %c5_i32 : i32 to index
    %c0_177 = arith.constant 0 : index
    %c0_178 = arith.constant 0 : index
    %450 = vector.load %arg1[%c0_176, %449, %c0_177, %c0_178] : memref<2x8x2x128xf32, #tpu.memory_space<vmem>>, vector<1x1x2x128xf32>
    %451 = vector.shape_cast %450 : vector<1x1x2x128xf32> to vector<2x128xf32>
    %c0_179 = arith.constant 0 : index
    %c0_180 = arith.constant 0 : index
    %c0_181 = arith.constant 0 : index
    %452 = vector.load %arg3[%c0_179, %c0_180, %c0_181] : memref<2x128x128xf32, #tpu.memory_space<vmem>>, vector<1x128x128xf32>
    %453 = vector.shape_cast %452 : vector<1x128x128xf32> to vector<128x128xf32>
    %cst_182 = arith.constant dense<0.000000e+00> : vector<2x128xf32>
    %454 = tpu.matmul %444, %453, %cst_182 {dimension_numbers = #tpu.dot_dimension_numbers<[1], [0], [0], [1], [0, 0, 1, 1], [], []>} : vector<2x128xf32>, vector<128x128xf32>, vector<2x128xf32> -> vector<2x128xf32>
    %455 = arith.addf %451, %454 : vector<2x128xf32>
    %cst_183 = arith.constant dense<0.000000e+00> : vector<2xf32>
    %456 = vector.multi_reduction <add>, %455, %cst_183 [1] : vector<2x128xf32> to vector<2xf32>
    %457 = vector.shape_cast %456 : vector<2xf32> to vector<2x1xf32>
    %cst_184 = arith.constant 1.280000e+02 : f32
    %458 = vector.broadcast %cst_184 : f32 to vector<2x1xf32>
    %459 = arith.divf %457, %458 : vector<2x1xf32>
    %460 = vector.broadcast %459 : vector<2x1xf32> to vector<2x128xf32>
    %461 = arith.subf %455, %460 : vector<2x128xf32>
    %462 = arith.mulf %461, %461 : vector<2x128xf32>
    %cst_185 = arith.constant dense<0.000000e+00> : vector<2xf32>
    %463 = vector.multi_reduction <add>, %462, %cst_185 [1] : vector<2x128xf32> to vector<2xf32>
    %464 = vector.shape_cast %463 : vector<2xf32> to vector<2x1xf32>
    %cst_186 = arith.constant 1.280000e+02 : f32
    %465 = vector.broadcast %cst_186 : f32 to vector<2x1xf32>
    %466 = arith.divf %464, %465 : vector<2x1xf32>
    %467 = vector.broadcast %459 : vector<2x1xf32> to vector<2x128xf32>
    %468 = arith.subf %455, %467 : vector<2x128xf32>
    %cst_187 = arith.constant 9.99999974E-6 : f32
    %469 = vector.broadcast %cst_187 : f32 to vector<2x1xf32>
    %470 = arith.addf %466, %469 : vector<2x1xf32>
    %471 = math.rsqrt %470 : vector<2x1xf32>
    %472 = vector.broadcast %471 : vector<2x1xf32> to vector<2x128xf32>
    %473 = arith.mulf %468, %472 : vector<2x128xf32>
    %474 = vector.shape_cast %1 : vector<128xf32> to vector<1x128xf32>
    %475 = vector.broadcast %474 : vector<1x128xf32> to vector<2x128xf32>
    %476 = arith.mulf %473, %475 : vector<2x128xf32>
    %477 = vector.shape_cast %5 : vector<128xf32> to vector<1x128xf32>
    %478 = vector.broadcast %477 : vector<1x128xf32> to vector<2x128xf32>
    %479 = arith.addf %476, %478 : vector<2x128xf32>
    %c0_188 = arith.constant 0 : index
    %480 = arith.index_cast %c5_i32 : i32 to index
    %c0_189 = arith.constant 0 : index
    %c0_190 = arith.constant 0 : index
    %481 = vector.load %arg2[%c0_188, %480, %c0_189, %c0_190] : memref<2x8x2x128xf32, #tpu.memory_space<vmem>>, vector<1x1x2x128xf32>
    %482 = vector.shape_cast %481 : vector<1x1x2x128xf32> to vector<2x128xf32>
    %483 = arith.mulf %479, %482 : vector<2x128xf32>
    %484 = arith.addf %444, %483 : vector<2x128xf32>
    %485 = arith.negf %484 : vector<2x128xf32>
    %486 = math.exp %485 : vector<2x128xf32>
    %cst_191 = arith.constant 1.000000e+00 : f32
    %487 = vector.broadcast %cst_191 : f32 to vector<2x128xf32>
    %488 = arith.addf %487, %486 : vector<2x128xf32>
    %489 = arith.divf %487, %488 : vector<2x128xf32>
    %490 = arith.mulf %484, %489 : vector<2x128xf32>
    %c1_192 = arith.constant 1 : index
    %491 = arith.index_cast %c5_i32 : i32 to index
    %c0_193 = arith.constant 0 : index
    %c0_194 = arith.constant 0 : index
    %492 = vector.load %arg1[%c1_192, %491, %c0_193, %c0_194] : memref<2x8x2x128xf32, #tpu.memory_space<vmem>>, vector<1x1x2x128xf32>
    %493 = vector.shape_cast %492 : vector<1x1x2x128xf32> to vector<2x128xf32>
    %c1_195 = arith.constant 1 : index
    %c0_196 = arith.constant 0 : index
    %c0_197 = arith.constant 0 : index
    %494 = vector.load %arg3[%c1_195, %c0_196, %c0_197] : memref<2x128x128xf32, #tpu.memory_space<vmem>>, vector<1x128x128xf32>
    %495 = vector.shape_cast %494 : vector<1x128x128xf32> to vector<128x128xf32>
    %cst_198 = arith.constant dense<0.000000e+00> : vector<2x128xf32>
    %496 = tpu.matmul %490, %495, %cst_198 {dimension_numbers = #tpu.dot_dimension_numbers<[1], [0], [0], [1], [0, 0, 1, 1], [], []>} : vector<2x128xf32>, vector<128x128xf32>, vector<2x128xf32> -> vector<2x128xf32>
    %497 = arith.addf %493, %496 : vector<2x128xf32>
    %cst_199 = arith.constant dense<0.000000e+00> : vector<2xf32>
    %498 = vector.multi_reduction <add>, %497, %cst_199 [1] : vector<2x128xf32> to vector<2xf32>
    %499 = vector.shape_cast %498 : vector<2xf32> to vector<2x1xf32>
    %cst_200 = arith.constant 1.280000e+02 : f32
    %500 = vector.broadcast %cst_200 : f32 to vector<2x1xf32>
    %501 = arith.divf %499, %500 : vector<2x1xf32>
    %502 = vector.broadcast %501 : vector<2x1xf32> to vector<2x128xf32>
    %503 = arith.subf %497, %502 : vector<2x128xf32>
    %504 = arith.mulf %503, %503 : vector<2x128xf32>
    %cst_201 = arith.constant dense<0.000000e+00> : vector<2xf32>
    %505 = vector.multi_reduction <add>, %504, %cst_201 [1] : vector<2x128xf32> to vector<2xf32>
    %506 = vector.shape_cast %505 : vector<2xf32> to vector<2x1xf32>
    %cst_202 = arith.constant 1.280000e+02 : f32
    %507 = vector.broadcast %cst_202 : f32 to vector<2x1xf32>
    %508 = arith.divf %506, %507 : vector<2x1xf32>
    %509 = vector.broadcast %501 : vector<2x1xf32> to vector<2x128xf32>
    %510 = arith.subf %497, %509 : vector<2x128xf32>
    %cst_203 = arith.constant 9.99999974E-6 : f32
    %511 = vector.broadcast %cst_203 : f32 to vector<2x1xf32>
    %512 = arith.addf %508, %511 : vector<2x1xf32>
    %513 = math.rsqrt %512 : vector<2x1xf32>
    %514 = vector.broadcast %513 : vector<2x1xf32> to vector<2x128xf32>
    %515 = arith.mulf %510, %514 : vector<2x128xf32>
    %516 = vector.shape_cast %3 : vector<128xf32> to vector<1x128xf32>
    %517 = vector.broadcast %516 : vector<1x128xf32> to vector<2x128xf32>
    %518 = arith.mulf %515, %517 : vector<2x128xf32>
    %519 = vector.shape_cast %7 : vector<128xf32> to vector<1x128xf32>
    %520 = vector.broadcast %519 : vector<1x128xf32> to vector<2x128xf32>
    %521 = arith.addf %518, %520 : vector<2x128xf32>
    %c1_204 = arith.constant 1 : index
    %522 = arith.index_cast %c5_i32 : i32 to index
    %c0_205 = arith.constant 0 : index
    %c0_206 = arith.constant 0 : index
    %523 = vector.load %arg2[%c1_204, %522, %c0_205, %c0_206] : memref<2x8x2x128xf32, #tpu.memory_space<vmem>>, vector<1x1x2x128xf32>
    %524 = vector.shape_cast %523 : vector<1x1x2x128xf32> to vector<2x128xf32>
    %525 = arith.mulf %521, %524 : vector<2x128xf32>
    %526 = arith.addf %490, %525 : vector<2x128xf32>
    %527 = arith.negf %526 : vector<2x128xf32>
    %528 = math.exp %527 : vector<2x128xf32>
    %cst_207 = arith.constant 1.000000e+00 : f32
    %529 = vector.broadcast %cst_207 : f32 to vector<2x128xf32>
    %530 = arith.addf %529, %528 : vector<2x128xf32>
    %531 = arith.divf %529, %530 : vector<2x128xf32>
    %532 = arith.mulf %526, %531 : vector<2x128xf32>
    %533 = arith.index_cast %c5_i32 : i32 to index
    %c0_208 = arith.constant 0 : index
    %c0_209 = arith.constant 0 : index
    %534 = vector.load %arg6[%533, %c0_208, %c0_209] : memref<8x2x128xf32, #tpu.memory_space<vmem>>, vector<1x2x128xf32>
    %535 = vector.shape_cast %534 : vector<1x2x128xf32> to vector<2x128xf32>
    %536 = vector.shape_cast %532 : vector<2x128xf32> to vector<1x2x128xf32>
    tpu.vector_store %arg6[%533, %c0_208, %c0_209], %536 {strides = array<i32>} : memref<8x2x128xf32, #tpu.memory_space<vmem>>, vector<1x2x128xf32>,
    %c6_i32 = arith.constant 6 : i32
    %c0_210 = arith.constant 0 : index
    %537 = arith.index_cast %c6_i32 : i32 to index
    %c0_211 = arith.constant 0 : index
    %c0_212 = arith.constant 0 : index
    %538 = vector.load %arg1[%c0_210, %537, %c0_211, %c0_212] : memref<2x8x2x128xf32, #tpu.memory_space<vmem>>, vector<1x1x2x128xf32>
    %539 = vector.shape_cast %538 : vector<1x1x2x128xf32> to vector<2x128xf32>
    %c0_213 = arith.constant 0 : index
    %c0_214 = arith.constant 0 : index
    %c0_215 = arith.constant 0 : index
    %540 = vector.load %arg3[%c0_213, %c0_214, %c0_215] : memref<2x128x128xf32, #tpu.memory_space<vmem>>, vector<1x128x128xf32>
    %541 = vector.shape_cast %540 : vector<1x128x128xf32> to vector<128x128xf32>
    %cst_216 = arith.constant dense<0.000000e+00> : vector<2x128xf32>
    %542 = tpu.matmul %532, %541, %cst_216 {dimension_numbers = #tpu.dot_dimension_numbers<[1], [0], [0], [1], [0, 0, 1, 1], [], []>} : vector<2x128xf32>, vector<128x128xf32>, vector<2x128xf32> -> vector<2x128xf32>
    %543 = arith.addf %539, %542 : vector<2x128xf32>
    %cst_217 = arith.constant dense<0.000000e+00> : vector<2xf32>
    %544 = vector.multi_reduction <add>, %543, %cst_217 [1] : vector<2x128xf32> to vector<2xf32>
    %545 = vector.shape_cast %544 : vector<2xf32> to vector<2x1xf32>
    %cst_218 = arith.constant 1.280000e+02 : f32
    %546 = vector.broadcast %cst_218 : f32 to vector<2x1xf32>
    %547 = arith.divf %545, %546 : vector<2x1xf32>
    %548 = vector.broadcast %547 : vector<2x1xf32> to vector<2x128xf32>
    %549 = arith.subf %543, %548 : vector<2x128xf32>
    %550 = arith.mulf %549, %549 : vector<2x128xf32>
    %cst_219 = arith.constant dense<0.000000e+00> : vector<2xf32>
    %551 = vector.multi_reduction <add>, %550, %cst_219 [1] : vector<2x128xf32> to vector<2xf32>
    %552 = vector.shape_cast %551 : vector<2xf32> to vector<2x1xf32>
    %cst_220 = arith.constant 1.280000e+02 : f32
    %553 = vector.broadcast %cst_220 : f32 to vector<2x1xf32>
    %554 = arith.divf %552, %553 : vector<2x1xf32>
    %555 = vector.broadcast %547 : vector<2x1xf32> to vector<2x128xf32>
    %556 = arith.subf %543, %555 : vector<2x128xf32>
    %cst_221 = arith.constant 9.99999974E-6 : f32
    %557 = vector.broadcast %cst_221 : f32 to vector<2x1xf32>
    %558 = arith.addf %554, %557 : vector<2x1xf32>
    %559 = math.rsqrt %558 : vector<2x1xf32>
    %560 = vector.broadcast %559 : vector<2x1xf32> to vector<2x128xf32>
    %561 = arith.mulf %556, %560 : vector<2x128xf32>
    %562 = vector.shape_cast %1 : vector<128xf32> to vector<1x128xf32>
    %563 = vector.broadcast %562 : vector<1x128xf32> to vector<2x128xf32>
    %564 = arith.mulf %561, %563 : vector<2x128xf32>
    %565 = vector.shape_cast %5 : vector<128xf32> to vector<1x128xf32>
    %566 = vector.broadcast %565 : vector<1x128xf32> to vector<2x128xf32>
    %567 = arith.addf %564, %566 : vector<2x128xf32>
    %c0_222 = arith.constant 0 : index
    %568 = arith.index_cast %c6_i32 : i32 to index
    %c0_223 = arith.constant 0 : index
    %c0_224 = arith.constant 0 : index
    %569 = vector.load %arg2[%c0_222, %568, %c0_223, %c0_224] : memref<2x8x2x128xf32, #tpu.memory_space<vmem>>, vector<1x1x2x128xf32>
    %570 = vector.shape_cast %569 : vector<1x1x2x128xf32> to vector<2x128xf32>
    %571 = arith.mulf %567, %570 : vector<2x128xf32>
    %572 = arith.addf %532, %571 : vector<2x128xf32>
    %573 = arith.negf %572 : vector<2x128xf32>
    %574 = math.exp %573 : vector<2x128xf32>
    %cst_225 = arith.constant 1.000000e+00 : f32
    %575 = vector.broadcast %cst_225 : f32 to vector<2x128xf32>
    %576 = arith.addf %575, %574 : vector<2x128xf32>
    %577 = arith.divf %575, %576 : vector<2x128xf32>
    %578 = arith.mulf %572, %577 : vector<2x128xf32>
    %c1_226 = arith.constant 1 : index
    %579 = arith.index_cast %c6_i32 : i32 to index
    %c0_227 = arith.constant 0 : index
    %c0_228 = arith.constant 0 : index
    %580 = vector.load %arg1[%c1_226, %579, %c0_227, %c0_228] : memref<2x8x2x128xf32, #tpu.memory_space<vmem>>, vector<1x1x2x128xf32>
    %581 = vector.shape_cast %580 : vector<1x1x2x128xf32> to vector<2x128xf32>
    %c1_229 = arith.constant 1 : index
    %c0_230 = arith.constant 0 : index
    %c0_231 = arith.constant 0 : index
    %582 = vector.load %arg3[%c1_229, %c0_230, %c0_231] : memref<2x128x128xf32, #tpu.memory_space<vmem>>, vector<1x128x128xf32>
    %583 = vector.shape_cast %582 : vector<1x128x128xf32> to vector<128x128xf32>
    %cst_232 = arith.constant dense<0.000000e+00> : vector<2x128xf32>
    %584 = tpu.matmul %578, %583, %cst_232 {dimension_numbers = #tpu.dot_dimension_numbers<[1], [0], [0], [1], [0, 0, 1, 1], [], []>} : vector<2x128xf32>, vector<128x128xf32>, vector<2x128xf32> -> vector<2x128xf32>
    %585 = arith.addf %581, %584 : vector<2x128xf32>
    %cst_233 = arith.constant dense<0.000000e+00> : vector<2xf32>
    %586 = vector.multi_reduction <add>, %585, %cst_233 [1] : vector<2x128xf32> to vector<2xf32>
    %587 = vector.shape_cast %586 : vector<2xf32> to vector<2x1xf32>
    %cst_234 = arith.constant 1.280000e+02 : f32
    %588 = vector.broadcast %cst_234 : f32 to vector<2x1xf32>
    %589 = arith.divf %587, %588 : vector<2x1xf32>
    %590 = vector.broadcast %589 : vector<2x1xf32> to vector<2x128xf32>
    %591 = arith.subf %585, %590 : vector<2x128xf32>
    %592 = arith.mulf %591, %591 : vector<2x128xf32>
    %cst_235 = arith.constant dense<0.000000e+00> : vector<2xf32>
    %593 = vector.multi_reduction <add>, %592, %cst_235 [1] : vector<2x128xf32> to vector<2xf32>
    %594 = vector.shape_cast %593 : vector<2xf32> to vector<2x1xf32>
    %cst_236 = arith.constant 1.280000e+02 : f32
    %595 = vector.broadcast %cst_236 : f32 to vector<2x1xf32>
    %596 = arith.divf %594, %595 : vector<2x1xf32>
    %597 = vector.broadcast %589 : vector<2x1xf32> to vector<2x128xf32>
    %598 = arith.subf %585, %597 : vector<2x128xf32>
    %cst_237 = arith.constant 9.99999974E-6 : f32
    %599 = vector.broadcast %cst_237 : f32 to vector<2x1xf32>
    %600 = arith.addf %596, %599 : vector<2x1xf32>
    %601 = math.rsqrt %600 : vector<2x1xf32>
    %602 = vector.broadcast %601 : vector<2x1xf32> to vector<2x128xf32>
    %603 = arith.mulf %598, %602 : vector<2x128xf32>
    %604 = vector.shape_cast %3 : vector<128xf32> to vector<1x128xf32>
    %605 = vector.broadcast %604 : vector<1x128xf32> to vector<2x128xf32>
    %606 = arith.mulf %603, %605 : vector<2x128xf32>
    %607 = vector.shape_cast %7 : vector<128xf32> to vector<1x128xf32>
    %608 = vector.broadcast %607 : vector<1x128xf32> to vector<2x128xf32>
    %609 = arith.addf %606, %608 : vector<2x128xf32>
    %c1_238 = arith.constant 1 : index
    %610 = arith.index_cast %c6_i32 : i32 to index
    %c0_239 = arith.constant 0 : index
    %c0_240 = arith.constant 0 : index
    %611 = vector.load %arg2[%c1_238, %610, %c0_239, %c0_240] : memref<2x8x2x128xf32, #tpu.memory_space<vmem>>, vector<1x1x2x128xf32>
    %612 = vector.shape_cast %611 : vector<1x1x2x128xf32> to vector<2x128xf32>
    %613 = arith.mulf %609, %612 : vector<2x128xf32>
    %614 = arith.addf %578, %613 : vector<2x128xf32>
    %615 = arith.negf %614 : vector<2x128xf32>
    %616 = math.exp %615 : vector<2x128xf32>
    %cst_241 = arith.constant 1.000000e+00 : f32
    %617 = vector.broadcast %cst_241 : f32 to vector<2x128xf32>
    %618 = arith.addf %617, %616 : vector<2x128xf32>
    %619 = arith.divf %617, %618 : vector<2x128xf32>
    %620 = arith.mulf %614, %619 : vector<2x128xf32>
    %621 = arith.index_cast %c6_i32 : i32 to index
    %c0_242 = arith.constant 0 : index
    %c0_243 = arith.constant 0 : index
    %622 = vector.load %arg6[%621, %c0_242, %c0_243] : memref<8x2x128xf32, #tpu.memory_space<vmem>>, vector<1x2x128xf32>
    %623 = vector.shape_cast %622 : vector<1x2x128xf32> to vector<2x128xf32>
    %624 = vector.shape_cast %620 : vector<2x128xf32> to vector<1x2x128xf32>
    tpu.vector_store %arg6[%621, %c0_242, %c0_243], %624 {strides = array<i32>} : memref<8x2x128xf32, #tpu.memory_space<vmem>>, vector<1x2x128xf32>,
    %c7_i32 = arith.constant 7 : i32
    %c0_244 = arith.constant 0 : index
    %625 = arith.index_cast %c7_i32 : i32 to index
    %c0_245 = arith.constant 0 : index
    %c0_246 = arith.constant 0 : index
    %626 = vector.load %arg1[%c0_244, %625, %c0_245, %c0_246] : memref<2x8x2x128xf32, #tpu.memory_space<vmem>>, vector<1x1x2x128xf32>
    %627 = vector.shape_cast %626 : vector<1x1x2x128xf32> to vector<2x128xf32>
    %c0_247 = arith.constant 0 : index
    %c0_248 = arith.constant 0 : index
    %c0_249 = arith.constant 0 : index
    %628 = vector.load %arg3[%c0_247, %c0_248, %c0_249] : memref<2x128x128xf32, #tpu.memory_space<vmem>>, vector<1x128x128xf32>
    %629 = vector.shape_cast %628 : vector<1x128x128xf32> to vector<128x128xf32>
    %cst_250 = arith.constant dense<0.000000e+00> : vector<2x128xf32>
    %630 = tpu.matmul %620, %629, %cst_250 {dimension_numbers = #tpu.dot_dimension_numbers<[1], [0], [0], [1], [0, 0, 1, 1], [], []>} : vector<2x128xf32>, vector<128x128xf32>, vector<2x128xf32> -> vector<2x128xf32>
    %631 = arith.addf %627, %630 : vector<2x128xf32>
    %cst_251 = arith.constant dense<0.000000e+00> : vector<2xf32>
    %632 = vector.multi_reduction <add>, %631, %cst_251 [1] : vector<2x128xf32> to vector<2xf32>
    %633 = vector.shape_cast %632 : vector<2xf32> to vector<2x1xf32>
    %cst_252 = arith.constant 1.280000e+02 : f32
    %634 = vector.broadcast %cst_252 : f32 to vector<2x1xf32>
    %635 = arith.divf %633, %634 : vector<2x1xf32>
    %636 = vector.broadcast %635 : vector<2x1xf32> to vector<2x128xf32>
    %637 = arith.subf %631, %636 : vector<2x128xf32>
    %638 = arith.mulf %637, %637 : vector<2x128xf32>
    %cst_253 = arith.constant dense<0.000000e+00> : vector<2xf32>
    %639 = vector.multi_reduction <add>, %638, %cst_253 [1] : vector<2x128xf32> to vector<2xf32>
    %640 = vector.shape_cast %639 : vector<2xf32> to vector<2x1xf32>
    %cst_254 = arith.constant 1.280000e+02 : f32
    %641 = vector.broadcast %cst_254 : f32 to vector<2x1xf32>
    %642 = arith.divf %640, %641 : vector<2x1xf32>
    %643 = vector.broadcast %635 : vector<2x1xf32> to vector<2x128xf32>
    %644 = arith.subf %631, %643 : vector<2x128xf32>
    %cst_255 = arith.constant 9.99999974E-6 : f32
    %645 = vector.broadcast %cst_255 : f32 to vector<2x1xf32>
    %646 = arith.addf %642, %645 : vector<2x1xf32>
    %647 = math.rsqrt %646 : vector<2x1xf32>
    %648 = vector.broadcast %647 : vector<2x1xf32> to vector<2x128xf32>
    %649 = arith.mulf %644, %648 : vector<2x128xf32>
    %650 = vector.shape_cast %1 : vector<128xf32> to vector<1x128xf32>
    %651 = vector.broadcast %650 : vector<1x128xf32> to vector<2x128xf32>
    %652 = arith.mulf %649, %651 : vector<2x128xf32>
    %653 = vector.shape_cast %5 : vector<128xf32> to vector<1x128xf32>
    %654 = vector.broadcast %653 : vector<1x128xf32> to vector<2x128xf32>
    %655 = arith.addf %652, %654 : vector<2x128xf32>
    %c0_256 = arith.constant 0 : index
    %656 = arith.index_cast %c7_i32 : i32 to index
    %c0_257 = arith.constant 0 : index
    %c0_258 = arith.constant 0 : index
    %657 = vector.load %arg2[%c0_256, %656, %c0_257, %c0_258] : memref<2x8x2x128xf32, #tpu.memory_space<vmem>>, vector<1x1x2x128xf32>
    %658 = vector.shape_cast %657 : vector<1x1x2x128xf32> to vector<2x128xf32>
    %659 = arith.mulf %655, %658 : vector<2x128xf32>
    %660 = arith.addf %620, %659 : vector<2x128xf32>
    %661 = arith.negf %660 : vector<2x128xf32>
    %662 = math.exp %661 : vector<2x128xf32>
    %cst_259 = arith.constant 1.000000e+00 : f32
    %663 = vector.broadcast %cst_259 : f32 to vector<2x128xf32>
    %664 = arith.addf %663, %662 : vector<2x128xf32>
    %665 = arith.divf %663, %664 : vector<2x128xf32>
    %666 = arith.mulf %660, %665 : vector<2x128xf32>
    %c1_260 = arith.constant 1 : index
    %667 = arith.index_cast %c7_i32 : i32 to index
    %c0_261 = arith.constant 0 : index
    %c0_262 = arith.constant 0 : index
    %668 = vector.load %arg1[%c1_260, %667, %c0_261, %c0_262] : memref<2x8x2x128xf32, #tpu.memory_space<vmem>>, vector<1x1x2x128xf32>
    %669 = vector.shape_cast %668 : vector<1x1x2x128xf32> to vector<2x128xf32>
    %c1_263 = arith.constant 1 : index
    %c0_264 = arith.constant 0 : index
    %c0_265 = arith.constant 0 : index
    %670 = vector.load %arg3[%c1_263, %c0_264, %c0_265] : memref<2x128x128xf32, #tpu.memory_space<vmem>>, vector<1x128x128xf32>
    %671 = vector.shape_cast %670 : vector<1x128x128xf32> to vector<128x128xf32>
    %cst_266 = arith.constant dense<0.000000e+00> : vector<2x128xf32>
    %672 = tpu.matmul %666, %671, %cst_266 {dimension_numbers = #tpu.dot_dimension_numbers<[1], [0], [0], [1], [0, 0, 1, 1], [], []>} : vector<2x128xf32>, vector<128x128xf32>, vector<2x128xf32> -> vector<2x128xf32>
    %673 = arith.addf %669, %672 : vector<2x128xf32>
    %cst_267 = arith.constant dense<0.000000e+00> : vector<2xf32>
    %674 = vector.multi_reduction <add>, %673, %cst_267 [1] : vector<2x128xf32> to vector<2xf32>
    %675 = vector.shape_cast %674 : vector<2xf32> to vector<2x1xf32>
    %cst_268 = arith.constant 1.280000e+02 : f32
    %676 = vector.broadcast %cst_268 : f32 to vector<2x1xf32>
    %677 = arith.divf %675, %676 : vector<2x1xf32>
    %678 = vector.broadcast %677 : vector<2x1xf32> to vector<2x128xf32>
    %679 = arith.subf %673, %678 : vector<2x128xf32>
    %680 = arith.mulf %679, %679 : vector<2x128xf32>
    %cst_269 = arith.constant dense<0.000000e+00> : vector<2xf32>
    %681 = vector.multi_reduction <add>, %680, %cst_269 [1] : vector<2x128xf32> to vector<2xf32>
    %682 = vector.shape_cast %681 : vector<2xf32> to vector<2x1xf32>
    %cst_270 = arith.constant 1.280000e+02 : f32
    %683 = vector.broadcast %cst_270 : f32 to vector<2x1xf32>
    %684 = arith.divf %682, %683 : vector<2x1xf32>
    %685 = vector.broadcast %677 : vector<2x1xf32> to vector<2x128xf32>
    %686 = arith.subf %673, %685 : vector<2x128xf32>
    %cst_271 = arith.constant 9.99999974E-6 : f32
    %687 = vector.broadcast %cst_271 : f32 to vector<2x1xf32>
    %688 = arith.addf %684, %687 : vector<2x1xf32>
    %689 = math.rsqrt %688 : vector<2x1xf32>
    %690 = vector.broadcast %689 : vector<2x1xf32> to vector<2x128xf32>
    %691 = arith.mulf %686, %690 : vector<2x128xf32>
    %692 = vector.shape_cast %3 : vector<128xf32> to vector<1x128xf32>
    %693 = vector.broadcast %692 : vector<1x128xf32> to vector<2x128xf32>
    %694 = arith.mulf %691, %693 : vector<2x128xf32>
    %695 = vector.shape_cast %7 : vector<128xf32> to vector<1x128xf32>
    %696 = vector.broadcast %695 : vector<1x128xf32> to vector<2x128xf32>
    %697 = arith.addf %694, %696 : vector<2x128xf32>
    %c1_272 = arith.constant 1 : index
    %698 = arith.index_cast %c7_i32 : i32 to index
    %c0_273 = arith.constant 0 : index
    %c0_274 = arith.constant 0 : index
    %699 = vector.load %arg2[%c1_272, %698, %c0_273, %c0_274] : memref<2x8x2x128xf32, #tpu.memory_space<vmem>>, vector<1x1x2x128xf32>
    %700 = vector.shape_cast %699 : vector<1x1x2x128xf32> to vector<2x128xf32>
    %701 = arith.mulf %697, %700 : vector<2x128xf32>
    %702 = arith.addf %666, %701 : vector<2x128xf32>
    %703 = arith.negf %702 : vector<2x128xf32>
    %704 = math.exp %703 : vector<2x128xf32>
    %cst_275 = arith.constant 1.000000e+00 : f32
    %705 = vector.broadcast %cst_275 : f32 to vector<2x128xf32>
    %706 = arith.addf %705, %704 : vector<2x128xf32>
    %707 = arith.divf %705, %706 : vector<2x128xf32>
    %708 = arith.mulf %702, %707 : vector<2x128xf32>
    %709 = arith.index_cast %c7_i32 : i32 to index
    %c0_276 = arith.constant 0 : index
    %c0_277 = arith.constant 0 : index
    %710 = vector.load %arg6[%709, %c0_276, %c0_277] : memref<8x2x128xf32, #tpu.memory_space<vmem>>, vector<1x2x128xf32>
    %711 = vector.shape_cast %710 : vector<1x2x128xf32> to vector<2x128xf32>
    %712 = vector.shape_cast %708 : vector<2x128xf32> to vector<1x2x128xf32>
    tpu.vector_store %arg6[%709, %c0_276, %c0_277], %712 {strides = array<i32>} : memref<8x2x128xf32, #tpu.memory_space<vmem>>, vector<1x2x128xf32>,
    %c8_i32 = arith.constant 8 : i32
    return
  }
  func.func @transform_0(%arg0: i32) -> (i32, i32, i32, i32) {
    %c0_i32 = arith.constant 0 : i32
    %c0_i32_0 = arith.constant 0 : i32
    %c0_i32_1 = arith.constant 0 : i32
    %c0_i32_2 = arith.constant 0 : i32
    %c0_i32_3 = arith.constant 0 : i32
    return %c0_i32, %c0_i32_0, %c0_i32_1, %c0_i32_2 : i32, i32, i32, i32
  }
  func.func @transform_1(%arg0: i32) -> (i32, i32, i32, i32) {
    %c0_i32 = arith.constant 0 : i32
    %c0_i32_0 = arith.constant 0 : i32
    %c0_i32_1 = arith.constant 0 : i32
    %c0_i32_2 = arith.constant 0 : i32
    %c0_i32_3 = arith.constant 0 : i32
    return %c0_i32, %c0_i32_0, %c0_i32_1, %c0_i32_2 : i32, i32, i32, i32
  }
  func.func @transform_2(%arg0: i32) -> (i32, i32, i32) {
    %c0_i32 = arith.constant 0 : i32
    %c0_i32_0 = arith.constant 0 : i32
    %c0_i32_1 = arith.constant 0 : i32
    %c0_i32_2 = arith.constant 0 : i32
    return %c0_i32, %c0_i32_0, %c0_i32_1 : i32, i32, i32
  }
  func.func @transform_3(%arg0: i32) -> (i32, i32) {
    %c0_i32 = arith.constant 0 : i32
    %c0_i32_0 = arith.constant 0 : i32
    %c0_i32_1 = arith.constant 0 : i32
    return %c0_i32, %c0_i32_0 : i32, i32
  }
  func.func @transform_4(%arg0: i32) -> (i32, i32) {
    %c0_i32 = arith.constant 0 : i32
    %c0_i32_0 = arith.constant 0 : i32
    %c0_i32_1 = arith.constant 0 : i32
    return %c0_i32, %c0_i32_0 : i32, i32
  }
  func.func @transform_5(%arg0: i32) -> (i32, i32, i32) {
    %c0_i32 = arith.constant 0 : i32
    %c0_i32_0 = arith.constant 0 : i32
    %c0_i32_1 = arith.constant 0 : i32
    %c0_i32_2 = arith.constant 0 : i32
    return %c0_i32, %c0_i32_0, %c0_i32_1 : i32, i32, i32
  }
}

module attributes {stable_mosaic.version = 11 : i64} {
  func.func @head_kernel(%arg0: i32, %arg1: memref<16x128xf32, #tpu.memory_space<vmem>>, %arg2: memref<128x256xf32, #tpu.memory_space<vmem>>, %arg3: memref<1x256xf32, #tpu.memory_space<vmem>>, %arg4: memref<16x256xf32, #tpu.memory_space<vmem>>) attributes {dimension_semantics = [#tpu.dimension_semantics<parallel>], iteration_bounds = array<i64: 1>, scalar_prefetch = 0 : i64, scratch_operands = 0 : i64, tpu.core_type = #tpu.core_type<tc>, window_params = [{pipeline_mode = #tpu.pipeline_mode<synchronous>, transform_indices = @transform_0, window_bounds = array<i64: 16, 128>}, {transform_indices = @transform_1, window_bounds = array<i64: 128, 256>}, {transform_indices = @transform_2, window_bounds = array<i64: 1, 256>}, {transform_indices = @transform_3, window_bounds = array<i64: 16, 256>}]} {
    %c0 = arith.constant 0 : index
    %c0_0 = arith.constant 0 : index
    %0 = vector.load %arg1[%c0, %c0_0] : memref<16x128xf32, #tpu.memory_space<vmem>>, vector<16x128xf32>
    %c0_1 = arith.constant 0 : index
    %c0_2 = arith.constant 0 : index
    %1 = vector.load %arg2[%c0_1, %c0_2] : memref<128x256xf32, #tpu.memory_space<vmem>>, vector<128x256xf32>
    %cst = arith.constant dense<0.000000e+00> : vector<16x256xf32>
    %2 = tpu.matmul %0, %1, %cst {dimension_numbers = #tpu.dot_dimension_numbers<[1], [0], [0], [1], [0, 0, 1, 1], [], []>} : vector<16x128xf32>, vector<128x256xf32>, vector<16x256xf32> -> vector<16x256xf32>
    %c0_3 = arith.constant 0 : index
    %c0_4 = arith.constant 0 : index
    %3 = vector.load %arg3[%c0_3, %c0_4] : memref<1x256xf32, #tpu.memory_space<vmem>>, vector<1x256xf32>
    %4 = vector.shape_cast %3 : vector<1x256xf32> to vector<256xf32>
    %5 = vector.shape_cast %4 : vector<256xf32> to vector<1x256xf32>
    %6 = vector.broadcast %5 : vector<1x256xf32> to vector<16x256xf32>
    %7 = arith.addf %2, %6 : vector<16x256xf32>
    %c0_5 = arith.constant 0 : index
    %c0_6 = arith.constant 0 : index
    %8 = vector.load %arg4[%c0_5, %c0_6] : memref<16x256xf32, #tpu.memory_space<vmem>>, vector<16x256xf32>
    tpu.vector_store %arg4[%c0_5, %c0_6], %7 {strides = array<i32>} : memref<16x256xf32, #tpu.memory_space<vmem>>, vector<16x256xf32>,
    return
  }
  func.func @transform_0(%arg0: i32) -> (i32, i32) {
    %c0_i32 = arith.constant 0 : i32
    %c0_i32_0 = arith.constant 0 : i32
    %c0_i32_1 = arith.constant 0 : i32
    return %c0_i32, %c0_i32_0 : i32, i32
  }
  func.func @transform_1(%arg0: i32) -> (i32, i32) {
    %c0_i32 = arith.constant 0 : i32
    %c0_i32_0 = arith.constant 0 : i32
    return %c0_i32, %arg0 : i32, i32
  }
  func.func @transform_2(%arg0: i32) -> (i32, i32) {
    %c0_i32 = arith.constant 0 : i32
    %c0_i32_0 = arith.constant 0 : i32
    return %c0_i32, %arg0 : i32, i32
  }
  func.func @transform_3(%arg0: i32) -> (i32, i32) {
    %c0_i32 = arith.constant 0 : i32
    %c0_i32_0 = arith.constant 0 : i32
    return %c0_i32, %arg0 : i32, i32
  }
}

</mosaic_0001>

<bundles_post_ra>
// kernel: ssrnn_forward.5
= control target key start
LH: loop header
LB: loop body
LE: loop exit
PB: predicated region body
PF: predicated region fallthrough
CT: control target
= control target key end

     0   :  { %s277_s1 = inlined_call_operand.vmem [shape: f32[128,256], index: 1, kind: input, shape index: {}]   ;;  %s278_s0 = inlined_call_operand.vmem [shape: f32[16,128], index: 0, kind: input, shape index: {}]   ;;  %s279_s2 = inlined_call_operand.vmem [shape: f32[1,256], index: 2, kind: input, shape index: {}]   ;;  %s280_s3 = inlined_call_operand.vmem [shape: f32[16,256], index: 3, kind: output, shape index: {}]  }
   0x1   :  { %v46_v0 = vld [vmem:[%s277_s1 + $0xf0] sm:$0xff]  ;;  %v47_v1 = vld [vmem:[%s277_s1 + $0xf8] sm:$0xff]  ;;  %v44_v2 = vld [vmem:[%s277_s1 + $0xe0] sm:$0xff] }
   0x2   :  { %108 = vmatpush.msra.mxu2 %v46_v0  ;;  %124 = vmatpush.msra.mxu3 %v47_v1  ;;  %v45_v3 = vld [vmem:[%s277_s1 + $0xe8] sm:$0xff]  ;;  %v42_v4 = vld [vmem:[%s277_s1 + $0xd0] sm:$0xff]  ;;  %v43_v5 = vld [vmem:[%s277_s1 + $0xd8] sm:$0xff] }
   0x3   :  { %54 = vmatpush.msra.mxu0 %v46_v0  ;;  %77 = vmatpush.msra.mxu1 %v47_v1  ;;  %v40_v6 = vld [vmem:[%s277_s1 + $0xc0] sm:$0xff]  ;;  %v41_v7 = vld [vmem:[%s277_s1 + $0xc8] sm:$0xff]  ;;  %v38_v8 = vld [vmem:[%s277_s1 + $0xb0] sm:$0xff] }
   0x4   :  { %109 = vmatpush.msra.mxu2 %v44_v2  ;;  %125 = vmatpush.msra.mxu3 %v45_v3  ;;  %v39_v9 = vld [vmem:[%s277_s1 + $0xb8] sm:$0xff]  ;;  %v36_v10 = vld [vmem:[%s277_s1 + $0xa0] sm:$0xff]  ;;  %v37_v11 = vld [vmem:[%s277_s1 + $0xa8] sm:$0xff] }
   0x5   :  { %55 = vmatpush.msra.mxu0 %v44_v2  ;;  %78 = vmatpush.msra.mxu1 %v45_v3  ;;  %v34_v12 = vld [vmem:[%s277_s1 + $0x90] sm:$0xff]  ;;  %v35_v13 = vld [vmem:[%s277_s1 + $0x98] sm:$0xff]  ;;  %v32_v14 = vld [vmem:[%s277_s1 + $0x80] sm:$0xff] }
   0x6   :  { %110 = vmatpush.msra.mxu2 %v42_v4  ;;  %126 = vmatpush.msra.mxu3 %v43_v5  ;;  %v33_v15 = vld [vmem:[%s277_s1 + $0x88] sm:$0xff]  ;;  %v30_v16 = vld [vmem:[%s277_s1 + $0x70] sm:$0xff]  ;;  %v31_v17 = vld [vmem:[%s277_s1 + $0x78] sm:$0xff] }
   0x7   :  { %56 = vmatpush.msra.mxu0 %v42_v4  ;;  %79 = vmatpush.msra.mxu1 %v43_v5  ;;  %v28_v18 = vld [vmem:[%s277_s1 + $0x60] sm:$0xff]  ;;  %v29_v19 = vld [vmem:[%s277_s1 + $0x68] sm:$0xff]  ;;  %v26_v20 = vld [vmem:[%s277_s1 + $0x50] sm:$0xff] }
   0x8   :  { %111 = vmatpush.msra.mxu2 %v40_v6  ;;  %127 = vmatpush.msra.mxu3 %v41_v7  ;;  %v27_v21 = vld [vmem:[%s277_s1 + $0x58] sm:$0xff]  ;;  %v24_v22 = vld [vmem:[%s277_s1 + $0x40] sm:$0xff]  ;;  %v25_v23 = vld [vmem:[%s277_s1 + $0x48] sm:$0xff] }
   0x9   :  { %57 = vmatpush.msra.mxu0 %v40_v6  ;;  %80 = vmatpush.msra.mxu1 %v41_v7  ;;  %v22_v24 = vld [vmem:[%s277_s1 + $0x30] sm:$0xff]  ;;  %v23_v25 = vld [vmem:[%s277_s1 + $0x38] sm:$0xff]  ;;  %v20_v26 = vld [vmem:[%s277_s1 + $0x20] sm:$0xff] }
   0xa   :  { %112 = vmatpush.msra.mxu2 %v38_v8  ;;  %128 = vmatpush.msra.mxu3 %v39_v9  ;;  %v21_v27 = vld [vmem:[%s277_s1 + $0x28] sm:$0xff]  ;;  %v18_v28 = vld [vmem:[%s277_s1 + $0x10] sm:$0xff]  ;;  %v19_v29 = vld [vmem:[%s277_s1 + $0x18] sm:$0xff] }
   0xb   :  { %58 = vmatpush.msra.mxu0 %v38_v8  ;;  %81 = vmatpush.msra.mxu1 %v39_v9  ;;  %v16_v30 = vld [vmem:[%s277_s1] sm:$0xff]  ;;  %v17_v31 = vld [vmem:[%s277_s1 + $0x8] sm:$0xff] }
   0xc   :  { %113 = vmatpush.msra.mxu2 %v36_v10  ;;  %129 = vmatpush.msra.mxu3 %v37_v11  ;;  %v15_v32 = vld [vmem:[%s278_s0 + $0x8] sm:$0xff]  ;;  %v14_v33 = vld [vmem:[%s278_s0] sm:$0xff] }
   0xd   :  { %59 = vmatpush.msra.mxu0 %v36_v10  ;;  %82 = vmatpush.msra.mxu1 %v37_v11  ;;  %v48_v34 = vld [vmem:[%s279_s2] sm:$0x3] }
   0xe   :  { %114 = vmatpush.msra.mxu2 %v34_v12  ;;  %130 = vmatpush.msra.mxu3 %v35_v13  ;;  %v50_v35 = vperm.slane %v48_v34, 0  ;;  %v51_v36 = vperm.slane %v48_v34, 1 }
   0xf   :  { %60 = vmatpush.msra.mxu0 %v34_v12  ;;  %83 = vmatpush.msra.mxu1 %v35_v13 }
  0x10   :  { %115 = vmatpush.msra.mxu2 %v32_v14  ;;  %131 = vmatpush.msra.mxu3 %v33_v15 }
  0x11   :  { %61 = vmatpush.msra.mxu0 %v32_v14  ;;  %84 = vmatpush.msra.mxu1 %v33_v15 }
  0x12   :  { %116 = vmatpush.msra.mxu2 %v30_v16  ;;  %132 = vmatpush.msra.mxu3 %v31_v17 }
  0x13   :  { %62 = vmatpush.msra.mxu0 %v30_v16  ;;  %85 = vmatpush.msra.mxu1 %v31_v17 }
  0x14   :  { %117 = vmatpush.msra.mxu2 %v28_v18  ;;  %133 = vmatpush.msra.mxu3 %v29_v19 }
  0x15   :  { %63 = vmatpush.msra.mxu0 %v28_v18  ;;  %86 = vmatpush.msra.mxu1 %v29_v19 }
  0x16   :  { %118 = vmatpush.msra.mxu2 %v26_v20  ;;  %134 = vmatpush.msra.mxu3 %v27_v21 }
  0x17   :  { %64 = vmatpush.msra.mxu0 %v26_v20  ;;  %87 = vmatpush.msra.mxu1 %v27_v21 }
  0x18   :  { %119 = vmatpush.msra.mxu2 %v24_v22  ;;  %135 = vmatpush.msra.mxu3 %v25_v23 }
  0x19   :  { %65 = vmatpush.msra.mxu0 %v24_v22  ;;  %88 = vmatpush.msra.mxu1 %v25_v23 }
  0x1a   :  { %120 = vmatpush.msra.mxu2 %v22_v24  ;;  %136 = vmatpush.msra.mxu3 %v23_v25 }
  0x1b   :  { %66 = vmatpush.msra.mxu0 %v22_v24  ;;  %89 = vmatpush.msra.mxu1 %v23_v25 }
  0x1c   :  { %121 = vmatpush.msra.mxu2 %v20_v26  ;;  %137 = vmatpush.msra.mxu3 %v21_v27 }
  0x1d   :  { %67 = vmatpush.msra.mxu0 %v20_v26  ;;  %90 = vmatpush.msra.mxu1 %v21_v27 }
  0x1e   :  { %122 = vmatpush.msra.mxu2 %v18_v28  ;;  %138 = vmatpush.msra.mxu3 %v19_v29 }
  0x1f   :  { %68 = vmatpush.msra.mxu0 %v18_v28  ;;  %91 = vmatpush.msra.mxu1 %v19_v29 }
  0x20   :  { %123 = vmatpush.msra.mxu2 %v16_v30  ;;  %139 = vmatpush.msra.mxu3 %v17_v31 }
  0x21   :  { %73 = vmatmul.f32.vlgmr.msra.gmra.mxu2 %v15_v32  ;;  %96 = vmatmul.f32.vlgmr.msra.gmra.mxu3 %v15_v32 }
  0x22   :  { %69 = vmatpush.msra.mxu0 %v16_v30  ;;  %92 = vmatpush.msra.mxu1 %v17_v31 }
  0x23   :  { %70 = vmatmul.f32.vlgmr.msra.gmra.mxu0 %v14_v33  ;;  %93 = vmatmul.f32.vlgmr.msra.gmra.mxu1 %v14_v33 }
  0xa0   :  { %v71_v37 = vpop.f32.mrf.mxu0  ;;  %v94_v38 = vpop.f32.mrf.mxu1 }
  0xa1   :  { %v72_v39 = vadd.f32 %v71_v37, %v50_v35  ;;  %v95_v40 = vadd.f32 %v94_v38, %v51_v36 }
  0xa3   :  { %100 = vst [vmem:[%s280_s3] sm:$0xff] %v72_v39 }
  0xa4   :  { %v74_v41 = vpop.f32.mrf.mxu2  ;;  %101 = vst [vmem:[%s280_s3 + $0x8] sm:$0xff] %v95_v40  ;;  %v97_v42 = vpop.f32.mrf.mxu3 }
  0xa5   :  { %v75_v43 = vadd.f32 %v74_v41, %v50_v35  ;;  %v98_v44 = vadd.f32 %v97_v42, %v51_v36 }
  0xa7   :  { %102 = vst [vmem:[%s280_s3 + $0x10] sm:$0xff] %v75_v43 }
  0xa8   :  { %103 = vst [vmem:[%s280_s3 + $0x18] sm:$0xff] %v98_v44 }

// kernel: ssrnn_forward.3
= control target key start
LH: loop header
LB: loop body
LE: loop exit
PB: predicated region body
PF: predicated region fallthrough
CT: control target
= control target key end

     0   :  { %s645_s1 = inlined_call_operand.vmem [shape: f32[128,512], index: 1, kind: input, shape index: {}]   ;;  %s646_s0 = inlined_call_operand.vmem [shape: f32[16,128], index: 0, kind: input, shape index: {}]   ;;  %s647_s2 = inlined_call_operand.vmem [shape: f32[1,512], index: 2, kind: input, shape index: {}]   ;;  %s648_s3 = inlined_call_operand.vmem [shape: f32[2,128], index: 3, kind: input, shape index: {}]   ;;  %s649_s4 = inlined_call_operand.vmem [shape: f32[2,128], index: 4, kind: input, shape index: {}]   ;;  %s650_s6 = inlined_call_operand.vmem [shape: f32[2,16,128], index: 6, kind: output, shape index: {1}]   ;;  %s651_s5 = inlined_call_operand.vmem [shape: f32[2,16,128], index: 5, kind: output, shape index: {0}]  }
   0x1   :  { %v84_v0 = vld [vmem:[%s645_s1 + $0x1e0] sm:$0xff]  ;;  %v85_v1 = vld [vmem:[%s645_s1 + $0x1e8] sm:$0xff]  ;;  %v86_v34 = vld [vmem:[%s645_s1 + $0x1f0] sm:$0xff] }
   0x2   :  { %v80_v2 = vld [vmem:[%s645_s1 + $0x1c0] sm:$0xff]  ;;  %98 = vmatpush.msra.mxu0 %v84_v0  ;;  %121 = vmatpush.msra.mxu1 %v85_v1  ;;  %v81_v3 = vld [vmem:[%s645_s1 + $0x1c8] sm:$0xff]  ;;  %v87_v35 = vld [vmem:[%s645_s1 + $0x1f8] sm:$0xff] }
   0x3   :  { %v76_v4 = vld [vmem:[%s645_s1 + $0x1a0] sm:$0xff]  ;;  %v77_v5 = vld [vmem:[%s645_s1 + $0x1a8] sm:$0xff]  ;;  %v82_v36 = vld [vmem:[%s645_s1 + $0x1d0] sm:$0xff]  ;;  %144 = vmatpush.msra.mxu2 %v86_v34  ;;  %167 = vmatpush.msra.mxu3 %v87_v35 }
   0x4   :  { %99 = vmatpush.msra.mxu0 %v80_v2  ;;  %122 = vmatpush.msra.mxu1 %v81_v3  ;;  %v72_v6 = vld [vmem:[%s645_s1 + $0x180] sm:$0xff]  ;;  %v73_v7 = vld [vmem:[%s645_s1 + $0x188] sm:$0xff]  ;;  %v83_v37 = vld [vmem:[%s645_s1 + $0x1d8] sm:$0xff]  ;;  %v330_v3 = vmov 128.0  }
   0x5   :  { %v68_v8 = vld [vmem:[%s645_s1 + $0x160] sm:$0xff]  ;;  %v69_v9 = vld [vmem:[%s645_s1 + $0x168] sm:$0xff]  ;;  %v78_v38 = vld [vmem:[%s645_s1 + $0x1b0] sm:$0xff]  ;;  %145 = vmatpush.msra.mxu2 %v82_v36  ;;  %168 = vmatpush.msra.mxu3 %v83_v37  ;;  %320 = vrcp.f32 %v330_v3 }
   0x6   :  { %100 = vmatpush.msra.mxu0 %v76_v4  ;;  %123 = vmatpush.msra.mxu1 %v77_v5  ;;  %v64_v10 = vld [vmem:[%s645_s1 + $0x140] sm:$0xff]  ;;  %v65_v11 = vld [vmem:[%s645_s1 + $0x148] sm:$0xff]  ;;  %v79_v39 = vld [vmem:[%s645_s1 + $0x1b8] sm:$0xff] }
   0x7   :  { %v60_v12 = vld [vmem:[%s645_s1 + $0x120] sm:$0xff]  ;;  %v61_v13 = vld [vmem:[%s645_s1 + $0x128] sm:$0xff]  ;;  %v74_v40 = vld [vmem:[%s645_s1 + $0x190] sm:$0xff]  ;;  %146 = vmatpush.msra.mxu2 %v78_v38  ;;  %169 = vmatpush.msra.mxu3 %v79_v39 }
   0x8   :  { %101 = vmatpush.msra.mxu0 %v72_v6  ;;  %124 = vmatpush.msra.mxu1 %v73_v7  ;;  %v56_v14 = vld [vmem:[%s645_s1 + $0x100] sm:$0xff]  ;;  %v57_v15 = vld [vmem:[%s645_s1 + $0x108] sm:$0xff]  ;;  %v75_v41 = vld [vmem:[%s645_s1 + $0x198] sm:$0xff] }
   0x9   :  { %v52_v16 = vld [vmem:[%s645_s1 + $0xe0] sm:$0xff]  ;;  %v53_v17 = vld [vmem:[%s645_s1 + $0xe8] sm:$0xff]  ;;  %v70_v42 = vld [vmem:[%s645_s1 + $0x170] sm:$0xff]  ;;  %147 = vmatpush.msra.mxu2 %v74_v40  ;;  %170 = vmatpush.msra.mxu3 %v75_v41 }
   0xa   :  { %102 = vmatpush.msra.mxu0 %v68_v8  ;;  %125 = vmatpush.msra.mxu1 %v69_v9  ;;  %v48_v18 = vld [vmem:[%s645_s1 + $0xc0] sm:$0xff]  ;;  %v49_v19 = vld [vmem:[%s645_s1 + $0xc8] sm:$0xff]  ;;  %v71_v43 = vld [vmem:[%s645_s1 + $0x178] sm:$0xff] }
   0xb   :  { %v44_v20 = vld [vmem:[%s645_s1 + $0xa0] sm:$0xff]  ;;  %v45_v21 = vld [vmem:[%s645_s1 + $0xa8] sm:$0xff]  ;;  %v66_v44 = vld [vmem:[%s645_s1 + $0x150] sm:$0xff]  ;;  %148 = vmatpush.msra.mxu2 %v70_v42  ;;  %171 = vmatpush.msra.mxu3 %v71_v43  ;;  %v321_v8 = vpop.eup %320 }
   0xc   :  { %103 = vmatpush.msra.mxu0 %v64_v10  ;;  %126 = vmatpush.msra.mxu1 %v65_v11  ;;  %v40_v22 = vld [vmem:[%s645_s1 + $0x80] sm:$0xff]  ;;  %v41_v23 = vld [vmem:[%s645_s1 + $0x88] sm:$0xff]  ;;  %v67_v45 = vld [vmem:[%s645_s1 + $0x158] sm:$0xff]  ;;  %vm201_vm0 = vweird.f32 %v321_v8 }
   0xd   :  { %v36_v24 = vld [vmem:[%s645_s1 + $0x60] sm:$0xff]  ;;  %v37_v25 = vld [vmem:[%s645_s1 + $0x68] sm:$0xff]  ;;  %v62_v46 = vld [vmem:[%s645_s1 + $0x130] sm:$0xff]  ;;  %149 = vmatpush.msra.mxu2 %v66_v44  ;;  %172 = vmatpush.msra.mxu3 %v67_v45 }
   0xe   :  { %104 = vmatpush.msra.mxu0 %v60_v12  ;;  %127 = vmatpush.msra.mxu1 %v61_v13  ;;  %v32_v26 = vld [vmem:[%s645_s1 + $0x40] sm:$0xff]  ;;  %v33_v27 = vld [vmem:[%s645_s1 + $0x48] sm:$0xff]  ;;  %v63_v47 = vld [vmem:[%s645_s1 + $0x138] sm:$0xff]  ;;  %v197_v13 = vmul.f32 128.0, %v321_v8 }
   0xf   :  { %v28_v28 = vld [vmem:[%s645_s1 + $0x20] sm:$0xff]  ;;  %v29_v29 = vld [vmem:[%s645_s1 + $0x28] sm:$0xff]  ;;  %v58_v48 = vld [vmem:[%s645_s1 + $0x110] sm:$0xff]  ;;  %150 = vmatpush.msra.mxu2 %v62_v46  ;;  %173 = vmatpush.msra.mxu3 %v63_v47 }
  0x10   :  { %105 = vmatpush.msra.mxu0 %v56_v14  ;;  %128 = vmatpush.msra.mxu1 %v57_v15  ;;  %v24_v30 = vld [vmem:[%s645_s1] sm:$0xff]  ;;  %v25_v31 = vld [vmem:[%s645_s1 + $0x8] sm:$0xff]  ;;  %v59_v49 = vld [vmem:[%s645_s1 + $0x118] sm:$0xff] }
  0x11   :  { %v465_v32 = vld [vmem:[%s646_s0] sm:$0xff]  ;;  %v472_v33 = vld [vmem:[%s646_s0 + $0x8] sm:$0xff]  ;;  %151 = vmatpush.msra.mxu2 %v58_v48  ;;  %174 = vmatpush.msra.mxu3 %v59_v49  ;;  %v54_v61 = vld [vmem:[%s645_s1 + $0xf0] sm:$0xff] }
  0x12   :  { %106 = vmatpush.msra.mxu0 %v52_v16  ;;  %129 = vmatpush.msra.mxu1 %v53_v17  ;;  %v527_v50 = vld [vmem:[%s647_s2] sm:$0xf]  ;;  %v55_v62 = vld [vmem:[%s645_s1 + $0xf8] sm:$0xff]  ;;  %v50_v63 = vld [vmem:[%s645_s1 + $0xd0] sm:$0xff]  ;;  %v198_v16 = vsub.f32 1.0, %v197_v13 }
  0x13   :  { %v90_v51 = vperm.slane %v527_v50, 0  ;;  %v91_v52 = vperm.slane %v527_v50, 1  ;;  %152 = vmatpush.msra.mxu2 %v54_v61  ;;  %175 = vmatpush.msra.mxu3 %v55_v62  ;;  %v51_v0 = vld [vmem:[%s645_s1 + $0xd8] sm:$0xff]  ;;  %v46_v1 = vld [vmem:[%s645_s1 + $0xb0] sm:$0xff]  ;;  %v92_v36 = vperm.slane %v527_v50, 2  ;;  %v93_v37 = vperm.slane %v527_v50, 3 }
  0x14   :  { %107 = vmatpush.msra.mxu0 %v48_v18  ;;  %130 = vmatpush.msra.mxu1 %v49_v19  ;;  %v47_v2 = vld [vmem:[%s645_s1 + $0xb8] sm:$0xff]  ;;  %v42_v4 = vld [vmem:[%s645_s1 + $0x90] sm:$0xff]  ;;  %v199_v17 = vmul.f32 %v321_v8, %v198_v16 }
  0x15   :  { %153 = vmatpush.msra.mxu2 %v50_v63  ;;  %176 = vmatpush.msra.mxu3 %v51_v0  ;;  %v43_v5 = vld [vmem:[%s645_s1 + $0x98] sm:$0xff]  ;;  %v38_v6 = vld [vmem:[%s645_s1 + $0x70] sm:$0xff] }
  0x16   :  { %108 = vmatpush.msra.mxu0 %v44_v20  ;;  %131 = vmatpush.msra.mxu1 %v45_v21  ;;  %v39_v7 = vld [vmem:[%s645_s1 + $0x78] sm:$0xff]  ;;  %v34_v9 = vld [vmem:[%s645_s1 + $0x50] sm:$0xff]  ;;  %v200_v18 = vadd.f32 %v321_v8, %v199_v17 }
  0x17   :  { %154 = vmatpush.msra.mxu2 %v46_v1  ;;  %177 = vmatpush.msra.mxu3 %v47_v2  ;;  %v35_v10 = vld [vmem:[%s645_s1 + $0x58] sm:$0xff]  ;;  %v30_v11 = vld [vmem:[%s645_s1 + $0x30] sm:$0xff] }
  0x18   :  { %109 = vmatpush.msra.mxu0 %v40_v22  ;;  %132 = vmatpush.msra.mxu1 %v41_v23  ;;  %v31_v12 = vld [vmem:[%s645_s1 + $0x38] sm:$0xff]  ;;  %v26_v14 = vld [vmem:[%s645_s1 + $0x10] sm:$0xff]  ;;  %v202_v19 = vsel %vm201_vm0, %v321_v8, %v200_v18  ;;  %v316_v8 = vld [vmem:[%s648_s3] ss:$0 sm:$0xff] }
  0x19   :  { %155 = vmatpush.msra.mxu2 %v42_v4  ;;  %178 = vmatpush.msra.mxu3 %v43_v5  ;;  %v27_v15 = vld [vmem:[%s645_s1 + $0x18] sm:$0xff]  ;;  %v319_v18 = vld [vmem:[%s649_s4 + $0x1] ss:$0 sm:$0xff] }
  0x1a   :  { %110 = vmatpush.msra.mxu0 %v36_v24  ;;  %133 = vmatpush.msra.mxu1 %v37_v25 }
  0x1b   :  { %156 = vmatpush.msra.mxu2 %v38_v6  ;;  %179 = vmatpush.msra.mxu3 %v39_v7 }
  0x1c   :  { %111 = vmatpush.msra.mxu0 %v32_v26  ;;  %134 = vmatpush.msra.mxu1 %v33_v27 }
  0x1d   :  { %157 = vmatpush.msra.mxu2 %v34_v9  ;;  %180 = vmatpush.msra.mxu3 %v35_v10 }
  0x1e   :  { %112 = vmatpush.msra.mxu0 %v28_v28  ;;  %135 = vmatpush.msra.mxu1 %v29_v29 }
  0x1f   :  { %158 = vmatpush.msra.mxu2 %v30_v11  ;;  %181 = vmatpush.msra.mxu3 %v31_v12  ;;  %v318_v12 = vld [vmem:[%s648_s3 + $0x1] ss:$0 sm:$0xff] }
  0x20   :  { %113 = vmatpush.msra.mxu0 %v24_v30  ;;  %136 = vmatpush.msra.mxu1 %v25_v31 }
  0x21   :  { %114 = vmatmul.f32.vlgmr.msra.gmra.mxu0 %v465_v32  ;;  %137 = vmatmul.f32.vlgmr.msra.gmra.mxu1 %v465_v32 }
  0x22   :  { %159 = vmatpush.msra.mxu2 %v26_v14  ;;  %182 = vmatpush.msra.mxu3 %v27_v15  ;;  %v317_v14 = vld [vmem:[%s649_s4] ss:$0 sm:$0xff] }
  0x23   :  { %160 = vmatmul.f32.vlgmr.msra.gmra.mxu2 %v465_v32  ;;  %183 = vmatmul.f32.vlgmr.msra.gmra.mxu3 %v465_v32 }
  0x29   :  { %117 = vmatmul.f32.gmra.mxu0 %v472_v33  ;;  %140 = vmatmul.f32.gmra.mxu1 %v472_v33 }
  0x2b   :  { %163 = vmatmul.f32.gmra.mxu2 %v472_v33  ;;  %186 = vmatmul.f32.gmra.mxu3 %v472_v33 }
  0x9e   :  { %v115_v53 = vpop.f32.mrf.mxu0  ;;  %v138_v54 = vpop.f32.mrf.mxu1 }
  0x9f   :  { %v116_v55 = vadd.f32 %v115_v53, %v90_v51  ;;  %v139_v56 = vadd.f32 %v138_v54, %v91_v52 }
  0xa1   :  { %251 = vadd.xlane.f32.xlu1 %v139_v56  ;;  %192 = vadd.xlane.f32.xlu0 %v116_v55 }
  0xa6   :  { %v118_v57 = vpop.f32.mrf.mxu0  ;;  %v141_v58 = vpop.f32.mrf.mxu1 }
  0xa7   :  { %v531_v59 = vadd.f32 %v118_v57, %v90_v51  ;;  %v142_v60 = vadd.f32 %v141_v58, %v91_v52  ;;  %v161_v38 = vpop.f32.mrf.mxu2  ;;  %v184_v39 = vpop.f32.mrf.mxu3 }
  0xa8   :  { %v162_v40 = vadd.f32 %v161_v38, %v92_v36  ;;  %v185_v41 = vadd.f32 %v184_v39, %v93_v37 }
  0xa9   :  { %253 = vadd.xlane.f32.xlu1 %v142_v60  ;;  %194 = vadd.xlane.f32.xlu0 %v531_v59 }
  0xaa   :  { %247 = vst [vmem:[%s650_s6] sm:$0xff] %v162_v40 }
  0xab   :  { %313 = vst [vmem:[%s650_s6 + $0x10] sm:$0xff] %v185_v41 }
  0xaf   :  { %v164_v48 = vpop.f32.mrf.mxu2  ;;  %v187_v49 = vpop.f32.mrf.mxu3 }
  0xb0   :  { %v165_v50 = vadd.f32 %v164_v48, %v92_v36  ;;  %v188_v51 = vadd.f32 %v187_v49, %v93_v37 }
  0xb2   :  { %248 = vst [vmem:[%s650_s6 + $0x8] sm:$0xff] %v165_v50 }
  0xb3   :  { %314 = vst [vmem:[%s650_s6 + $0x18] sm:$0xff] %v188_v51 }
 0x114   :  { %v252_v20 = vpop.xlane.xlu1 %251  ;;  %v193_v21 = vpop.xlane.xlu0 %192 }
 0x115   :  { %v255_v22 = vmul.f32 %v252_v20, %v202_v19  ;;  %v203_v23 = vmul.f32 %v202_v19, %v193_v21 }
 0x117   :  { %v586_v24 = vsub.f32 %v139_v56, %v255_v22  ;;  %v588_v25 = vsub.f32 %v116_v55, %v203_v23 }
 0x119   :  { %v259_v26 = vmul.f32 %v586_v24, %v586_v24  ;;  %v207_v27 = vmul.f32 %v588_v25, %v588_v25 }
 0x11b   :  { %261 = vadd.xlane.f32.xlu0 %v259_v26  ;;  %209 = vadd.xlane.f32.xlu2 %v207_v27 }
 0x11c   :  { %v254_v28 = vpop.xlane.xlu1 %253  ;;  %v195_v29 = vpop.xlane.xlu0 %194 }
 0x11d   :  { %v256_v30 = vmul.f32 %v254_v28, %v202_v19  ;;  %v204_v31 = vmul.f32 %v202_v19, %v195_v29 }
 0x11f   :  { %v594_v32 = vsub.f32 %v142_v60, %v256_v30  ;;  %v597_v33 = vsub.f32 %v531_v59, %v204_v31 }
 0x121   :  { %v260_v34 = vmul.f32 %v594_v32, %v594_v32  ;;  %v208_v35 = vmul.f32 %v597_v33, %v597_v33 }
 0x123   :  { %263 = vadd.xlane.f32.xlu1 %v260_v34  ;;  %211 = vadd.xlane.f32.xlu2 %v208_v35 }
 0x18e   :  { %v210_v42 = vpop.xlane.xlu2 %209  ;;  %v262_v43 = vpop.xlane.xlu0 %261 }
 0x18f   :  { %v213_v44 = vmul.f32 %v210_v42, %v202_v19  ;;  %v265_v45 = vmul.f32 %v262_v43, %v202_v19 }
 0x191   :  { %v215_v46 = vadd.f32 1e-05, %v213_v44  ;;  %v267_v47 = vadd.f32 1e-05, %v265_v45 }
 0x193   :  { %322 = vrsqrt.f32 %v215_v46  ;;  %vm223_vm3 = vweird.f32 %v215_v46  ;;  %vm275_vm5 = vweird.f32 %v267_v47 }
 0x194   :  { %324 = vrsqrt.f32 %v267_v47 }
 0x196   :  { %v264_v52 = vpop.xlane.xlu1 %263  ;;  %v212_v53 = vpop.xlane.xlu2 %211 }
 0x197   :  { %v266_v54 = vmul.f32 %v264_v52, %v202_v19  ;;  %v214_v55 = vmul.f32 %v212_v53, %v202_v19 }
 0x199   :  { %v323_v56 = vpop.eup %322  ;;  %v268_v57 = vadd.f32 1e-05, %v266_v54  ;;  %v216_v58 = vadd.f32 1e-05, %v214_v55 }
 0x19a   :  { %v325_v59 = vpop.eup %324  ;;  %v218_v60 = vmul.f32 %v323_v56, %v215_v46  ;;  %vm224_vm1 = vweird.f32 %v323_v56 }
 0x19b   :  { %v270_v61 = vmul.f32 %v325_v59, %v267_v47  ;;  %326 = vrsqrt.f32 %v268_v57  ;;  %vm276_vm2 = vweird.f32 %v325_v59  ;;  %vm225_vm4 = vmor %vm223_vm3, %vm224_vm1  ;;  %vm285_vm9 = vweird.f32 %v268_v57 }
 0x19c   :  { %v219_v62 = vmul.f32 %v323_v56, %v218_v60  ;;  %328 = vrsqrt.f32 %v216_v58  ;;  %vm277_vm6 = vmor %vm275_vm5, %vm276_vm2  ;;  %vm233_vm11 = vweird.f32 %v216_v58 }
 0x19d   :  { %v271_v63 = vmul.f32 %v325_v59, %v270_v61 }
 0x19e   :  { %v220_v0 = vmul.f32 0.5, %v219_v62 }
 0x19f   :  { %v272_v1 = vmul.f32 0.5, %v271_v63 }
 0x1a0   :  { %v221_v2 = vsub.f32 1.5, %v220_v0 }
 0x1a1   :  { %v327_v3 = vpop.eup %326  ;;  %v273_v4 = vsub.f32 1.5, %v272_v1 }
 0x1a2   :  { %v329_v5 = vpop.eup %328  ;;  %v222_v6 = vmul.f32 %v323_v56, %v221_v2  ;;  %v280_v7 = vmul.f32 %v327_v3, %v268_v57  ;;  %vm286_vm7 = vweird.f32 %v327_v3 }
 0x1a3   :  { %v274_v9 = vmul.f32 %v325_v59, %v273_v4  ;;  %v228_v10 = vmul.f32 %v329_v5, %v216_v58  ;;  %vm234_vm8 = vweird.f32 %v329_v5  ;;  %vm287_vm10 = vmor %vm285_vm9, %vm286_vm7 }
 0x1a4   :  { %v226_v11 = vsel %vm225_vm4, %v323_v56, %v222_v6  ;;  %v281_v13 = vmul.f32 %v327_v3, %v280_v7  ;;  %vm235_vm12 = vmor %vm233_vm11, %vm234_vm8 }
 0x1a5   :  { %v237_v15 = vmul.f32 %v226_v11, %v588_v25  ;;  %v278_v16 = vsel %vm277_vm6, %v325_v59, %v274_v9  ;;  %v229_v17 = vmul.f32 %v329_v5, %v228_v10 }
 0x1a6   :  { %v289_v19 = vmul.f32 %v278_v16, %v586_v24  ;;  %v282_v20 = vmul.f32 0.5, %v281_v13 }
 0x1a7   :  { %v240_v21 = vmul.f32 %v316_v8, %v237_v15  ;;  %v230_v22 = vmul.f32 0.5, %v229_v17 }
 0x1a8   :  { %v292_v23 = vmul.f32 %v318_v12, %v289_v19  ;;  %v283_v26 = vsub.f32 1.5, %v282_v20 }
 0x1a9   :  { %v243_v27 = vadd.f32 %v317_v14, %v240_v21  ;;  %v231_v28 = vsub.f32 1.5, %v230_v22 }
 0x1aa   :  { %v295_v29 = vadd.f32 %v319_v18, %v292_v23  ;;  %v284_v30 = vmul.f32 %v327_v3, %v283_v26 }
 0x1ab   :  { %245 = vst [vmem:[%s651_s5] sm:$0xff] %v243_v27  ;;  %v232_v25 = vmul.f32 %v329_v5, %v231_v28 }
 0x1ac   :  { %311 = vst [vmem:[%s651_s5 + $0x10] sm:$0xff] %v295_v29  ;;  %v288_v24 = vsel %vm287_vm10, %v327_v3, %v284_v30 }
 0x1ad   :  { %v290_v31 = vmul.f32 %v288_v24, %v594_v32  ;;  %v236_v34 = vsel %vm235_vm12, %v329_v5, %v232_v25 }
 0x1ae   :  { %v238_v35 = vmul.f32 %v236_v34, %v597_v33 }
 0x1af   :  { %v293_v36 = vmul.f32 %v318_v12, %v290_v31 }
 0x1b0   :  { %v241_v37 = vmul.f32 %v316_v8, %v238_v35 }
 0x1b1   :  { %v296_v38 = vadd.f32 %v319_v18, %v293_v36 }
 0x1b2   :  { %v244_v39 = vadd.f32 %v317_v14, %v241_v37 }
 0x1b3   :  { %312 = vst [vmem:[%s651_s5 + $0x18] sm:$0xff] %v296_v38 }
 0x1b4   :  { %246 = vst [vmem:[%s651_s5 + $0x8] sm:$0xff] %v244_v39 }

// kernel: ssrnn_forward.4
= control target key start
LH: loop header
LB: loop body
LE: loop exit
PB: predicated region body
PF: predicated region fallthrough
CT: control target
= control target key end

     0   :  { %v1735_v16 = vmov 0.0   ;;  %vm62_vm0 = vcmask 1041408   ;;  %v1736_v21 = vmov 128.0   ;;  %s2409_s2 = inlined_call_operand.vmem [shape: f32[2,128,128], index: 2, kind: input, shape index: {}]   ;;  %s2410_s0 = inlined_call_operand.vmem [shape: f32[2,8,2,128], index: 0, kind: input, shape index: {}]   ;;  %s2411_s3 = inlined_call_operand.vmem [shape: f32[2,128], index: 3, kind: input, shape index: {}]   ;;  %s2412_s4 = inlined_call_operand.vmem [shape: f32[2,128], index: 4, kind: input, shape index: {}]   ;;  %s2413_s1 = inlined_call_operand.vmem [shape: f32[2,8,2,128], index: 1, kind: input, shape index: {}]   ;;  %s2414_s5 = inlined_call_operand.vmem [shape: f32[8,2,128], index: 5, kind: output, shape index: {}]  }
   0x1   :  { %v40_v0 = vld [vmem:[%s2409_s2 + $0x78] sm:$0xff]  ;;  %v39_v1 = vld [vmem:[%s2409_s2 + $0x70] sm:$0xff]  ;;  %v38_v2 = vld [vmem:[%s2409_s2 + $0x68] sm:$0xff]  ;;  %1633 = vrcp.f32 %v1736_v21 }
   0x2   :  { %41 = vmatpush.msra.mxu0 %v40_v0  ;;  %228 = vmatpush.msra.mxu2 %v40_v0  ;;  %v37_v3 = vld [vmem:[%s2409_s2 + $0x60] sm:$0xff]  ;;  %v36_v4 = vld [vmem:[%s2409_s2 + $0x58] sm:$0xff]  ;;  %v35_v5 = vld [vmem:[%s2409_s2 + $0x50] sm:$0xff] }
   0x3   :  { %v34_v6 = vld [vmem:[%s2409_s2 + $0x48] sm:$0xff]  ;;  %v33_v7 = vld [vmem:[%s2409_s2 + $0x40] sm:$0xff]  ;;  %v32_v8 = vld [vmem:[%s2409_s2 + $0x38] sm:$0xff] }
   0x4   :  { %42 = vmatpush.msra.mxu0 %v39_v1  ;;  %229 = vmatpush.msra.mxu2 %v39_v1  ;;  %v31_v9 = vld [vmem:[%s2409_s2 + $0x30] sm:$0xff]  ;;  %v30_v10 = vld [vmem:[%s2409_s2 + $0x28] sm:$0xff]  ;;  %v29_v11 = vld [vmem:[%s2409_s2 + $0x20] sm:$0xff] }
   0x5   :  { %v28_v12 = vld [vmem:[%s2409_s2 + $0x18] sm:$0xff]  ;;  %v27_v13 = vld [vmem:[%s2409_s2 + $0x10] sm:$0xff]  ;;  %v26_v14 = vld [vmem:[%s2409_s2 + $0x8] sm:$0xff] }
   0x6   :  { %43 = vmatpush.msra.mxu0 %v38_v2  ;;  %230 = vmatpush.msra.mxu2 %v38_v2  ;;  %v25_v15 = vld [vmem:[%s2409_s2] sm:$0xff]  ;;  %v1830_v33 = vld [vmem:[%s2409_s2 + $0xf8] sm:$0xff]  ;;  %v1835_v34 = vld [vmem:[%s2409_s2 + $0xf0] sm:$0xff] }
   0x7   :  { %v24_v17 = vld [vmem:[%s2410_s0] sm:$0x3]  ;;  %v1634_v22 = vpop.eup %1633  ;;  %138 = vmatpush.msra.mxu1 %v1830_v33  ;;  %315 = vmatpush.msra.mxu3 %v1830_v33  ;;  %v1842_v35 = vld [vmem:[%s2409_s2 + $0xe8] sm:$0xff]  ;;  %v1856_v37 = vld [vmem:[%s2409_s2 + $0xd8] sm:$0xff] }
   0x8   :  { %44 = vmatpush.msra.mxu0 %v37_v3  ;;  %231 = vmatpush.msra.mxu2 %v37_v3  ;;  %v67_v23 = vmul.f32 128.0, %v1634_v22  ;;  %vm71_vm1 = vweird.f32 %v1634_v22  ;;  %v1849_v36 = vld [vmem:[%s2409_s2 + $0xe0] sm:$0xff]  ;;  %v1863_v38 = vld [vmem:[%s2409_s2 + $0xd0] sm:$0xff]  ;;  %v1870_v40 = vld [vmem:[%s2409_s2 + $0xc8] sm:$0xff] }
   0x9   :  { %139 = vmatpush.msra.mxu1 %v1835_v34  ;;  %316 = vmatpush.msra.mxu3 %v1835_v34  ;;  %v1878_v42 = vld [vmem:[%s2409_s2 + $0xc0] sm:$0xff]  ;;  %v1885_v44 = vld [vmem:[%s2409_s2 + $0xb8] sm:$0xff]  ;;  %v1892_v45 = vld [vmem:[%s2409_s2 + $0xb0] sm:$0xff] }
   0xa   :  { %45 = vmatpush.msra.mxu0 %v36_v4  ;;  %232 = vmatpush.msra.mxu2 %v36_v4  ;;  %v68_v24 = vsub.f32 1.0, %v67_v23  ;;  %v1899_v46 = vld [vmem:[%s2409_s2 + $0xa8] sm:$0xff]  ;;  %v1452_v47 = vld [vmem:[%s2409_s2 + $0xa0] sm:$0xff]  ;;  %v1451_v50 = vld [vmem:[%s2409_s2 + $0x98] sm:$0xff] }
   0xb   :  { %140 = vmatpush.msra.mxu1 %v1842_v35  ;;  %317 = vmatpush.msra.mxu3 %v1842_v35  ;;  %v1450_v52 = vld [vmem:[%s2409_s2 + $0x90] sm:$0xff]  ;;  %v1449_v54 = vld [vmem:[%s2409_s2 + $0x88] sm:$0xff]  ;;  %v1448_v56 = vld [vmem:[%s2409_s2 + $0x80] sm:$0xff] }
   0xc   :  { %46 = vmatpush.msra.mxu0 %v35_v5  ;;  %233 = vmatpush.msra.mxu2 %v35_v5  ;;  %v69_v25 = vmul.f32 %v1634_v22, %v68_v24  ;;  %v1923_v58 = vld [vmem:[%s2411_s3] ss:$0 sm:$0xff] }
   0xd   :  { %141 = vmatpush.msra.mxu1 %v1849_v36  ;;  %318 = vmatpush.msra.mxu3 %v1849_v36  ;;  %v1931_v61 = vld [vmem:[%s2412_s4] ss:$0 sm:$0xff] }
   0xe   :  { %47 = vmatpush.msra.mxu0 %v34_v6  ;;  %234 = vmatpush.msra.mxu2 %v34_v6  ;;  %v70_v26 = vadd.f32 %v1634_v22, %v69_v25  ;;  %v96_v63 = vld [vmem:[%s2413_s1] sm:$0x3] }
   0xf   :  { %142 = vmatpush.msra.mxu1 %v1856_v37  ;;  %319 = vmatpush.msra.mxu3 %v1856_v37 }
  0x10   :  { %48 = vmatpush.msra.mxu0 %v33_v7  ;;  %235 = vmatpush.msra.mxu2 %v33_v7  ;;  %v1819_v27 = vsel %vm71_vm1, %v1634_v22, %v70_v26 }
  0x11   :  { %143 = vmatpush.msra.mxu1 %v1863_v38  ;;  %320 = vmatpush.msra.mxu3 %v1863_v38 }
  0x12   :  { %49 = vmatpush.msra.mxu0 %v32_v8  ;;  %236 = vmatpush.msra.mxu2 %v32_v8 }
  0x13   :  { %144 = vmatpush.msra.mxu1 %v1870_v40  ;;  %321 = vmatpush.msra.mxu3 %v1870_v40 }
  0x14   :  { %50 = vmatpush.msra.mxu0 %v31_v9  ;;  %237 = vmatpush.msra.mxu2 %v31_v9 }
  0x15   :  { %145 = vmatpush.msra.mxu1 %v1878_v42  ;;  %322 = vmatpush.msra.mxu3 %v1878_v42 }
  0x16   :  { %51 = vmatpush.msra.mxu0 %v30_v10  ;;  %238 = vmatpush.msra.mxu2 %v30_v10 }
  0x17   :  { %146 = vmatpush.msra.mxu1 %v1885_v44  ;;  %323 = vmatpush.msra.mxu3 %v1885_v44 }
  0x18   :  { %52 = vmatpush.msra.mxu0 %v29_v11  ;;  %239 = vmatpush.msra.mxu2 %v29_v11 }
  0x19   :  { %147 = vmatpush.msra.mxu1 %v1892_v45  ;;  %324 = vmatpush.msra.mxu3 %v1892_v45 }
  0x1a   :  { %53 = vmatpush.msra.mxu0 %v28_v12  ;;  %240 = vmatpush.msra.mxu2 %v28_v12 }
  0x1b   :  { %148 = vmatpush.msra.mxu1 %v1899_v46  ;;  %325 = vmatpush.msra.mxu3 %v1899_v46 }
  0x1c   :  { %54 = vmatpush.msra.mxu0 %v27_v13  ;;  %241 = vmatpush.msra.mxu2 %v27_v13 }
  0x1d   :  { %149 = vmatpush.msra.mxu1 %v1452_v47  ;;  %326 = vmatpush.msra.mxu3 %v1452_v47 }
  0x1e   :  { %55 = vmatpush.msra.mxu0 %v26_v14  ;;  %242 = vmatpush.msra.mxu2 %v26_v14 }
  0x1f   :  { %150 = vmatpush.msra.mxu1 %v1451_v50  ;;  %327 = vmatpush.msra.mxu3 %v1451_v50 }
  0x20   :  { %56 = vmatpush.msra.mxu0 %v25_v15  ;;  %243 = vmatpush.msra.mxu2 %v25_v15 }
  0x21   :  { %57 = vmatmul.f32.vlgmr.msra.gmra.mxu0 %v1735_v16  ;;  %151 = vmatpush.msra.mxu1 %v1450_v52  ;;  %v1447_v16 = vld [vmem:[%s2410_s0 + $0x10] sm:$0x3] }
  0x22   :  { %580 = vmatpush.msrb.mxu2 %v40_v0  ;;  %404 = vmatpush.msrb.mxu0 %v40_v0 }
  0x23   :  { %328 = vmatpush.msra.mxu3 %v1450_v52  ;;  %152 = vmatpush.msra.mxu1 %v1449_v54 }
  0x24   :  { %581 = vmatpush.msrb.mxu2 %v39_v1  ;;  %405 = vmatpush.msrb.mxu0 %v39_v1 }
  0x25   :  { %329 = vmatpush.msra.mxu3 %v1449_v54  ;;  %153 = vmatpush.msra.mxu1 %v1448_v56 }
  0x26   :  { %582 = vmatpush.msrb.mxu2 %v38_v2  ;;  %406 = vmatpush.msrb.mxu0 %v38_v2 }
  0x27   :  { %330 = vmatpush.msra.mxu3 %v1448_v56  ;;  %491 = vmatpush.msrb.mxu1 %v1830_v33 }
  0x28   :  { %583 = vmatpush.msrb.mxu2 %v37_v3  ;;  %407 = vmatpush.msrb.mxu0 %v37_v3 }
  0x29   :  { %667 = vmatpush.msrb.mxu3 %v1830_v33  ;;  %492 = vmatpush.msrb.mxu1 %v1835_v34 }
  0x2a   :  { %584 = vmatpush.msrb.mxu2 %v36_v4  ;;  %408 = vmatpush.msrb.mxu0 %v36_v4 }
  0x2b   :  { %668 = vmatpush.msrb.mxu3 %v1835_v34  ;;  %493 = vmatpush.msrb.mxu1 %v1842_v35 }
  0x2c   :  { %585 = vmatpush.msrb.mxu2 %v35_v5  ;;  %409 = vmatpush.msrb.mxu0 %v35_v5 }
  0x2d   :  { %669 = vmatpush.msrb.mxu3 %v1842_v35  ;;  %494 = vmatpush.msrb.mxu1 %v1849_v36  ;;  %v1968_v35 = vld [vmem:[%s2411_s3 + $0x1] ss:$0 sm:$0xff] }
  0x2e   :  { %586 = vmatpush.msrb.mxu2 %v34_v6  ;;  %410 = vmatpush.msrb.mxu0 %v34_v6 }
  0x2f   :  { %670 = vmatpush.msrb.mxu3 %v1849_v36  ;;  %495 = vmatpush.msrb.mxu1 %v1856_v37 }
  0x30   :  { %587 = vmatpush.msrb.mxu2 %v33_v7  ;;  %411 = vmatpush.msrb.mxu0 %v33_v7 }
  0x31   :  { %671 = vmatpush.msrb.mxu3 %v1856_v37  ;;  %496 = vmatpush.msrb.mxu1 %v1863_v38  ;;  %v1973_v37 = vld [vmem:[%s2412_s4 + $0x1] ss:$0 sm:$0xff] }
  0x32   :  { %588 = vmatpush.msrb.mxu2 %v32_v8  ;;  %412 = vmatpush.msrb.mxu0 %v32_v8 }
  0x33   :  { %672 = vmatpush.msrb.mxu3 %v1863_v38  ;;  %497 = vmatpush.msrb.mxu1 %v1870_v40 }
  0x34   :  { %589 = vmatpush.msrb.mxu2 %v31_v9  ;;  %413 = vmatpush.msrb.mxu0 %v31_v9 }
  0x35   :  { %673 = vmatpush.msrb.mxu3 %v1870_v40  ;;  %498 = vmatpush.msrb.mxu1 %v1878_v42  ;;  %v1464_v40 = vld [vmem:[%s2413_s1 + $0x10] sm:$0x3] }
  0x36   :  { %590 = vmatpush.msrb.mxu2 %v30_v10  ;;  %414 = vmatpush.msrb.mxu0 %v30_v10 }
  0x37   :  { %674 = vmatpush.msrb.mxu3 %v1878_v42  ;;  %499 = vmatpush.msrb.mxu1 %v1885_v44 }
  0x38   :  { %591 = vmatpush.msrb.mxu2 %v29_v11  ;;  %415 = vmatpush.msrb.mxu0 %v29_v11 }
  0x39   :  { %675 = vmatpush.msrb.mxu3 %v1885_v44  ;;  %500 = vmatpush.msrb.mxu1 %v1892_v45 }
  0x3a   :  { %592 = vmatpush.msrb.mxu2 %v28_v12  ;;  %416 = vmatpush.msrb.mxu0 %v28_v12 }
  0x3b   :  { %676 = vmatpush.msrb.mxu3 %v1892_v45  ;;  %501 = vmatpush.msrb.mxu1 %v1899_v46 }
  0x3c   :  { %593 = vmatpush.msrb.mxu2 %v27_v13  ;;  %417 = vmatpush.msrb.mxu0 %v27_v13 }
  0x3d   :  { %677 = vmatpush.msrb.mxu3 %v1899_v46  ;;  %502 = vmatpush.msrb.mxu1 %v1452_v47 }
  0x3e   :  { %594 = vmatpush.msrb.mxu2 %v26_v14  ;;  %418 = vmatpush.msrb.mxu0 %v26_v14 }
  0x3f   :  { %678 = vmatpush.msrb.mxu3 %v1452_v47  ;;  %503 = vmatpush.msrb.mxu1 %v1451_v50 }
  0x40   :  { %595 = vmatpush.msrb.mxu2 %v25_v15  ;;  %419 = vmatpush.msrb.mxu0 %v25_v15 }
  0x41   :  { %679 = vmatpush.msrb.mxu3 %v1451_v50  ;;  %504 = vmatpush.msrb.mxu1 %v1450_v52 }
  0x43   :  { %680 = vmatpush.msrb.mxu3 %v1450_v52  ;;  %505 = vmatpush.msrb.mxu1 %v1449_v54 }
  0x45   :  { %681 = vmatpush.msrb.mxu3 %v1449_v54  ;;  %506 = vmatpush.msrb.mxu1 %v1448_v56 }
  0x47   :  { %682 = vmatpush.msrb.mxu3 %v1448_v56 }
  0x9e   :  { %v58_v18 = vpop.f32.mrf.mxu0 }
  0x9f   :  { %v61_v19 = vadd.f32 %v58_v18, %v24_v17 }
  0xa1   :  { %v63_v20 = vsel %vm62_vm0, %v61_v19, 0.0 }
  0xa2   :  { %64 = vadd.xlane.f32.xlu0 %v63_v20 }
 0x115   :  { %v65_v28 = vpop.xlane.xlu0 %64 }
 0x116   :  { %v73_v29 = vmul.f32 %v1819_v27, %v65_v28 }
 0x118   :  { %v1822_v30 = vsub.f32 %v61_v19, %v73_v29 }
 0x11a   :  { %v75_v31 = vmul.f32 %v1822_v30, %v1822_v30 }
 0x11c   :  { %v76_v32 = vsel %vm62_vm0, %v75_v31, 0.0 }
 0x11d   :  { %77 = vadd.xlane.f32.xlu0 %v76_v32 }
 0x190   :  { %v78_v39 = vpop.xlane.xlu0 %77 }
 0x191   :  { %v79_v41 = vmul.f32 %v78_v39, %v1819_v27 }
 0x193   :  { %v80_v43 = vadd.f32 1e-05, %v79_v41 }
 0x195   :  { %1635 = vrsqrt.f32 %v80_v43  ;;  %vm87_vm3 = vweird.f32 %v80_v43 }
 0x19b   :  { %v1636_v48 = vpop.eup %1635 }
 0x19c   :  { %v82_v49 = vmul.f32 %v1636_v48, %v80_v43  ;;  %vm88_vm2 = vweird.f32 %v1636_v48 }
 0x19d   :  { %vm89_vm4 = vmor %vm87_vm3, %vm88_vm2 }
 0x19e   :  { %v83_v51 = vmul.f32 %v1636_v48, %v82_v49 }
 0x1a0   :  { %v84_v53 = vmul.f32 0.5, %v83_v51 }
 0x1a2   :  { %v85_v55 = vsub.f32 1.5, %v84_v53 }
 0x1a4   :  { %v86_v57 = vmul.f32 %v1636_v48, %v85_v55 }
 0x1a6   :  { %v90_v59 = vsel %vm89_vm4, %v1636_v48, %v86_v57 }
 0x1a7   :  { %v91_v60 = vmul.f32 %v90_v59, %v1822_v30  ;;  %v1466_v59 = vld [vmem:[%s2410_s0 + $0x2] sm:$0x3] }
 0x1a9   :  { %v93_v62 = vmul.f32 %v1923_v58, %v91_v60 }
 0x1ab   :  { %v95_v0 = vadd.f32 %v1931_v61, %v93_v62 }
 0x1ad   :  { %v97_v1 = vmul.f32 %v96_v63, %v95_v0 }
 0x1af   :  { %v1446_v2 = vmul.f32 -1.442695, %v97_v1 }
 0x1b1   :  { %1637 = vpow2.f32 %v1446_v2 }
 0x1b7   :  { %v1638_v3 = vpop.eup %1637 }
 0x1b8   :  { %v102_v4 = vadd.f32 1.0, %v1638_v3 }
 0x1ba   :  { %1639 = vrcp.f32 %v102_v4  ;;  %v114_v8 = vand.u32 2147483648, %v102_v4  ;;  %v112_v10 = vand.u32 2147483647, %v102_v4  ;;  %vm108_vm6 = vweird.f32 %v102_v4 }
 0x1bc   :  { %v115_v12 = vor.u32 1.1754944e-38, %v114_v8  ;;  %vm113_vm8 = vcmp.eq.f32.partialorder %v112_v10, 8.507059e+37 }
 0x1c0   :  { %v1640_v5 = vpop.eup %1639 }
 0x1c1   :  { %v104_v6 = vmul.f32 %v1640_v5, %v102_v4  ;;  %vm109_vm5 = vweird.f32 %v1640_v5 }
 0x1c2   :  { %vm110_vm7 = vmor %vm108_vm6, %vm109_vm5 }
 0x1c3   :  { %v105_v7 = vsub.f32 1.0, %v104_v6 }
 0x1c5   :  { %v106_v9 = vmul.f32 %v1640_v5, %v105_v7 }
 0x1c7   :  { %v107_v11 = vadd.f32 %v1640_v5, %v106_v9 }
 0x1c9   :  { %v111_v13 = vsel %vm110_vm7, %v1640_v5, %v107_v11 }
 0x1ca   :  { %v116_v14 = vsel %vm113_vm8, %v115_v12, %v111_v13 }
 0x1cb   :  { %v118_v15 = vmul.f32 %v116_v14, %v97_v1 }
 0x1cd   :  { %154 = vmatmul.f32.vlgmr.msra.gmra.mxu1 %v118_v15 }
 0x24a   :  { %v155_v17 = vpop.f32.mrf.mxu1 }
 0x24b   :  { %v158_v18 = vadd.f32 %v1447_v16, %v155_v17  ;;  %v1467_v17 = vld [vmem:[%s2413_s1 + $0x2] sm:$0x3] }
 0x24d   :  { %v159_v19 = vsel %vm62_vm0, %v158_v18, 0.0 }
 0x24e   :  { %160 = vadd.xlane.f32.xlu1 %v159_v19 }
 0x2c1   :  { %v161_v20 = vpop.xlane.xlu1 %160 }
 0x2c2   :  { %v162_v21 = vmul.f32 %v161_v20, %v1819_v27 }
 0x2c4   :  { %v163_v22 = vsub.f32 %v158_v18, %v162_v21 }
 0x2c6   :  { %v164_v23 = vmul.f32 %v163_v22, %v163_v22 }
 0x2c8   :  { %v165_v24 = vsel %vm62_vm0, %v164_v23, 0.0 }
 0x2c9   :  { %166 = vadd.xlane.f32.xlu1 %v165_v24 }
 0x33c   :  { %v167_v25 = vpop.xlane.xlu1 %166 }
 0x33d   :  { %v168_v26 = vmul.f32 %v167_v25, %v1819_v27 }
 0x33f   :  { %v169_v28 = vadd.f32 1e-05, %v168_v26 }
 0x341   :  { %1641 = vrsqrt.f32 %v169_v28  ;;  %vm176_vm10 = vweird.f32 %v169_v28 }
 0x347   :  { %v1642_v29 = vpop.eup %1641 }
 0x348   :  { %v171_v30 = vmul.f32 %v1642_v29, %v169_v28  ;;  %vm177_vm9 = vweird.f32 %v1642_v29 }
 0x349   :  { %vm178_vm11 = vmor %vm176_vm10, %vm177_vm9 }
 0x34a   :  { %v172_v31 = vmul.f32 %v1642_v29, %v171_v30 }
 0x34c   :  { %v173_v32 = vmul.f32 0.5, %v172_v31 }
 0x34e   :  { %v174_v33 = vsub.f32 1.5, %v173_v32 }
 0x350   :  { %v175_v34 = vmul.f32 %v1642_v29, %v174_v33 }
 0x352   :  { %v179_v36 = vsel %vm178_vm11, %v1642_v29, %v175_v34 }
 0x353   :  { %v180_v38 = vmul.f32 %v179_v36, %v163_v22 }
 0x355   :  { %v182_v39 = vmul.f32 %v1968_v35, %v180_v38  ;;  %v1469_v38 = vld [vmem:[%s2410_s0 + $0x12] sm:$0x3] }
 0x357   :  { %v184_v41 = vadd.f32 %v1973_v37, %v182_v39 }
 0x359   :  { %v187_v42 = vmul.f32 %v1464_v40, %v184_v41 }
 0x35b   :  { %v188_v43 = vadd.f32 %v187_v42, %v118_v15 }
 0x35d   :  { %v1465_v44 = vmul.f32 -1.442695, %v188_v43 }
 0x35f   :  { %1643 = vpow2.f32 %v1465_v44 }
 0x365   :  { %v1644_v45 = vpop.eup %1643 }
 0x366   :  { %v192_v46 = vadd.f32 1.0, %v1644_v45 }
 0x368   :  { %1645 = vrcp.f32 %v192_v46  ;;  %v204_v50 = vand.u32 2147483648, %v192_v46  ;;  %v202_v52 = vand.u32 2147483647, %v192_v46  ;;  %vm198_vm13 = vweird.f32 %v192_v46 }
 0x36a   :  { %v205_v54 = vor.u32 1.1754944e-38, %v204_v50  ;;  %vm203_vm15 = vcmp.eq.f32.partialorder %v202_v52, 8.507059e+37 }
 0x36e   :  { %v1646_v47 = vpop.eup %1645 }
 0x36f   :  { %v194_v48 = vmul.f32 %v1646_v47, %v192_v46  ;;  %vm199_vm12 = vweird.f32 %v1646_v47 }
 0x370   :  { %vm200_vm14 = vmor %vm198_vm13, %vm199_vm12 }
 0x371   :  { %v195_v49 = vsub.f32 1.0, %v194_v48 }
 0x373   :  { %v196_v51 = vmul.f32 %v1646_v47, %v195_v49 }
 0x375   :  { %v197_v53 = vadd.f32 %v1646_v47, %v196_v51 }
 0x377   :  { %v201_v55 = vsel %vm200_vm14, %v1646_v47, %v197_v53 }
 0x378   :  { %v206_v56 = vsel %vm203_vm15, %v205_v54, %v201_v55 }
 0x379   :  { %v208_v57 = vmul.f32 %v206_v56, %v188_v43 }
 0x37b   :  { %209 = vst [vmem:[%s2414_s5] sm:$0x3] %v208_v57  ;;  %244 = vmatmul.f32.vlgmr.msra.gmra.mxu2 %v208_v57 }
 0x3fe   :  { %v245_v60 = vpop.f32.mrf.mxu2 }
 0x3ff   :  { %v248_v62 = vadd.f32 %v1466_v59, %v245_v60  ;;  %v1486_v60 = vld [vmem:[%s2413_s1 + $0x12] sm:$0x3] }
 0x401   :  { %v249_v63 = vsel %vm62_vm0, %v248_v62, 0.0 }
 0x402   :  { %250 = vadd.xlane.f32.xlu2 %v249_v63 }
 0x475   :  { %v251_v0 = vpop.xlane.xlu2 %250 }
 0x476   :  { %v252_v1 = vmul.f32 %v251_v0, %v1819_v27 }
 0x478   :  { %v253_v2 = vsub.f32 %v248_v62, %v252_v1 }
 0x47a   :  { %v254_v3 = vmul.f32 %v253_v2, %v253_v2 }
 0x47c   :  { %v255_v4 = vsel %vm62_vm0, %v254_v3, 0.0 }
 0x47d   :  { %256 = vadd.xlane.f32.xlu2 %v255_v4 }
 0x4f0   :  { %v257_v5 = vpop.xlane.xlu2 %256 }
 0x4f1   :  { %v258_v6 = vmul.f32 %v257_v5, %v1819_v27 }
 0x4f3   :  { %v259_v7 = vadd.f32 1e-05, %v258_v6 }
 0x4f5   :  { %1647 = vrsqrt.f32 %v259_v7  ;;  %vm266_vm2 = vweird.f32 %v259_v7 }
 0x4fb   :  { %v1648_v8 = vpop.eup %1647 }
 0x4fc   :  { %v261_v9 = vmul.f32 %v1648_v8, %v259_v7  ;;  %vm267_vm1 = vweird.f32 %v1648_v8 }
 0x4fd   :  { %vm268_vm3 = vmor %vm266_vm2, %vm267_vm1 }
 0x4fe   :  { %v262_v10 = vmul.f32 %v1648_v8, %v261_v9 }
 0x500   :  { %v263_v11 = vmul.f32 0.5, %v262_v10 }
 0x502   :  { %v264_v12 = vsub.f32 1.5, %v263_v11 }
 0x504   :  { %v265_v13 = vmul.f32 %v1648_v8, %v264_v12 }
 0x506   :  { %v269_v14 = vsel %vm268_vm3, %v1648_v8, %v265_v13 }
 0x507   :  { %v270_v15 = vmul.f32 %v269_v14, %v253_v2 }
 0x509   :  { %v271_v16 = vmul.f32 %v1923_v58, %v270_v15  ;;  %v1489_v15 = vld [vmem:[%s2410_s0 + $0x4] sm:$0x3] }
 0x50b   :  { %v272_v18 = vadd.f32 %v1931_v61, %v271_v16 }
 0x50d   :  { %v275_v19 = vmul.f32 %v1467_v17, %v272_v18 }
 0x50f   :  { %v276_v20 = vadd.f32 %v275_v19, %v208_v57 }
 0x511   :  { %v1468_v21 = vmul.f32 -1.442695, %v276_v20 }
 0x513   :  { %1649 = vpow2.f32 %v1468_v21 }
 0x519   :  { %v1650_v22 = vpop.eup %1649 }
 0x51a   :  { %v280_v23 = vadd.f32 1.0, %v1650_v22 }
 0x51c   :  { %1651 = vrcp.f32 %v280_v23  ;;  %v292_v28 = vand.u32 2147483648, %v280_v23  ;;  %v290_v30 = vand.u32 2147483647, %v280_v23  ;;  %vm286_vm5 = vweird.f32 %v280_v23 }
 0x51e   :  { %v293_v32 = vor.u32 1.1754944e-38, %v292_v28  ;;  %vm291_vm7 = vcmp.eq.f32.partialorder %v290_v30, 8.507059e+37 }
 0x522   :  { %v1652_v24 = vpop.eup %1651 }
 0x523   :  { %v282_v25 = vmul.f32 %v1652_v24, %v280_v23  ;;  %vm287_vm4 = vweird.f32 %v1652_v24 }
 0x524   :  { %vm288_vm6 = vmor %vm286_vm5, %vm287_vm4 }
 0x525   :  { %v283_v26 = vsub.f32 1.0, %v282_v25 }
 0x527   :  { %v284_v29 = vmul.f32 %v1652_v24, %v283_v26 }
 0x529   :  { %v285_v31 = vadd.f32 %v1652_v24, %v284_v29 }
 0x52b   :  { %v289_v33 = vsel %vm288_vm6, %v1652_v24, %v285_v31 }
 0x52c   :  { %v294_v34 = vsel %vm291_vm7, %v293_v32, %v289_v33 }
 0x52d   :  { %v296_v36 = vmul.f32 %v294_v34, %v276_v20 }
 0x52f   :  { %331 = vmatmul.f32.vlgmr.msra.gmra.mxu3 %v296_v36 }
 0x5b2   :  { %v332_v39 = vpop.f32.mrf.mxu3 }
 0x5b3   :  { %v335_v40 = vadd.f32 %v1469_v38, %v332_v39  ;;  %v1490_v39 = vld [vmem:[%s2413_s1 + $0x4] sm:$0x3] }
 0x5b5   :  { %v336_v41 = vsel %vm62_vm0, %v335_v40, 0.0 }
 0x5b6   :  { %337 = vadd.xlane.f32.xlu0 %v336_v41 }
 0x629   :  { %v338_v42 = vpop.xlane.xlu0 %337 }
 0x62a   :  { %v339_v43 = vmul.f32 %v338_v42, %v1819_v27 }
 0x62c   :  { %v340_v44 = vsub.f32 %v335_v40, %v339_v43 }
 0x62e   :  { %v341_v45 = vmul.f32 %v340_v44, %v340_v44 }
 0x630   :  { %v342_v46 = vsel %vm62_vm0, %v341_v45, 0.0 }
 0x631   :  { %343 = vadd.xlane.f32.xlu1 %v342_v46 }
 0x6a4   :  { %v344_v47 = vpop.xlane.xlu1 %343 }
 0x6a5   :  { %v345_v48 = vmul.f32 %v344_v47, %v1819_v27 }
 0x6a7   :  { %v346_v49 = vadd.f32 1e-05, %v345_v48 }
 0x6a9   :  { %1653 = vrsqrt.f32 %v346_v49  ;;  %vm353_vm9 = vweird.f32 %v346_v49 }
 0x6af   :  { %v1654_v50 = vpop.eup %1653 }
 0x6b0   :  { %v348_v51 = vmul.f32 %v1654_v50, %v346_v49  ;;  %vm354_vm8 = vweird.f32 %v1654_v50 }
 0x6b1   :  { %vm355_vm10 = vmor %vm353_vm9, %vm354_vm8 }
 0x6b2   :  { %v349_v52 = vmul.f32 %v1654_v50, %v348_v51 }
 0x6b4   :  { %v350_v53 = vmul.f32 0.5, %v349_v52 }
 0x6b6   :  { %v351_v54 = vsub.f32 1.5, %v350_v53 }
 0x6b8   :  { %v352_v55 = vmul.f32 %v1654_v50, %v351_v54 }
 0x6ba   :  { %v356_v56 = vsel %vm355_vm10, %v1654_v50, %v352_v55 }
 0x6bb   :  { %v357_v57 = vmul.f32 %v356_v56, %v340_v44 }
 0x6bd   :  { %v358_v59 = vmul.f32 %v1968_v35, %v357_v57  ;;  %v1492_v57 = vld [vmem:[%s2410_s0 + $0x14] sm:$0x3] }
 0x6bf   :  { %v359_v62 = vadd.f32 %v1973_v37, %v358_v59 }
 0x6c1   :  { %v362_v63 = vmul.f32 %v1486_v60, %v359_v62 }
 0x6c3   :  { %v363_v0 = vadd.f32 %v362_v63, %v296_v36 }
 0x6c5   :  { %v1487_v1 = vmul.f32 -1.442695, %v363_v0 }
 0x6c7   :  { %1655 = vpow2.f32 %v1487_v1 }
 0x6cd   :  { %v1656_v2 = vpop.eup %1655 }
 0x6ce   :  { %v367_v3 = vadd.f32 1.0, %v1656_v2 }
 0x6d0   :  { %1657 = vrcp.f32 %v367_v3  ;;  %v379_v7 = vand.u32 2147483648, %v367_v3  ;;  %v377_v9 = vand.u32 2147483647, %v367_v3  ;;  %vm373_vm12 = vweird.f32 %v367_v3 }
 0x6d2   :  { %v380_v11 = vor.u32 1.1754944e-38, %v379_v7  ;;  %vm378_vm14 = vcmp.eq.f32.partialorder %v377_v9, 8.507059e+37 }
 0x6d6   :  { %v1658_v4 = vpop.eup %1657 }
 0x6d7   :  { %v369_v5 = vmul.f32 %v1658_v4, %v367_v3  ;;  %vm374_vm11 = vweird.f32 %v1658_v4 }
 0x6d8   :  { %vm375_vm13 = vmor %vm373_vm12, %vm374_vm11 }
 0x6d9   :  { %v370_v6 = vsub.f32 1.0, %v369_v5 }
 0x6db   :  { %v371_v8 = vmul.f32 %v1658_v4, %v370_v6 }
 0x6dd   :  { %v372_v10 = vadd.f32 %v1658_v4, %v371_v8 }
 0x6df   :  { %v376_v12 = vsel %vm375_vm13, %v1658_v4, %v372_v10 }
 0x6e0   :  { %v381_v13 = vsel %vm378_vm14, %v380_v11, %v376_v12 }
 0x6e1   :  { %v383_v14 = vmul.f32 %v381_v13, %v363_v0 }
 0x6e3   :  { %1488 = vst [vmem:[%s2414_s5 + $0x2] sm:$0x3] %v383_v14  ;;  %420 = vmatmul.f32.vlgmr.msrb.gmra.mxu0 %v383_v14 }
 0x760   :  { %v421_v16 = vpop.f32.mrf.mxu0 }
 0x761   :  { %v424_v17 = vadd.f32 %v1489_v15, %v421_v16  ;;  %v1509_v16 = vld [vmem:[%s2413_s1 + $0x14] sm:$0x3] }
 0x763   :  { %v425_v18 = vsel %vm62_vm0, %v424_v17, 0.0 }
 0x764   :  { %426 = vadd.xlane.f32.xlu2 %v425_v18 }
 0x7d7   :  { %v427_v19 = vpop.xlane.xlu2 %426 }
 0x7d8   :  { %v428_v20 = vmul.f32 %v427_v19, %v1819_v27 }
 0x7da   :  { %v429_v21 = vsub.f32 %v424_v17, %v428_v20 }
 0x7dc   :  { %v430_v22 = vmul.f32 %v429_v21, %v429_v21 }
 0x7de   :  { %v431_v23 = vsel %vm62_vm0, %v430_v22, 0.0 }
 0x7df   :  { %432 = vadd.xlane.f32.xlu0 %v431_v23 }
 0x852   :  { %v433_v24 = vpop.xlane.xlu0 %432 }
 0x853   :  { %v434_v25 = vmul.f32 %v433_v24, %v1819_v27 }
 0x855   :  { %v435_v26 = vadd.f32 1e-05, %v434_v25 }
 0x857   :  { %1659 = vrsqrt.f32 %v435_v26  ;;  %vm442_vm1 = vweird.f32 %v435_v26 }
 0x85d   :  { %v1660_v28 = vpop.eup %1659 }
 0x85e   :  { %v437_v29 = vmul.f32 %v1660_v28, %v435_v26  ;;  %vm443_vm15 = vweird.f32 %v1660_v28 }
 0x85f   :  { %vm444_vm2 = vmor %vm442_vm1, %vm443_vm15 }
 0x860   :  { %v438_v30 = vmul.f32 %v1660_v28, %v437_v29 }
 0x862   :  { %v439_v31 = vmul.f32 0.5, %v438_v30 }
 0x864   :  { %v440_v32 = vsub.f32 1.5, %v439_v31 }
 0x866   :  { %v441_v33 = vmul.f32 %v1660_v28, %v440_v32 }
 0x868   :  { %v445_v34 = vsel %vm444_vm2, %v1660_v28, %v441_v33 }
 0x869   :  { %v446_v36 = vmul.f32 %v445_v34, %v429_v21 }
 0x86b   :  { %v447_v38 = vmul.f32 %v1923_v58, %v446_v36  ;;  %v1512_v36 = vld [vmem:[%s2410_s0 + $0x6] sm:$0x3] }
 0x86d   :  { %v448_v40 = vadd.f32 %v1931_v61, %v447_v38 }
 0x86f   :  { %v451_v41 = vmul.f32 %v1490_v39, %v448_v40 }
 0x871   :  { %v452_v42 = vadd.f32 %v451_v41, %v383_v14 }
 0x873   :  { %v1491_v43 = vmul.f32 -1.442695, %v452_v42 }
 0x875   :  { %1661 = vpow2.f32 %v1491_v43 }
 0x87b   :  { %v1662_v44 = vpop.eup %1661 }
 0x87c   :  { %v456_v45 = vadd.f32 1.0, %v1662_v44 }
 0x87e   :  { %1663 = vrcp.f32 %v456_v45  ;;  %v468_v49 = vand.u32 2147483648, %v456_v45  ;;  %v466_v51 = vand.u32 2147483647, %v456_v45  ;;  %vm462_vm4 = vweird.f32 %v456_v45 }
 0x880   :  { %v469_v53 = vor.u32 1.1754944e-38, %v468_v49  ;;  %vm467_vm6 = vcmp.eq.f32.partialorder %v466_v51, 8.507059e+37 }
 0x884   :  { %v1664_v46 = vpop.eup %1663 }
 0x885   :  { %v458_v47 = vmul.f32 %v1664_v46, %v456_v45  ;;  %vm463_vm3 = vweird.f32 %v1664_v46 }
 0x886   :  { %vm464_vm5 = vmor %vm462_vm4, %vm463_vm3 }
 0x887   :  { %v459_v48 = vsub.f32 1.0, %v458_v47 }
 0x889   :  { %v460_v50 = vmul.f32 %v1664_v46, %v459_v48 }
 0x88b   :  { %v461_v52 = vadd.f32 %v1664_v46, %v460_v50 }
 0x88d   :  { %v465_v54 = vsel %vm464_vm5, %v1664_v46, %v461_v52 }
 0x88e   :  { %v470_v55 = vsel %vm467_vm6, %v469_v53, %v465_v54 }
 0x88f   :  { %v472_v56 = vmul.f32 %v470_v55, %v452_v42 }
 0x891   :  { %507 = vmatmul.f32.vlgmr.msrb.gmra.mxu1 %v472_v56 }
 0x90e   :  { %v508_v59 = vpop.f32.mrf.mxu1 }
 0x90f   :  { %v511_v60 = vadd.f32 %v1492_v57, %v508_v59  ;;  %v1513_v59 = vld [vmem:[%s2413_s1 + $0x6] sm:$0x3] }
 0x911   :  { %v512_v62 = vsel %vm62_vm0, %v511_v60, 0.0 }
 0x912   :  { %513 = vadd.xlane.f32.xlu1 %v512_v62 }
 0x985   :  { %v514_v63 = vpop.xlane.xlu1 %513 }
 0x986   :  { %v515_v0 = vmul.f32 %v514_v63, %v1819_v27 }
 0x988   :  { %v516_v1 = vsub.f32 %v511_v60, %v515_v0 }
 0x98a   :  { %v517_v2 = vmul.f32 %v516_v1, %v516_v1 }
 0x98c   :  { %v518_v3 = vsel %vm62_vm0, %v517_v2, 0.0 }
 0x98d   :  { %519 = vadd.xlane.f32.xlu2 %v518_v3 }
 0xa00   :  { %v520_v4 = vpop.xlane.xlu2 %519 }
 0xa01   :  { %v521_v5 = vmul.f32 %v520_v4, %v1819_v27 }
 0xa03   :  { %v522_v6 = vadd.f32 1e-05, %v521_v5 }
 0xa05   :  { %1665 = vrsqrt.f32 %v522_v6  ;;  %vm529_vm8 = vweird.f32 %v522_v6 }
 0xa0b   :  { %v1666_v7 = vpop.eup %1665 }
 0xa0c   :  { %v524_v8 = vmul.f32 %v1666_v7, %v522_v6  ;;  %vm530_vm7 = vweird.f32 %v1666_v7 }
 0xa0d   :  { %vm531_vm9 = vmor %vm529_vm8, %vm530_vm7 }
 0xa0e   :  { %v525_v9 = vmul.f32 %v1666_v7, %v524_v8 }
 0xa10   :  { %v526_v10 = vmul.f32 0.5, %v525_v9 }
 0xa12   :  { %v527_v11 = vsub.f32 1.5, %v526_v10 }
 0xa14   :  { %v528_v12 = vmul.f32 %v1666_v7, %v527_v11 }
 0xa16   :  { %v532_v13 = vsel %vm531_vm9, %v1666_v7, %v528_v12  ;;  %v1515_v12 = vld [vmem:[%s2410_s0 + $0x16] sm:$0x3] }
 0xa17   :  { %v533_v14 = vmul.f32 %v532_v13, %v516_v1 }
 0xa19   :  { %v534_v15 = vmul.f32 %v1968_v35, %v533_v14 }
 0xa1b   :  { %v535_v17 = vadd.f32 %v1973_v37, %v534_v15 }
 0xa1d   :  { %v538_v18 = vmul.f32 %v1509_v16, %v535_v17 }
 0xa1f   :  { %v539_v19 = vadd.f32 %v538_v18, %v472_v56 }
 0xa21   :  { %v1510_v20 = vmul.f32 -1.442695, %v539_v19 }
 0xa23   :  { %1667 = vpow2.f32 %v1510_v20 }
 0xa29   :  { %v1668_v21 = vpop.eup %1667 }
 0xa2a   :  { %v543_v22 = vadd.f32 1.0, %v1668_v21  ;;  %v2065_v21 = vld [vmem:[%s2409_s2 + $0x78] sm:$0xff] }
 0xa2b   :  { %756 = vmatpush.msra.mxu0 %v2065_v21  ;;  %932 = vmatpush.msra.mxu2 %v2065_v21 }
 0xa2c   :  { %1669 = vrcp.f32 %v543_v22  ;;  %v555_v26 = vand.u32 2147483648, %v543_v22  ;;  %v553_v29 = vand.u32 2147483647, %v543_v22  ;;  %vm549_vm11 = vweird.f32 %v543_v22 }
 0xa2e   :  { %v556_v31 = vor.u32 1.1754944e-38, %v555_v26  ;;  %vm554_vm13 = vcmp.eq.f32.partialorder %v553_v29, 8.507059e+37  ;;  %v2099_v29 = vld [vmem:[%s2409_s2 + $0x50] sm:$0xff] }
 0xa32   :  { %v1670_v23 = vpop.eup %1669 }
 0xa33   :  { %v545_v24 = vmul.f32 %v1670_v23, %v543_v22  ;;  %vm550_vm10 = vweird.f32 %v1670_v23  ;;  %v2070_v22 = vld [vmem:[%s2409_s2 + $0x70] sm:$0xff] }
 0xa34   :  { %vm551_vm12 = vmor %vm549_vm11, %vm550_vm10  ;;  %757 = vmatpush.msra.mxu0 %v2070_v22  ;;  %933 = vmatpush.msra.mxu2 %v2070_v22 }
 0xa35   :  { %v546_v25 = vsub.f32 1.0, %v545_v24  ;;  %v2084_v24 = vld [vmem:[%s2409_s2 + $0x60] sm:$0xff] }
 0xa37   :  { %v547_v28 = vmul.f32 %v1670_v23, %v546_v25  ;;  %v2091_v25 = vld [vmem:[%s2409_s2 + $0x58] sm:$0xff] }
 0xa39   :  { %v548_v30 = vadd.f32 %v1670_v23, %v547_v28 }
 0xa3b   :  { %v552_v32 = vsel %vm551_vm12, %v1670_v23, %v548_v30  ;;  %v2077_v23 = vld [vmem:[%s2409_s2 + $0x68] sm:$0xff] }
 0xa3c   :  { %v557_v33 = vsel %vm554_vm13, %v556_v31, %v552_v32  ;;  %758 = vmatpush.msra.mxu0 %v2077_v23  ;;  %934 = vmatpush.msra.mxu2 %v2077_v23  ;;  %v2106_v31 = vld [vmem:[%s2409_s2 + $0x48] sm:$0xff]  ;;  %v748_v32 = vld [vmem:[%s2409_s2 + $0x40] sm:$0xff] }
 0xa3d   :  { %v559_v34 = vmul.f32 %v557_v33, %v539_v19  ;;  %v747_v33 = vld [vmem:[%s2409_s2 + $0x38] sm:$0xff] }
 0xa3e   :  { %759 = vmatpush.msra.mxu0 %v2084_v24  ;;  %935 = vmatpush.msra.mxu2 %v2084_v24 }
 0xa3f   :  { %1511 = vst [vmem:[%s2414_s5 + $0x4] sm:$0x3] %v559_v34  ;;  %596 = vmatmul.f32.vlgmr.msrb.gmra.mxu2 %v559_v34 }
 0xa40   :  { %760 = vmatpush.msra.mxu0 %v2091_v25  ;;  %936 = vmatpush.msra.mxu2 %v2091_v25 }
 0xa42   :  { %761 = vmatpush.msra.mxu0 %v2099_v29  ;;  %937 = vmatpush.msra.mxu2 %v2099_v29 }
 0xa44   :  { %762 = vmatpush.msra.mxu0 %v2106_v31  ;;  %938 = vmatpush.msra.mxu2 %v2106_v31 }
 0xa46   :  { %763 = vmatpush.msra.mxu0 %v748_v32  ;;  %939 = vmatpush.msra.mxu2 %v748_v32 }
 0xa48   :  { %764 = vmatpush.msra.mxu0 %v747_v33  ;;  %940 = vmatpush.msra.mxu2 %v747_v33 }
 0xac2   :  { %v597_v38 = vpop.f32.mrf.mxu2 }
 0xac3   :  { %v600_v39 = vadd.f32 %v1512_v36, %v597_v38  ;;  %v745_v38 = vld [vmem:[%s2409_s2 + $0x28] sm:$0xff] }
 0xac5   :  { %v601_v40 = vsel %vm62_vm0, %v600_v39, 0.0 }
 0xac6   :  { %602 = vadd.xlane.f32.xlu0 %v601_v40  ;;  %v744_v40 = vld [vmem:[%s2409_s2 + $0x20] sm:$0xff] }
 0xb39   :  { %v603_v41 = vpop.xlane.xlu0 %602 }
 0xb3a   :  { %v604_v42 = vmul.f32 %v603_v41, %v1819_v27 }
 0xb3c   :  { %v605_v43 = vsub.f32 %v600_v39, %v604_v42  ;;  %v743_v42 = vld [vmem:[%s2409_s2 + $0x18] sm:$0xff] }
 0xb3e   :  { %v606_v44 = vmul.f32 %v605_v43, %v605_v43 }
 0xb40   :  { %v607_v45 = vsel %vm62_vm0, %v606_v44, 0.0  ;;  %v742_v44 = vld [vmem:[%s2409_s2 + $0x10] sm:$0xff] }
 0xb41   :  { %608 = vadd.xlane.f32.xlu1 %v607_v45 }
 0xbb4   :  { %v609_v46 = vpop.xlane.xlu1 %608 }
 0xbb5   :  { %v610_v47 = vmul.f32 %v609_v46, %v1819_v27  ;;  %v741_v46 = vld [vmem:[%s2409_s2 + $0x8] sm:$0xff] }
 0xbb7   :  { %v611_v48 = vadd.f32 1e-05, %v610_v47 }
 0xbb9   :  { %1671 = vrsqrt.f32 %v611_v48  ;;  %vm618_vm15 = vweird.f32 %v611_v48 }
 0xbbf   :  { %v1672_v49 = vpop.eup %1671 }
 0xbc0   :  { %v613_v50 = vmul.f32 %v1672_v49, %v611_v48  ;;  %vm619_vm14 = vweird.f32 %v1672_v49  ;;  %v740_v48 = vld [vmem:[%s2409_s2] sm:$0xff] }
 0xbc1   :  { %vm620_vm1 = vmor %vm618_vm15, %vm619_vm14 }
 0xbc2   :  { %v614_v51 = vmul.f32 %v1672_v49, %v613_v50 }
 0xbc4   :  { %v615_v52 = vmul.f32 0.5, %v614_v51 }
 0xbc6   :  { %v616_v53 = vsub.f32 1.5, %v615_v52  ;;  %v1532_v52 = vld [vmem:[%s2413_s1 + $0x16] sm:$0x3] }
 0xbc8   :  { %v617_v54 = vmul.f32 %v1672_v49, %v616_v53 }
 0xbca   :  { %v621_v55 = vsel %vm620_vm1, %v1672_v49, %v617_v54 }
 0xbcb   :  { %v622_v56 = vmul.f32 %v621_v55, %v605_v43 }
 0xbcd   :  { %v623_v57 = vmul.f32 %v1923_v58, %v622_v56 }
 0xbcf   :  { %v624_v60 = vadd.f32 %v1931_v61, %v623_v57 }
 0xbd1   :  { %v627_v62 = vmul.f32 %v1513_v59, %v624_v60 }
 0xbd3   :  { %v628_v63 = vadd.f32 %v627_v62, %v559_v34  ;;  %v746_v34 = vld [vmem:[%s2409_s2 + $0x30] sm:$0xff] }
 0xbd4   :  { %765 = vmatpush.msra.mxu0 %v746_v34  ;;  %941 = vmatpush.msra.mxu2 %v746_v34 }
 0xbd5   :  { %v1514_v0 = vmul.f32 -1.442695, %v628_v63 }
 0xbd6   :  { %766 = vmatpush.msra.mxu0 %v745_v38  ;;  %942 = vmatpush.msra.mxu2 %v745_v38 }
 0xbd7   :  { %1673 = vpow2.f32 %v1514_v0 }
 0xbd8   :  { %767 = vmatpush.msra.mxu0 %v744_v40  ;;  %943 = vmatpush.msra.mxu2 %v744_v40 }
 0xbda   :  { %768 = vmatpush.msra.mxu0 %v743_v42  ;;  %944 = vmatpush.msra.mxu2 %v743_v42 }
 0xbdc   :  { %769 = vmatpush.msra.mxu0 %v742_v44  ;;  %945 = vmatpush.msra.mxu2 %v742_v44 }
 0xbdd   :  { %v1674_v1 = vpop.eup %1673 }
 0xbde   :  { %v632_v2 = vadd.f32 1.0, %v1674_v1  ;;  %770 = vmatpush.msra.mxu0 %v741_v46  ;;  %946 = vmatpush.msra.mxu2 %v741_v46 }
 0xbe0   :  { %1675 = vrcp.f32 %v632_v2  ;;  %v644_v6 = vand.u32 2147483648, %v632_v2  ;;  %v642_v58 = vand.u32 2147483647, %v632_v2  ;;  %vm638_vm3 = vweird.f32 %v632_v2  ;;  %771 = vmatpush.msra.mxu0 %v740_v48  ;;  %947 = vmatpush.msra.mxu2 %v740_v48 }
 0xbe2   :  { %v645_v9 = vor.u32 1.1754944e-38, %v644_v6  ;;  %vm643_vm5 = vcmp.eq.f32.partialorder %v642_v58, 8.507059e+37  ;;  %1108 = vmatpush.msrb.mxu0 %v2065_v21  ;;  %1284 = vmatpush.msrb.mxu2 %v2065_v21  ;;  %v1535_v6 = vld [vmem:[%s2410_s0 + $0x8] sm:$0x3] }
 0xbe4   :  { %1109 = vmatpush.msrb.mxu0 %v2070_v22  ;;  %1285 = vmatpush.msrb.mxu2 %v2070_v22  ;;  %v2221_v22 = vld [vmem:[%s2409_s2 + $0xc8] sm:$0xff] }
 0xbe6   :  { %v1676_v3 = vpop.eup %1675  ;;  %1110 = vmatpush.msrb.mxu0 %v2077_v23  ;;  %1286 = vmatpush.msrb.mxu2 %v2077_v23  ;;  %v2228_v23 = vld [vmem:[%s2409_s2 + $0xc0] sm:$0xff] }
 0xbe7   :  { %v634_v4 = vmul.f32 %v1676_v3, %v632_v2  ;;  %vm639_vm2 = vweird.f32 %v1676_v3 }
 0xbe8   :  { %vm640_vm4 = vmor %vm638_vm3, %vm639_vm2  ;;  %1111 = vmatpush.msrb.mxu0 %v2084_v24  ;;  %1287 = vmatpush.msrb.mxu2 %v2084_v24  ;;  %v2235_v24 = vld [vmem:[%s2409_s2 + $0xb8] sm:$0xff] }
 0xbe9   :  { %v635_v5 = vsub.f32 1.0, %v634_v4 }
 0xbea   :  { %1112 = vmatpush.msrb.mxu0 %v2091_v25  ;;  %1288 = vmatpush.msrb.mxu2 %v2091_v25  ;;  %v2242_v25 = vld [vmem:[%s2409_s2 + $0xb0] sm:$0xff] }
 0xbeb   :  { %v636_v7 = vmul.f32 %v1676_v3, %v635_v5 }
 0xbec   :  { %1113 = vmatpush.msrb.mxu0 %v2099_v29  ;;  %1289 = vmatpush.msrb.mxu2 %v2099_v29 }
 0xbed   :  { %v637_v8 = vadd.f32 %v1676_v3, %v636_v7 }
 0xbee   :  { %1114 = vmatpush.msrb.mxu0 %v2106_v31  ;;  %1290 = vmatpush.msrb.mxu2 %v2106_v31 }
 0xbef   :  { %v641_v10 = vsel %vm640_vm4, %v1676_v3, %v637_v8 }
 0xbf0   :  { %v646_v61 = vsel %vm643_vm5, %v645_v9, %v641_v10  ;;  %1115 = vmatpush.msrb.mxu0 %v748_v32  ;;  %1291 = vmatpush.msrb.mxu2 %v748_v32  ;;  %v1542_v32 = vld [vmem:[%s2409_s2 + $0x98] sm:$0xff] }
 0xbf1   :  { %v2049_v11 = vmul.f32 %v646_v61, %v628_v63 }
 0xbf2   :  { %1116 = vmatpush.msrb.mxu0 %v747_v33  ;;  %1292 = vmatpush.msrb.mxu2 %v747_v33 }
 0xbf3   :  { %683 = vmatmul.f32.vlgmr.msrb.gmra.mxu3 %v2049_v11 }
 0xbf4   :  { %1117 = vmatpush.msrb.mxu0 %v746_v34  ;;  %1293 = vmatpush.msrb.mxu2 %v746_v34  ;;  %v1541_v34 = vld [vmem:[%s2409_s2 + $0x90] sm:$0xff] }
 0xbf6   :  { %1118 = vmatpush.msrb.mxu0 %v745_v38  ;;  %1294 = vmatpush.msrb.mxu2 %v745_v38  ;;  %v1540_v38 = vld [vmem:[%s2409_s2 + $0x88] sm:$0xff] }
 0xbf8   :  { %1119 = vmatpush.msrb.mxu0 %v744_v40  ;;  %1295 = vmatpush.msrb.mxu2 %v744_v40  ;;  %v1539_v40 = vld [vmem:[%s2409_s2 + $0x80] sm:$0xff] }
 0xbfa   :  { %1120 = vmatpush.msrb.mxu0 %v743_v42  ;;  %1296 = vmatpush.msrb.mxu2 %v743_v42 }
 0xbfc   :  { %1121 = vmatpush.msrb.mxu0 %v742_v44  ;;  %1297 = vmatpush.msrb.mxu2 %v742_v44 }
 0xbfe   :  { %1122 = vmatpush.msrb.mxu0 %v741_v46  ;;  %1298 = vmatpush.msrb.mxu2 %v741_v46  ;;  %v2281_v46 = vld [vmem:[%s2412_s4] ss:$0 sm:$0xff] }
 0xc00   :  { %1123 = vmatpush.msrb.mxu0 %v740_v48  ;;  %1299 = vmatpush.msrb.mxu2 %v740_v48 }
 0xc76   :  { %v684_v13 = vpop.f32.mrf.mxu3 }
 0xc77   :  { %v687_v14 = vadd.f32 %v1515_v12, %v684_v13  ;;  %v2180_v13 = vld [vmem:[%s2409_s2 + $0xf8] sm:$0xff] }
 0xc78   :  { %843 = vmatpush.msra.mxu1 %v2180_v13  ;;  %1019 = vmatpush.msra.mxu3 %v2180_v13 }
 0xc79   :  { %v688_v15 = vsel %vm62_vm0, %v687_v14, 0.0 }
 0xc7a   :  { %689 = vadd.xlane.f32.xlu2 %v688_v15  ;;  %v2192_v15 = vld [vmem:[%s2409_s2 + $0xe8] sm:$0xff] }
 0xced   :  { %v690_v16 = vpop.xlane.xlu2 %689 }
 0xcee   :  { %v691_v17 = vmul.f32 %v690_v16, %v1819_v27  ;;  %v2199_v16 = vld [vmem:[%s2409_s2 + $0xe0] sm:$0xff] }
 0xcf0   :  { %v2057_v18 = vsub.f32 %v687_v14, %v691_v17  ;;  %v2185_v14 = vld [vmem:[%s2409_s2 + $0xf0] sm:$0xff]  ;;  %v2206_v17 = vld [vmem:[%s2409_s2 + $0xd8] sm:$0xff] }
 0xcf1   :  { %844 = vmatpush.msra.mxu1 %v2185_v14  ;;  %1020 = vmatpush.msra.mxu3 %v2185_v14 }
 0xcf2   :  { %v693_v19 = vmul.f32 %v2057_v18, %v2057_v18 }
 0xcf3   :  { %845 = vmatpush.msra.mxu1 %v2192_v15  ;;  %1021 = vmatpush.msra.mxu3 %v2192_v15 }
 0xcf4   :  { %v694_v20 = vsel %vm62_vm0, %v693_v19, 0.0 }
 0xcf5   :  { %695 = vadd.xlane.f32.xlu0 %v694_v20  ;;  %846 = vmatpush.msra.mxu1 %v2199_v16  ;;  %v2214_v20 = vld [vmem:[%s2409_s2 + $0xd0] sm:$0xff] }
 0xcf6   :  { %1022 = vmatpush.msra.mxu3 %v2199_v16 }
 0xcf7   :  { %847 = vmatpush.msra.mxu1 %v2206_v17 }
 0xcf8   :  { %1023 = vmatpush.msra.mxu3 %v2206_v17 }
 0xcf9   :  { %848 = vmatpush.msra.mxu1 %v2214_v20 }
 0xcfa   :  { %1024 = vmatpush.msra.mxu3 %v2214_v20 }
 0xcfb   :  { %849 = vmatpush.msra.mxu1 %v2221_v22 }
 0xcfc   :  { %1025 = vmatpush.msra.mxu3 %v2221_v22 }
 0xcfd   :  { %850 = vmatpush.msra.mxu1 %v2228_v23 }
 0xcfe   :  { %1026 = vmatpush.msra.mxu3 %v2228_v23 }
 0xcff   :  { %851 = vmatpush.msra.mxu1 %v2235_v24 }
 0xd00   :  { %1027 = vmatpush.msra.mxu3 %v2235_v24 }
 0xd01   :  { %852 = vmatpush.msra.mxu1 %v2242_v25 }
 0xd02   :  { %1028 = vmatpush.msra.mxu3 %v2242_v25 }
 0xd68   :  { %v696_v26 = vpop.xlane.xlu0 %695 }
 0xd69   :  { %v697_v28 = vmul.f32 %v696_v26, %v1819_v27 }
 0xd6b   :  { %v698_v30 = vadd.f32 1e-05, %v697_v28  ;;  %v1544_v28 = vld [vmem:[%s2409_s2 + $0xa8] sm:$0xff] }
 0xd6c   :  { %853 = vmatpush.msra.mxu1 %v1544_v28  ;;  %1029 = vmatpush.msra.mxu3 %v1544_v28 }
 0xd6d   :  { %1677 = vrsqrt.f32 %v698_v30  ;;  %vm705_vm7 = vweird.f32 %v698_v30 }
 0xd73   :  { %v1678_v36 = vpop.eup %1677 }
 0xd74   :  { %v700_v39 = vmul.f32 %v1678_v36, %v698_v30  ;;  %vm706_vm6 = vweird.f32 %v1678_v36  ;;  %v1543_v30 = vld [vmem:[%s2409_s2 + $0xa0] sm:$0xff] }
 0xd75   :  { %vm707_vm8 = vmor %vm705_vm7, %vm706_vm6  ;;  %854 = vmatpush.msra.mxu1 %v1543_v30  ;;  %1030 = vmatpush.msra.mxu3 %v1543_v30 }
 0xd76   :  { %v701_v41 = vmul.f32 %v1678_v36, %v700_v39 }
 0xd77   :  { %855 = vmatpush.msra.mxu1 %v1542_v32  ;;  %1031 = vmatpush.msra.mxu3 %v1542_v32 }
 0xd78   :  { %v702_v43 = vmul.f32 0.5, %v701_v41 }
 0xd79   :  { %856 = vmatpush.msra.mxu1 %v1541_v34  ;;  %1032 = vmatpush.msra.mxu3 %v1541_v34 }
 0xd7a   :  { %v703_v45 = vsub.f32 1.5, %v702_v43  ;;  %v2270_v43 = vld [vmem:[%s2411_s3] ss:$0 sm:$0xff] }
 0xd7b   :  { %857 = vmatpush.msra.mxu1 %v1540_v38  ;;  %1033 = vmatpush.msra.mxu3 %v1540_v38 }
 0xd7c   :  { %v704_v47 = vmul.f32 %v1678_v36, %v703_v45  ;;  %v1536_v45 = vld [vmem:[%s2413_s1 + $0x8] sm:$0x3] }
 0xd7d   :  { %858 = vmatpush.msra.mxu1 %v1539_v40  ;;  %1034 = vmatpush.msra.mxu3 %v1539_v40 }
 0xd7e   :  { %v708_v49 = vsel %vm707_vm8, %v1678_v36, %v704_v47 }
 0xd7f   :  { %v709_v50 = vmul.f32 %v708_v49, %v2057_v18  ;;  %1195 = vmatpush.msrb.mxu1 %v2180_v13  ;;  %1371 = vmatpush.msrb.mxu3 %v2180_v13 }
 0xd81   :  { %v710_v51 = vmul.f32 %v1968_v35, %v709_v50  ;;  %1196 = vmatpush.msrb.mxu1 %v2185_v14  ;;  %1372 = vmatpush.msrb.mxu3 %v2185_v14 }
 0xd83   :  { %v711_v53 = vadd.f32 %v1973_v37, %v710_v51  ;;  %1197 = vmatpush.msrb.mxu1 %v2192_v15  ;;  %1373 = vmatpush.msrb.mxu3 %v2192_v15 }
 0xd85   :  { %v714_v54 = vmul.f32 %v1532_v52, %v711_v53  ;;  %1198 = vmatpush.msrb.mxu1 %v2199_v16  ;;  %1374 = vmatpush.msrb.mxu3 %v2199_v16 }
 0xd87   :  { %v715_v35 = vadd.f32 %v714_v54, %v2049_v11  ;;  %1199 = vmatpush.msrb.mxu1 %v2206_v17  ;;  %1375 = vmatpush.msrb.mxu3 %v2206_v17 }
 0xd89   :  { %v1533_v55 = vmul.f32 -1.442695, %v715_v35  ;;  %1200 = vmatpush.msrb.mxu1 %v2214_v20  ;;  %1376 = vmatpush.msrb.mxu3 %v2214_v20  ;;  %v1555_v20 = vld [vmem:[%s2413_s1 + $0x18] sm:$0x3] }
 0xd8b   :  { %1679 = vpow2.f32 %v1533_v55  ;;  %1201 = vmatpush.msrb.mxu1 %v2221_v22  ;;  %1377 = vmatpush.msrb.mxu3 %v2221_v22 }
 0xd8d   :  { %1202 = vmatpush.msrb.mxu1 %v2228_v23  ;;  %1378 = vmatpush.msrb.mxu3 %v2228_v23 }
 0xd8f   :  { %1203 = vmatpush.msrb.mxu1 %v2235_v24  ;;  %1379 = vmatpush.msrb.mxu3 %v2235_v24 }
 0xd91   :  { %v1680_v37 = vpop.eup %1679  ;;  %1204 = vmatpush.msrb.mxu1 %v2242_v25  ;;  %1380 = vmatpush.msrb.mxu3 %v2242_v25 }
 0xd92   :  { %v719_v56 = vadd.f32 1.0, %v1680_v37 }
 0xd93   :  { %1205 = vmatpush.msrb.mxu1 %v1544_v28  ;;  %1381 = vmatpush.msrb.mxu3 %v1544_v28 }
 0xd94   :  { %1681 = vrcp.f32 %v719_v56  ;;  %v731_v62 = vand.u32 2147483648, %v719_v56  ;;  %v729_v0 = vand.u32 2147483647, %v719_v56  ;;  %vm725_vm10 = vweird.f32 %v719_v56 }
 0xd95   :  { %1206 = vmatpush.msrb.mxu1 %v1543_v30  ;;  %1382 = vmatpush.msrb.mxu3 %v1543_v30 }
 0xd96   :  { %v732_v2 = vor.u32 1.1754944e-38, %v731_v62  ;;  %vm730_vm12 = vcmp.eq.f32.partialorder %v729_v0, 8.507059e+37  ;;  %v1538_v0 = vld [vmem:[%s2410_s0 + $0x18] sm:$0x3] }
 0xd97   :  { %1207 = vmatpush.msrb.mxu1 %v1542_v32  ;;  %1383 = vmatpush.msrb.mxu3 %v1542_v32 }
 0xd99   :  { %1208 = vmatpush.msrb.mxu1 %v1541_v34  ;;  %1384 = vmatpush.msrb.mxu3 %v1541_v34 }
 0xd9a   :  { %v1682_v57 = vpop.eup %1681 }
 0xd9b   :  { %v721_v59 = vmul.f32 %v1682_v57, %v719_v56  ;;  %vm726_vm9 = vweird.f32 %v1682_v57  ;;  %1209 = vmatpush.msrb.mxu1 %v1540_v38  ;;  %1385 = vmatpush.msrb.mxu3 %v1540_v38 }
 0xd9c   :  { %vm727_vm11 = vmor %vm725_vm10, %vm726_vm9 }
 0xd9d   :  { %v722_v60 = vsub.f32 1.0, %v721_v59  ;;  %1210 = vmatpush.msrb.mxu1 %v1539_v40  ;;  %1386 = vmatpush.msrb.mxu3 %v1539_v40 }
 0xd9f   :  { %v723_v63 = vmul.f32 %v1682_v57, %v722_v60 }
 0xda1   :  { %v724_v1 = vadd.f32 %v1682_v57, %v723_v63 }
 0xda3   :  { %v728_v3 = vsel %vm727_vm11, %v1682_v57, %v724_v1 }
 0xda4   :  { %v733_v4 = vsel %vm730_vm12, %v732_v2, %v728_v3 }
 0xda5   :  { %v2160_v5 = vmul.f32 %v733_v4, %v715_v35 }
 0xda7   :  { %1534 = vst [vmem:[%s2414_s5 + $0x6] sm:$0x3] %v2160_v5  ;;  %772 = vmatmul.f32.vlgmr.msra.gmra.mxu0 %v2160_v5 }
 0xe24   :  { %v773_v7 = vpop.f32.mrf.mxu0 }
 0xe25   :  { %v776_v58 = vadd.f32 %v1535_v6, %v773_v7 }
 0xe27   :  { %v777_v8 = vsel %vm62_vm0, %v776_v58, 0.0 }
 0xe28   :  { %778 = vadd.xlane.f32.xlu1 %v777_v8 }
 0xe9b   :  { %v779_v9 = vpop.xlane.xlu1 %778 }
 0xe9c   :  { %v780_v10 = vmul.f32 %v779_v9, %v1819_v27 }
 0xe9e   :  { %v2172_v61 = vsub.f32 %v776_v58, %v780_v10 }
 0xea0   :  { %v782_v11 = vmul.f32 %v2172_v61, %v2172_v61 }
 0xea2   :  { %v783_v12 = vsel %vm62_vm0, %v782_v11, 0.0 }
 0xea3   :  { %784 = vadd.xlane.f32.xlu2 %v783_v12 }
 0xf16   :  { %v785_v18 = vpop.xlane.xlu2 %784 }
 0xf17   :  { %v786_v19 = vmul.f32 %v785_v18, %v1819_v27  ;;  %v2313_v18 = vld [vmem:[%s2411_s3 + $0x1] ss:$0 sm:$0xff] }
 0xf19   :  { %v787_v21 = vadd.f32 1e-05, %v786_v19 }
 0xf1b   :  { %1683 = vrsqrt.f32 %v787_v21  ;;  %vm794_vm14 = vweird.f32 %v787_v21 }
 0xf21   :  { %v1684_v26 = vpop.eup %1683 }
 0xf22   :  { %v789_v29 = vmul.f32 %v1684_v26, %v787_v21  ;;  %vm795_vm13 = vweird.f32 %v1684_v26  ;;  %v2322_v21 = vld [vmem:[%s2412_s4 + $0x1] ss:$0 sm:$0xff] }
 0xf23   :  { %vm796_vm15 = vmor %vm794_vm14, %vm795_vm13 }
 0xf24   :  { %v790_v31 = vmul.f32 %v1684_v26, %v789_v29 }
 0xf26   :  { %v791_v33 = vmul.f32 0.5, %v790_v31 }
 0xf28   :  { %v792_v36 = vsub.f32 1.5, %v791_v33 }
 0xf2a   :  { %v793_v39 = vmul.f32 %v1684_v26, %v792_v36 }
 0xf2c   :  { %v797_v41 = vsel %vm796_vm15, %v1684_v26, %v793_v39 }
 0xf2d   :  { %v798_v42 = vmul.f32 %v797_v41, %v2172_v61 }
 0xf2f   :  { %v799_v44 = vmul.f32 %v2270_v43, %v798_v42  ;;  %v1558_v42 = vld [vmem:[%s2410_s0 + $0xa] sm:$0x3] }
 0xf31   :  { %v800_v47 = vadd.f32 %v2281_v46, %v799_v44 }
 0xf33   :  { %v803_v48 = vmul.f32 %v1536_v45, %v800_v47 }
 0xf35   :  { %v804_v49 = vadd.f32 %v803_v48, %v2160_v5 }
 0xf37   :  { %v1537_v50 = vmul.f32 -1.442695, %v804_v49 }
 0xf39   :  { %1685 = vpow2.f32 %v1537_v50 }
 0xf3f   :  { %v1686_v51 = vpop.eup %1685 }
 0xf40   :  { %v808_v52 = vadd.f32 1.0, %v1686_v51 }
 0xf42   :  { %1687 = vrcp.f32 %v808_v52  ;;  %v820_v55 = vand.u32 2147483648, %v808_v52  ;;  %v818_v56 = vand.u32 2147483647, %v808_v52  ;;  %vm814_vm2 = vweird.f32 %v808_v52 }
 0xf44   :  { %v821_v59 = vor.u32 1.1754944e-38, %v820_v55  ;;  %vm819_vm4 = vcmp.eq.f32.partialorder %v818_v56, 8.507059e+37 }
 0xf48   :  { %v1688_v53 = vpop.eup %1687 }
 0xf49   :  { %v810_v54 = vmul.f32 %v1688_v53, %v808_v52  ;;  %vm815_vm1 = vweird.f32 %v1688_v53 }
 0xf4a   :  { %vm816_vm3 = vmor %vm814_vm2, %vm815_vm1 }
 0xf4b   :  { %v811_v35 = vsub.f32 1.0, %v810_v54 }
 0xf4d   :  { %v812_v37 = vmul.f32 %v1688_v53, %v811_v35 }
 0xf4f   :  { %v813_v57 = vadd.f32 %v1688_v53, %v812_v37 }
 0xf51   :  { %v817_v60 = vsel %vm816_vm3, %v1688_v53, %v813_v57 }
 0xf52   :  { %v822_v62 = vsel %vm819_vm4, %v821_v59, %v817_v60 }
 0xf53   :  { %v824_v63 = vmul.f32 %v822_v62, %v804_v49 }
 0xf55   :  { %859 = vmatmul.f32.vlgmr.msra.gmra.mxu1 %v824_v63 }
 0xfd2   :  { %v860_v1 = vpop.f32.mrf.mxu1 }
 0xfd3   :  { %v863_v2 = vadd.f32 %v1538_v0, %v860_v1  ;;  %v1559_v1 = vld [vmem:[%s2413_s1 + $0xa] sm:$0x3] }
 0xfd5   :  { %v864_v3 = vsel %vm62_vm0, %v863_v2, 0.0 }
 0xfd6   :  { %865 = vadd.xlane.f32.xlu0 %v864_v3 }
0x1049   :  { %v866_v4 = vpop.xlane.xlu0 %865 }
0x104a   :  { %v867_v5 = vmul.f32 %v866_v4, %v1819_v27 }
0x104c   :  { %v868_v6 = vsub.f32 %v863_v2, %v867_v5 }
0x104e   :  { %v869_v7 = vmul.f32 %v868_v6, %v868_v6 }
0x1050   :  { %v870_v58 = vsel %vm62_vm0, %v869_v7, 0.0 }
0x1051   :  { %871 = vadd.xlane.f32.xlu1 %v870_v58 }
0x10c4   :  { %v872_v8 = vpop.xlane.xlu1 %871 }
0x10c5   :  { %v873_v9 = vmul.f32 %v872_v8, %v1819_v27 }
0x10c7   :  { %v874_v10 = vadd.f32 1e-05, %v873_v9 }
0x10c9   :  { %1689 = vrsqrt.f32 %v874_v10  ;;  %vm881_vm6 = vweird.f32 %v874_v10 }
0x10cf   :  { %v1690_v61 = vpop.eup %1689 }
0x10d0   :  { %v876_v11 = vmul.f32 %v1690_v61, %v874_v10  ;;  %vm882_vm5 = vweird.f32 %v1690_v61 }
0x10d1   :  { %vm883_vm7 = vmor %vm881_vm6, %vm882_vm5 }
0x10d2   :  { %v877_v12 = vmul.f32 %v1690_v61, %v876_v11 }
0x10d4   :  { %v878_v13 = vmul.f32 0.5, %v877_v12 }
0x10d6   :  { %v879_v14 = vsub.f32 1.5, %v878_v13 }
0x10d8   :  { %v880_v15 = vmul.f32 %v1690_v61, %v879_v14 }
0x10da   :  { %v884_v16 = vsel %vm883_vm7, %v1690_v61, %v880_v15 }
0x10db   :  { %v885_v17 = vmul.f32 %v884_v16, %v868_v6 }
0x10dd   :  { %v886_v19 = vmul.f32 %v2313_v18, %v885_v17  ;;  %v1561_v17 = vld [vmem:[%s2410_s0 + $0x1a] sm:$0x3] }
0x10df   :  { %v887_v22 = vadd.f32 %v2322_v21, %v886_v19 }
0x10e1   :  { %v890_v23 = vmul.f32 %v1555_v20, %v887_v22 }
0x10e3   :  { %v891_v24 = vadd.f32 %v890_v23, %v824_v63 }
0x10e5   :  { %v1556_v25 = vmul.f32 -1.442695, %v891_v24 }
0x10e7   :  { %1691 = vpow2.f32 %v1556_v25 }
0x10ed   :  { %v1692_v26 = vpop.eup %1691 }
0x10ee   :  { %v895_v28 = vadd.f32 1.0, %v1692_v26 }
0x10f0   :  { %1693 = vrcp.f32 %v895_v28  ;;  %v907_v32 = vand.u32 2147483648, %v895_v28  ;;  %v905_v34 = vand.u32 2147483647, %v895_v28  ;;  %vm901_vm9 = vweird.f32 %v895_v28 }
0x10f2   :  { %v908_v38 = vor.u32 1.1754944e-38, %v907_v32  ;;  %vm906_vm11 = vcmp.eq.f32.partialorder %v905_v34, 8.507059e+37 }
0x10f6   :  { %v1694_v29 = vpop.eup %1693 }
0x10f7   :  { %v897_v30 = vmul.f32 %v1694_v29, %v895_v28  ;;  %vm902_vm8 = vweird.f32 %v1694_v29 }
0x10f8   :  { %vm903_vm10 = vmor %vm901_vm9, %vm902_vm8 }
0x10f9   :  { %v898_v31 = vsub.f32 1.0, %v897_v30 }
0x10fb   :  { %v899_v33 = vmul.f32 %v1694_v29, %v898_v31 }
0x10fd   :  { %v900_v36 = vadd.f32 %v1694_v29, %v899_v33 }
0x10ff   :  { %v904_v39 = vsel %vm903_vm10, %v1694_v29, %v900_v36 }
0x1100   :  { %v909_v40 = vsel %vm906_vm11, %v908_v38, %v904_v39 }
0x1101   :  { %v911_v41 = vmul.f32 %v909_v40, %v891_v24 }
0x1103   :  { %1557 = vst [vmem:[%s2414_s5 + $0x8] sm:$0x3] %v911_v41  ;;  %948 = vmatmul.f32.vlgmr.msra.gmra.mxu2 %v911_v41 }
0x1186   :  { %v949_v44 = vpop.f32.mrf.mxu2 }
0x1187   :  { %v952_v45 = vadd.f32 %v1558_v42, %v949_v44  ;;  %v1578_v44 = vld [vmem:[%s2413_s1 + $0x1a] sm:$0x3] }
0x1189   :  { %v953_v47 = vsel %vm62_vm0, %v952_v45, 0.0 }
0x118a   :  { %954 = vadd.xlane.f32.xlu2 %v953_v47 }
0x11fd   :  { %v955_v48 = vpop.xlane.xlu2 %954 }
0x11fe   :  { %v956_v49 = vmul.f32 %v955_v48, %v1819_v27 }
0x1200   :  { %v957_v50 = vsub.f32 %v952_v45, %v956_v49 }
0x1202   :  { %v958_v51 = vmul.f32 %v957_v50, %v957_v50 }
0x1204   :  { %v959_v52 = vsel %vm62_vm0, %v958_v51, 0.0 }
0x1205   :  { %960 = vadd.xlane.f32.xlu0 %v959_v52 }
0x1278   :  { %v961_v53 = vpop.xlane.xlu0 %960 }
0x1279   :  { %v962_v54 = vmul.f32 %v961_v53, %v1819_v27 }
0x127b   :  { %v963_v35 = vadd.f32 1e-05, %v962_v54 }
0x127d   :  { %1695 = vrsqrt.f32 %v963_v35  ;;  %vm970_vm13 = vweird.f32 %v963_v35 }
0x1283   :  { %v1696_v55 = vpop.eup %1695 }
0x1284   :  { %v965_v37 = vmul.f32 %v1696_v55, %v963_v35  ;;  %vm971_vm12 = vweird.f32 %v1696_v55 }
0x1285   :  { %vm972_vm14 = vmor %vm970_vm13, %vm971_vm12 }
0x1286   :  { %v966_v56 = vmul.f32 %v1696_v55, %v965_v37 }
0x1288   :  { %v967_v57 = vmul.f32 0.5, %v966_v56 }
0x128a   :  { %v968_v59 = vsub.f32 1.5, %v967_v57 }
0x128c   :  { %v969_v60 = vmul.f32 %v1696_v55, %v968_v59 }
0x128e   :  { %v973_v62 = vsel %vm972_vm14, %v1696_v55, %v969_v60 }
0x128f   :  { %v974_v63 = vmul.f32 %v973_v62, %v957_v50 }
0x1291   :  { %v975_v0 = vmul.f32 %v2270_v43, %v974_v63  ;;  %v1581_v63 = vld [vmem:[%s2410_s0 + $0xc] sm:$0x3] }
0x1293   :  { %v976_v2 = vadd.f32 %v2281_v46, %v975_v0 }
0x1295   :  { %v979_v3 = vmul.f32 %v1559_v1, %v976_v2 }
0x1297   :  { %v980_v4 = vadd.f32 %v979_v3, %v911_v41 }
0x1299   :  { %v1560_v5 = vmul.f32 -1.442695, %v980_v4 }
0x129b   :  { %1697 = vpow2.f32 %v1560_v5 }
0x12a1   :  { %v1698_v6 = vpop.eup %1697 }
0x12a2   :  { %v984_v7 = vadd.f32 1.0, %v1698_v6 }
0x12a4   :  { %1699 = vrcp.f32 %v984_v7  ;;  %v996_v10 = vand.u32 2147483648, %v984_v7  ;;  %v994_v11 = vand.u32 2147483647, %v984_v7  ;;  %vm990_vm1 = vweird.f32 %v984_v7 }
0x12a6   :  { %v997_v13 = vor.u32 1.1754944e-38, %v996_v10  ;;  %vm995_vm3 = vcmp.eq.f32.partialorder %v994_v11, 8.507059e+37 }
0x12aa   :  { %v1700_v58 = vpop.eup %1699 }
0x12ab   :  { %v986_v8 = vmul.f32 %v1700_v58, %v984_v7  ;;  %vm991_vm15 = vweird.f32 %v1700_v58 }
0x12ac   :  { %vm992_vm2 = vmor %vm990_vm1, %vm991_vm15 }
0x12ad   :  { %v987_v9 = vsub.f32 1.0, %v986_v8 }
0x12af   :  { %v988_v61 = vmul.f32 %v1700_v58, %v987_v9 }
0x12b1   :  { %v989_v12 = vadd.f32 %v1700_v58, %v988_v61 }
0x12b3   :  { %v993_v14 = vsel %vm992_vm2, %v1700_v58, %v989_v12 }
0x12b4   :  { %v998_v15 = vsel %vm995_vm3, %v997_v13, %v993_v14 }
0x12b5   :  { %v1000_v16 = vmul.f32 %v998_v15, %v980_v4 }
0x12b7   :  { %1035 = vmatmul.f32.vlgmr.msra.gmra.mxu3 %v1000_v16 }
0x133a   :  { %v1036_v19 = vpop.f32.mrf.mxu3 }
0x133b   :  { %v1039_v20 = vadd.f32 %v1561_v17, %v1036_v19  ;;  %v1582_v19 = vld [vmem:[%s2413_s1 + $0xc] sm:$0x3] }
0x133d   :  { %v1040_v22 = vsel %vm62_vm0, %v1039_v20, 0.0 }
0x133e   :  { %1041 = vadd.xlane.f32.xlu1 %v1040_v22 }
0x13b1   :  { %v1042_v23 = vpop.xlane.xlu1 %1041 }
0x13b2   :  { %v1043_v24 = vmul.f32 %v1042_v23, %v1819_v27 }
0x13b4   :  { %v1044_v25 = vsub.f32 %v1039_v20, %v1043_v24 }
0x13b6   :  { %v1045_v26 = vmul.f32 %v1044_v25, %v1044_v25 }
0x13b8   :  { %v1046_v28 = vsel %vm62_vm0, %v1045_v26, 0.0 }
0x13b9   :  { %1047 = vadd.xlane.f32.xlu2 %v1046_v28 }
0x142c   :  { %v1048_v29 = vpop.xlane.xlu2 %1047 }
0x142d   :  { %v1049_v30 = vmul.f32 %v1048_v29, %v1819_v27 }
0x142f   :  { %v1050_v31 = vadd.f32 1e-05, %v1049_v30 }
0x1431   :  { %1701 = vrsqrt.f32 %v1050_v31  ;;  %vm1057_vm5 = vweird.f32 %v1050_v31 }
0x1437   :  { %v1702_v32 = vpop.eup %1701 }
0x1438   :  { %v1052_v33 = vmul.f32 %v1702_v32, %v1050_v31  ;;  %vm1058_vm4 = vweird.f32 %v1702_v32 }
0x1439   :  { %vm1059_vm6 = vmor %vm1057_vm5, %vm1058_vm4 }
0x143a   :  { %v1053_v34 = vmul.f32 %v1702_v32, %v1052_v33 }
0x143c   :  { %v1054_v36 = vmul.f32 0.5, %v1053_v34 }
0x143e   :  { %v1055_v38 = vsub.f32 1.5, %v1054_v36 }
0x1440   :  { %v1056_v39 = vmul.f32 %v1702_v32, %v1055_v38 }
0x1442   :  { %v1060_v40 = vsel %vm1059_vm6, %v1702_v32, %v1056_v39 }
0x1443   :  { %v1061_v41 = vmul.f32 %v1060_v40, %v1044_v25 }
0x1445   :  { %v1062_v42 = vmul.f32 %v2313_v18, %v1061_v41  ;;  %v1584_v41 = vld [vmem:[%s2410_s0 + $0x1c] sm:$0x3] }
0x1447   :  { %v1063_v45 = vadd.f32 %v2322_v21, %v1062_v42 }
0x1449   :  { %v1066_v47 = vmul.f32 %v1578_v44, %v1063_v45 }
0x144b   :  { %v1067_v48 = vadd.f32 %v1066_v47, %v1000_v16 }
0x144d   :  { %v1579_v49 = vmul.f32 -1.442695, %v1067_v48 }
0x144f   :  { %1703 = vpow2.f32 %v1579_v49 }
0x1455   :  { %v1704_v50 = vpop.eup %1703 }
0x1456   :  { %v1071_v51 = vadd.f32 1.0, %v1704_v50 }
0x1458   :  { %1705 = vrcp.f32 %v1071_v51  ;;  %v1083_v35 = vand.u32 2147483648, %v1071_v51  ;;  %v1081_v37 = vand.u32 2147483647, %v1071_v51  ;;  %vm1077_vm8 = vweird.f32 %v1071_v51 }
0x145a   :  { %v1084_v57 = vor.u32 1.1754944e-38, %v1083_v35  ;;  %vm1082_vm10 = vcmp.eq.f32.partialorder %v1081_v37, 8.507059e+37 }
0x145e   :  { %v1706_v52 = vpop.eup %1705 }
0x145f   :  { %v1073_v53 = vmul.f32 %v1706_v52, %v1071_v51  ;;  %vm1078_vm7 = vweird.f32 %v1706_v52 }
0x1460   :  { %vm1079_vm9 = vmor %vm1077_vm8, %vm1078_vm7 }
0x1461   :  { %v1074_v54 = vsub.f32 1.0, %v1073_v53 }
0x1463   :  { %v1075_v55 = vmul.f32 %v1706_v52, %v1074_v54 }
0x1465   :  { %v1076_v56 = vadd.f32 %v1706_v52, %v1075_v55 }
0x1467   :  { %v1080_v59 = vsel %vm1079_vm9, %v1706_v52, %v1076_v56 }
0x1468   :  { %v1085_v60 = vsel %vm1082_vm10, %v1084_v57, %v1080_v59 }
0x1469   :  { %v1087_v62 = vmul.f32 %v1085_v60, %v1067_v48 }
0x146b   :  { %1580 = vst [vmem:[%s2414_s5 + $0xa] sm:$0x3] %v1087_v62  ;;  %1124 = vmatmul.f32.vlgmr.msrb.gmra.mxu0 %v1087_v62 }
0x14e8   :  { %v1125_v0 = vpop.f32.mrf.mxu0 }
0x14e9   :  { %v1128_v1 = vadd.f32 %v1581_v63, %v1125_v0  ;;  %v1601_v0 = vld [vmem:[%s2413_s1 + $0x1c] sm:$0x3] }
0x14eb   :  { %v1129_v2 = vsel %vm62_vm0, %v1128_v1, 0.0 }
0x14ec   :  { %1130 = vadd.xlane.f32.xlu0 %v1129_v2 }
0x155f   :  { %v1131_v3 = vpop.xlane.xlu0 %1130 }
0x1560   :  { %v1132_v4 = vmul.f32 %v1131_v3, %v1819_v27 }
0x1562   :  { %v1133_v5 = vsub.f32 %v1128_v1, %v1132_v4 }
0x1564   :  { %v1134_v6 = vmul.f32 %v1133_v5, %v1133_v5 }
0x1566   :  { %v1135_v7 = vsel %vm62_vm0, %v1134_v6, 0.0 }
0x1567   :  { %1136 = vadd.xlane.f32.xlu1 %v1135_v7 }
0x15da   :  { %v1137_v58 = vpop.xlane.xlu1 %1136 }
0x15db   :  { %v1138_v8 = vmul.f32 %v1137_v58, %v1819_v27 }
0x15dd   :  { %v1139_v9 = vadd.f32 1e-05, %v1138_v8 }
0x15df   :  { %1707 = vrsqrt.f32 %v1139_v9  ;;  %vm1146_vm12 = vweird.f32 %v1139_v9 }
0x15e5   :  { %v1708_v10 = vpop.eup %1707 }
0x15e6   :  { %v1141_v61 = vmul.f32 %v1708_v10, %v1139_v9  ;;  %vm1147_vm11 = vweird.f32 %v1708_v10 }
0x15e7   :  { %vm1148_vm13 = vmor %vm1146_vm12, %vm1147_vm11 }
0x15e8   :  { %v1142_v11 = vmul.f32 %v1708_v10, %v1141_v61 }
0x15ea   :  { %v1143_v12 = vmul.f32 0.5, %v1142_v11 }
0x15ec   :  { %v1144_v13 = vsub.f32 1.5, %v1143_v12 }
0x15ee   :  { %v1145_v14 = vmul.f32 %v1708_v10, %v1144_v13 }
0x15f0   :  { %v1149_v15 = vsel %vm1148_vm13, %v1708_v10, %v1145_v14 }
0x15f1   :  { %v1150_v16 = vmul.f32 %v1149_v15, %v1133_v5 }
0x15f3   :  { %v1151_v17 = vmul.f32 %v2270_v43, %v1150_v16  ;;  %v1604_v16 = vld [vmem:[%s2410_s0 + $0xe] sm:$0x3] }
0x15f5   :  { %v1152_v20 = vadd.f32 %v2281_v46, %v1151_v17 }
0x15f7   :  { %v1155_v22 = vmul.f32 %v1582_v19, %v1152_v20 }
0x15f9   :  { %v1156_v23 = vadd.f32 %v1155_v22, %v1087_v62 }
0x15fb   :  { %v1583_v24 = vmul.f32 -1.442695, %v1156_v23 }
0x15fd   :  { %1709 = vpow2.f32 %v1583_v24 }
0x1603   :  { %v1710_v25 = vpop.eup %1709 }
0x1604   :  { %v1160_v26 = vadd.f32 1.0, %v1710_v25 }
0x1606   :  { %1711 = vrcp.f32 %v1160_v26  ;;  %v1172_v31 = vand.u32 2147483648, %v1160_v26  ;;  %v1170_v33 = vand.u32 2147483647, %v1160_v26  ;;  %vm1166_vm15 = vweird.f32 %v1160_v26 }
0x1608   :  { %v1173_v36 = vor.u32 1.1754944e-38, %v1172_v31  ;;  %vm1171_vm2 = vcmp.eq.f32.partialorder %v1170_v33, 8.507059e+37 }
0x160c   :  { %v1712_v28 = vpop.eup %1711 }
0x160d   :  { %v1162_v29 = vmul.f32 %v1712_v28, %v1160_v26  ;;  %vm1167_vm14 = vweird.f32 %v1712_v28 }
0x160e   :  { %vm1168_vm1 = vmor %vm1166_vm15, %vm1167_vm14 }
0x160f   :  { %v1163_v30 = vsub.f32 1.0, %v1162_v29 }
0x1611   :  { %v1164_v32 = vmul.f32 %v1712_v28, %v1163_v30 }
0x1613   :  { %v1165_v34 = vadd.f32 %v1712_v28, %v1164_v32 }
0x1615   :  { %v1169_v38 = vsel %vm1168_vm1, %v1712_v28, %v1165_v34 }
0x1616   :  { %v1174_v39 = vsel %vm1171_vm2, %v1173_v36, %v1169_v38 }
0x1617   :  { %v1176_v40 = vmul.f32 %v1174_v39, %v1156_v23 }
0x1619   :  { %1211 = vmatmul.f32.vlgmr.msrb.gmra.mxu1 %v1176_v40 }
0x1696   :  { %v1212_v42 = vpop.f32.mrf.mxu1 }
0x1697   :  { %v1215_v44 = vadd.f32 %v1584_v41, %v1212_v42  ;;  %v1605_v42 = vld [vmem:[%s2413_s1 + $0xe] sm:$0x3] }
0x1699   :  { %v1216_v45 = vsel %vm62_vm0, %v1215_v44, 0.0 }
0x169a   :  { %1217 = vadd.xlane.f32.xlu2 %v1216_v45 }
0x170d   :  { %v1218_v47 = vpop.xlane.xlu2 %1217 }
0x170e   :  { %v1219_v48 = vmul.f32 %v1218_v47, %v1819_v27 }
0x1710   :  { %v1220_v49 = vsub.f32 %v1215_v44, %v1219_v48 }
0x1712   :  { %v1221_v50 = vmul.f32 %v1220_v49, %v1220_v49 }
0x1714   :  { %v1222_v51 = vsel %vm62_vm0, %v1221_v50, 0.0 }
0x1715   :  { %1223 = vadd.xlane.f32.xlu0 %v1222_v51 }
0x1788   :  { %v1224_v52 = vpop.xlane.xlu0 %1223 }
0x1789   :  { %v1225_v53 = vmul.f32 %v1224_v52, %v1819_v27 }
0x178b   :  { %v1226_v54 = vadd.f32 1e-05, %v1225_v53 }
0x178d   :  { %1713 = vrsqrt.f32 %v1226_v54  ;;  %vm1233_vm4 = vweird.f32 %v1226_v54 }
0x1793   :  { %v1714_v35 = vpop.eup %1713 }
0x1794   :  { %v1228_v55 = vmul.f32 %v1714_v35, %v1226_v54  ;;  %vm1234_vm3 = vweird.f32 %v1714_v35 }
0x1795   :  { %vm1235_vm5 = vmor %vm1233_vm4, %vm1234_vm3 }
0x1796   :  { %v1229_v37 = vmul.f32 %v1714_v35, %v1228_v55 }
0x1798   :  { %v1230_v56 = vmul.f32 0.5, %v1229_v37 }
0x179a   :  { %v1231_v57 = vsub.f32 1.5, %v1230_v56 }
0x179c   :  { %v1232_v59 = vmul.f32 %v1714_v35, %v1231_v57 }
0x179e   :  { %v1236_v60 = vsel %vm1235_vm5, %v1714_v35, %v1232_v59  ;;  %v1607_v59 = vld [vmem:[%s2410_s0 + $0x1e] sm:$0x3] }
0x179f   :  { %v1237_v62 = vmul.f32 %v1236_v60, %v1220_v49 }
0x17a1   :  { %v1238_v63 = vmul.f32 %v2313_v18, %v1237_v62 }
0x17a3   :  { %v1239_v1 = vadd.f32 %v2322_v21, %v1238_v63 }
0x17a5   :  { %v1242_v2 = vmul.f32 %v1601_v0, %v1239_v1 }
0x17a7   :  { %v1243_v3 = vadd.f32 %v1242_v2, %v1176_v40 }
0x17a9   :  { %v1602_v4 = vmul.f32 -1.442695, %v1243_v3 }
0x17ab   :  { %1715 = vpow2.f32 %v1602_v4 }
0x17b1   :  { %v1716_v5 = vpop.eup %1715 }
0x17b2   :  { %v1247_v6 = vadd.f32 1.0, %v1716_v5 }
0x17b4   :  { %1717 = vrcp.f32 %v1247_v6  ;;  %v1259_v9 = vand.u32 2147483648, %v1247_v6  ;;  %v1257_v61 = vand.u32 2147483647, %v1247_v6  ;;  %vm1253_vm7 = vweird.f32 %v1247_v6 }
0x17b6   :  { %v1260_v12 = vor.u32 1.1754944e-38, %v1259_v9  ;;  %vm1258_vm9 = vcmp.eq.f32.partialorder %v1257_v61, 8.507059e+37 }
0x17ba   :  { %v1718_v7 = vpop.eup %1717 }
0x17bb   :  { %v1249_v58 = vmul.f32 %v1718_v7, %v1247_v6  ;;  %vm1254_vm6 = vweird.f32 %v1718_v7 }
0x17bc   :  { %vm1255_vm8 = vmor %vm1253_vm7, %vm1254_vm6 }
0x17bd   :  { %v1250_v8 = vsub.f32 1.0, %v1249_v58 }
0x17bf   :  { %v1251_v10 = vmul.f32 %v1718_v7, %v1250_v8 }
0x17c1   :  { %v1252_v11 = vadd.f32 %v1718_v7, %v1251_v10 }
0x17c3   :  { %v1256_v13 = vsel %vm1255_vm8, %v1718_v7, %v1252_v11 }
0x17c4   :  { %v1261_v14 = vsel %vm1258_vm9, %v1260_v12, %v1256_v13 }
0x17c5   :  { %v1263_v15 = vmul.f32 %v1261_v14, %v1243_v3 }
0x17c7   :  { %1603 = vst [vmem:[%s2414_s5 + $0xc] sm:$0x3] %v1263_v15  ;;  %1300 = vmatmul.f32.vlgmr.msrb.gmra.mxu2 %v1263_v15 }
0x184a   :  { %v1301_v17 = vpop.f32.mrf.mxu2 }
0x184b   :  { %v1304_v19 = vadd.f32 %v1604_v16, %v1301_v17 }
0x184d   :  { %v1305_v20 = vsel %vm62_vm0, %v1304_v19, 0.0 }
0x184e   :  { %1306 = vadd.xlane.f32.xlu1 %v1305_v20 }
0x18c1   :  { %v1307_v22 = vpop.xlane.xlu1 %1306 }
0x18c2   :  { %v1308_v23 = vmul.f32 %v1307_v22, %v1819_v27 }
0x18c4   :  { %v1309_v24 = vsub.f32 %v1304_v19, %v1308_v23 }
0x18c6   :  { %v1310_v25 = vmul.f32 %v1309_v24, %v1309_v24 }
0x18c8   :  { %v1311_v26 = vsel %vm62_vm0, %v1310_v25, 0.0 }
0x18c9   :  { %1312 = vadd.xlane.f32.xlu2 %v1311_v26 }
0x193c   :  { %v1313_v28 = vpop.xlane.xlu2 %1312 }
0x193d   :  { %v1314_v29 = vmul.f32 %v1313_v28, %v1819_v27 }
0x193f   :  { %v1315_v30 = vadd.f32 1e-05, %v1314_v29 }
0x1941   :  { %1719 = vrsqrt.f32 %v1315_v30  ;;  %vm1322_vm11 = vweird.f32 %v1315_v30 }
0x1947   :  { %v1720_v31 = vpop.eup %1719 }
0x1948   :  { %v1317_v32 = vmul.f32 %v1720_v31, %v1315_v30  ;;  %vm1323_vm10 = vweird.f32 %v1720_v31 }
0x1949   :  { %vm1324_vm12 = vmor %vm1322_vm11, %vm1323_vm10 }
0x194a   :  { %v1318_v33 = vmul.f32 %v1720_v31, %v1317_v32 }
0x194c   :  { %v1319_v34 = vmul.f32 0.5, %v1318_v33 }
0x194e   :  { %v1320_v36 = vsub.f32 1.5, %v1319_v34 }
0x1950   :  { %v1321_v38 = vmul.f32 %v1720_v31, %v1320_v36 }
0x1952   :  { %v1325_v39 = vsel %vm1324_vm12, %v1720_v31, %v1321_v38 }
0x1953   :  { %v1326_v40 = vmul.f32 %v1325_v39, %v1309_v24 }
0x1955   :  { %v1327_v41 = vmul.f32 %v2270_v43, %v1326_v40 }
0x1957   :  { %v1328_v44 = vadd.f32 %v2281_v46, %v1327_v41 }
0x1959   :  { %v1331_v45 = vmul.f32 %v1605_v42, %v1328_v44 }
0x195b   :  { %v1332_v47 = vadd.f32 %v1331_v45, %v1263_v15  ;;  %v1624_v15 = vld [vmem:[%s2413_s1 + $0x1e] sm:$0x3] }
0x195d   :  { %v1606_v48 = vmul.f32 -1.442695, %v1332_v47 }
0x195f   :  { %1721 = vpow2.f32 %v1606_v48 }
0x1965   :  { %v1722_v49 = vpop.eup %1721 }
0x1966   :  { %v1336_v50 = vadd.f32 1.0, %v1722_v49 }
0x1968   :  { %1723 = vrcp.f32 %v1336_v50  ;;  %v1348_v54 = vand.u32 2147483648, %v1336_v50  ;;  %v1346_v43 = vand.u32 2147483647, %v1336_v50  ;;  %vm1342_vm14 = vweird.f32 %v1336_v50 }
0x196a   :  { %v1349_v37 = vor.u32 1.1754944e-38, %v1348_v54  ;;  %vm1347_vm1 = vcmp.eq.f32.partialorder %v1346_v43, 8.507059e+37 }
0x196e   :  { %v1724_v51 = vpop.eup %1723 }
0x196f   :  { %v1338_v52 = vmul.f32 %v1724_v51, %v1336_v50  ;;  %vm1343_vm13 = vweird.f32 %v1724_v51 }
0x1970   :  { %vm1344_vm15 = vmor %vm1342_vm14, %vm1343_vm13 }
0x1971   :  { %v1339_v53 = vsub.f32 1.0, %v1338_v52 }
0x1973   :  { %v1340_v35 = vmul.f32 %v1724_v51, %v1339_v53 }
0x1975   :  { %v1341_v55 = vadd.f32 %v1724_v51, %v1340_v35 }
0x1977   :  { %v1345_v56 = vsel %vm1344_vm15, %v1724_v51, %v1341_v55 }
0x1978   :  { %v1350_v46 = vsel %vm1347_vm1, %v1349_v37, %v1345_v56 }
0x1979   :  { %v1352_v57 = vmul.f32 %v1350_v46, %v1332_v47 }
0x197b   :  { %1387 = vmatmul.f32.vlgmr.msrb.gmra.mxu3 %v1352_v57 }
0x19fe   :  { %v1388_v60 = vpop.f32.mrf.mxu3 }
0x19ff   :  { %v1391_v62 = vadd.f32 %v1607_v59, %v1388_v60 }
0x1a01   :  { %v1392_v63 = vsel %vm62_vm0, %v1391_v62, 0.0 }
0x1a02   :  { %1393 = vadd.xlane.f32.xlu0 %v1392_v63 }
0x1a75   :  { %v1394_v0 = vpop.xlane.xlu0 %1393 }
0x1a76   :  { %v1395_v1 = vmul.f32 %v1394_v0, %v1819_v27 }
0x1a78   :  { %v1396_v2 = vsub.f32 %v1391_v62, %v1395_v1 }
0x1a7a   :  { %v1397_v3 = vmul.f32 %v1396_v2, %v1396_v2 }
0x1a7c   :  { %v1398_v4 = vsel %vm62_vm0, %v1397_v3, 0.0 }
0x1a7d   :  { %1399 = vadd.xlane.f32.xlu1 %v1398_v4 }
0x1af0   :  { %v1400_v5 = vpop.xlane.xlu1 %1399 }
0x1af1   :  { %v1401_v6 = vmul.f32 %v1400_v5, %v1819_v27 }
0x1af3   :  { %v1402_v7 = vadd.f32 1e-05, %v1401_v6 }
0x1af5   :  { %1725 = vrsqrt.f32 %v1402_v7  ;;  %vm1409_vm3 = vweird.f32 %v1402_v7 }
0x1afb   :  { %v1726_v58 = vpop.eup %1725 }
0x1afc   :  { %v1404_v8 = vmul.f32 %v1726_v58, %v1402_v7  ;;  %vm1410_vm2 = vweird.f32 %v1726_v58 }
0x1afd   :  { %vm1411_vm4 = vmor %vm1409_vm3, %vm1410_vm2 }
0x1afe   :  { %v1405_v9 = vmul.f32 %v1726_v58, %v1404_v8 }
0x1b00   :  { %v1406_v10 = vmul.f32 0.5, %v1405_v9 }
0x1b02   :  { %v1407_v61 = vsub.f32 1.5, %v1406_v10 }
0x1b04   :  { %v1408_v11 = vmul.f32 %v1726_v58, %v1407_v61 }
0x1b06   :  { %v1412_v12 = vsel %vm1411_vm4, %v1726_v58, %v1408_v11 }
0x1b07   :  { %v1413_v13 = vmul.f32 %v1412_v12, %v1396_v2 }
0x1b09   :  { %v1414_v14 = vmul.f32 %v2313_v18, %v1413_v13 }
0x1b0b   :  { %v1415_v27 = vadd.f32 %v2322_v21, %v1414_v14 }
0x1b0d   :  { %v1418_v16 = vmul.f32 %v1624_v15, %v1415_v27 }
0x1b0f   :  { %v1419_v17 = vadd.f32 %v1418_v16, %v1352_v57 }
0x1b11   :  { %v1625_v19 = vmul.f32 -1.442695, %v1419_v17 }
0x1b13   :  { %1727 = vpow2.f32 %v1625_v19 }
0x1b19   :  { %v1728_v20 = vpop.eup %1727 }
0x1b1a   :  { %v1423_v22 = vadd.f32 1.0, %v1728_v20 }
0x1b1c   :  { %1729 = vrcp.f32 %v1423_v22  ;;  %v1435_v26 = vand.u32 2147483648, %v1423_v22  ;;  %v1433_v18 = vand.u32 2147483647, %v1423_v22  ;;  %vm1429_vm5 = vweird.f32 %v1423_v22 }
0x1b1e   :  { %v1436_v30 = vor.u32 1.1754944e-38, %v1435_v26  ;;  %vm1434_vm7 = vcmp.eq.f32.partialorder %v1433_v18, 8.507059e+37 }
0x1b22   :  { %v1730_v23 = vpop.eup %1729 }
0x1b23   :  { %v1425_v24 = vmul.f32 %v1730_v23, %v1423_v22  ;;  %vm1430_vm0 = vweird.f32 %v1730_v23 }
0x1b24   :  { %vm1431_vm6 = vmor %vm1429_vm5, %vm1430_vm0 }
0x1b25   :  { %v1426_v25 = vsub.f32 1.0, %v1425_v24 }
0x1b27   :  { %v1427_v28 = vmul.f32 %v1730_v23, %v1426_v25 }
0x1b29   :  { %v1428_v29 = vadd.f32 %v1730_v23, %v1427_v28 }
0x1b2b   :  { %v1432_v31 = vsel %vm1431_vm6, %v1730_v23, %v1428_v29 }
0x1b2c   :  { %v1437_v21 = vsel %vm1434_vm7, %v1436_v30, %v1432_v31 }
0x1b2d   :  { %v1439_v32 = vmul.f32 %v1437_v21, %v1419_v17 }
0x1b2f   :  { %1626 = vst [vmem:[%s2414_s5 + $0xe] sm:$0x3] %v1439_v32 }

</bundles_post_ra>
